<compile_context>
chip_gen: v5e
topology: v5e:2x2
jax: 0.10.0
libtpu: 0.0.40
codegen_flags: <defaults>
</compile_context>

<pallas_src>
import numpy as np
import jax
import jax.numpy as jnp
from jax.experimental import pallas as pl
from jax.experimental.pallas import tpu as pltpu

LANE = 128      # TPU lane width; channel dims are padded to one lane group.


def _round_up(x, m):
    return (x + m - 1) // m * m


def _vmem_limit_bytes():
    """Per-generation VMEM budget: ~75% of capacity, capped at 100 MiB."""
    try:
        cap = int(pltpu.get_tpu_info().vmem_capacity_bytes)
    except Exception:
        cap = 64 * 1024 * 1024
    return min(cap * 3 // 4, 100 * 1024 * 1024)


def _pick_batch_tile(n, m_per_image):
    """Fold batch images into the matmul M dim until M >= 256 (MXU depth)."""
    bt = 1
    while bt < n and bt * m_per_image < 256 and n % (2 * bt) == 0:
        bt *= 2
    return bt


# ----------------------------------------------------------------------------
# Kernels
# ----------------------------------------------------------------------------
def _conv3x3_bn_relu(up, w_ref, scale, bias, out_dtype):
    """3x3 conv (pad=1) + folded-BN affine + ReLU on an in-VMEM activation.

    up     : (bt, H, W, Cin) bf16 value (Cin padded to LANE)
    w_ref  : (9*Cin, Cout) bf16 ref; tap t=ki*3+kj occupies rows [t*Cin,(t+1)*Cin)
    scale, bias : (1, Cout) f32 folded BN(+conv-bias) affine
    returns (bt, H, W, Cout) out_dtype

    Zero halo is built in VMEM (no HBM pad); the three kj-shifted views are
    lane-concatenated ONCE into (bt, H+2, W, 3*Cin); the three ki shifts are
    then free leading-dim row slices feeding three accumulated K=3*Cin MXU
    matmuls with f32 accumulation (no 9x im2col buffer).
    """
    bt, hh, ww, cin = up.shape
    cout = w_ref.shape[1]

    zc = jnp.zeros((bt, hh, 1, cin), up.dtype)
    xw = jnp.concatenate([zc, up, zc], axis=2)             # (bt, H, W+2, Cin)
    zr = jnp.zeros((bt, 1, ww + 2, cin), up.dtype)
    xp = jnp.concatenate([zr, xw, zr], axis=1)             # (bt, H+2, W+2, Cin)

    # TODO(synk): build the +-1 W shifts with pltpu.roll (XLU slot) instead of
    # sublane-offset slices.
    xw3 = jnp.concatenate([xp[:, :, kj:kj + ww, :] for kj in range(3)],
                          axis=-1)                         # (bt, H+2, W, 3*Cin)

    acc = jnp.zeros((bt * hh * ww, cout), jnp.float32)
    for ki in range(3):
        lhs = xw3[:, ki:ki + hh].reshape(bt * hh * ww, 3 * cin)
        acc = acc + jnp.dot(lhs, w_ref[ki * 3 * cin:(ki + 1) * 3 * cin, :],
                            preferred_element_type=jnp.float32)

    y = jnp.maximum(acc * scale + bias, 0.0)               # act = ReLU
    return y.reshape(bt, hh, ww, cout).astype(out_dtype)


def _conv_bn_relu_kernel(x_ref, w_ref, scale_ref, bias_ref, o_ref):
    o_ref[...] = _conv3x3_bn_relu(x_ref[...], w_ref, scale_ref[...],
                                  bias_ref[...], o_ref.dtype)


def _unpool_conv_bn_relu_kernel(x_ref, code_ref, w_ref, scale_ref, bias_ref,
                                o_ref):
    """MaxUnpool2d(2,2) fused with the first conv layer (unpool never hits HBM).

    x_ref    : (bt, h, w, Cin) pooled values (bf16)
    code_ref : (bt, h, w, Cin) int32 in-window code 2*a + b  (a, b in {0,1})
    o_ref    : (bt, 2h, 2w, Cout)

    Assumes (as MaxPool2d(2,2) guarantees) each index lies inside its own 2x2
    window; arbitrary out-of-window indices would be dropped.
    """
    bt, h, w, cin = x_ref.shape
    ups = []
    for bi in range(bt):                                   # bt is static, small
        xv = x_ref[bi]                                     # (h, w, Cin)
        cv = code_ref[bi]
        rows = []
        for a in (0, 1):
            cells = [jnp.where(cv == (2 * a + b), xv, jnp.zeros_like(xv))
                     for b in (0, 1)]
            # interleave along W: (h, w, 2, Cin) -> (h, 2w, Cin)
            rows.append(jnp.stack(cells, axis=2).reshape(h, 2 * w, cin))
        # interleave along H: (h, 2, 2w, Cin) -> (2h, 2w, Cin)
        # TODO(synk): replace the stack/reshape interleave with strided stores
        # into a VMEM scratch to skip the relayout pass (v5e: single vst slot).
        ups.append(jnp.stack(rows, axis=1).reshape(2 * h, 2 * w, cin))
    up = jnp.stack(ups, axis=0)                            # (bt, 2h, 2w, Cin)
    o_ref[...] = _conv3x3_bn_relu(up, w_ref, scale_ref[...], bias_ref[...],
                                  o_ref.dtype)


# ----------------------------------------------------------------------------
# pallas_call wrappers
# ----------------------------------------------------------------------------
def conv_bn_relu_pallas(x, w_packed, scale, bias):
    n, hh, ww, cin = x.shape
    k2, cout = w_packed.shape                              # k2 = 9*Cin
    bt = _pick_batch_tile(n, hh * ww)
    flops = int(2 * n * hh * ww * k2 * cout)               # padded MACs = MXU work
    bytes_accessed = int(x.size * x.dtype.itemsize + w_packed.size * 2
                         + (scale.size + bias.size) * 4 + n * hh * ww * cout * 2)
    # TODO(synk): add a parallel spatial row-tile grid axis (2-row halo via
    # manual DMA) for production-size planes / N == 1 on v7x.
    return pl.pallas_call(
        _conv_bn_relu_kernel,
        out_shape=jax.ShapeDtypeStruct((n, hh, ww, cout), jnp.bfloat16),
        grid=(n // bt,),
        in_specs=[
            pl.BlockSpec((bt, hh, ww, cin), lambda b: (b, 0, 0, 0)),
            pl.BlockSpec((k2, cout), lambda b: (0, 0)),
            pl.BlockSpec((1, cout), lambda b: (0, 0)),
            pl.BlockSpec((1, cout), lambda b: (0, 0)),
        ],
        out_specs=pl.BlockSpec((bt, hh, ww, cout), lambda b: (b, 0, 0, 0)),
        compiler_params=pltpu.CompilerParams(
            dimension_semantics=("parallel",),
            vmem_limit_bytes=_vmem_limit_bytes()),
        cost_estimate=pl.CostEstimate(flops=flops, transcendentals=0,
                                      bytes_accessed=bytes_accessed),
    )(x, w_packed, scale, bias)


def unpool_conv_bn_relu_pallas(x, code, w_packed, scale, bias):
    n, h, w, cin = x.shape
    oh, ow = 2 * h, 2 * w
    k2, cout = w_packed.shape
    bt = _pick_batch_tile(n, oh * ow)
    flops = int(2 * n * oh * ow * k2 * cout)
    bytes_accessed = int(x.size * x.dtype.itemsize
                         + code.size * code.dtype.itemsize
                         + w_packed.size * 2 + (scale.size + bias.size) * 4
                         + n * oh * ow * cout * 2)
    return pl.pallas_call(
        _unpool_conv_bn_relu_kernel,
        out_shape=jax.ShapeDtypeStruct((n, oh, ow, cout), jnp.bfloat16),
        grid=(n // bt,),
        in_specs=[
            pl.BlockSpec((bt, h, w, cin), lambda b: (b, 0, 0, 0)),
            pl.BlockSpec((bt, h, w, cin), lambda b: (b, 0, 0, 0)),
            pl.BlockSpec((k2, cout), lambda b: (0, 0)),
            pl.BlockSpec((1, cout), lambda b: (0, 0)),
            pl.BlockSpec((1, cout), lambda b: (0, 0)),
        ],
        out_specs=pl.BlockSpec((bt, oh, ow, cout), lambda b: (b, 0, 0, 0)),
        compiler_params=pltpu.CompilerParams(
            dimension_semantics=("parallel",),
            vmem_limit_bytes=_vmem_limit_bytes()),
        cost_estimate=pl.CostEstimate(flops=flops, transcendentals=0,
                                      bytes_accessed=bytes_accessed),
    )(x, code, w_packed, scale, bias)


# ----------------------------------------------------------------------------
# Decoder forward (glue: layout transposes + channel padding only)
# ----------------------------------------------------------------------------
def decoder_forward(packed_params, x_nchw, idx_nchw, n_out):
    n, c, h, w = x_nchw.shape
    cin_pad = packed_params[0]["w"].shape[0] // 9
    ow = 2 * w

    x = jnp.transpose(x_nchw, (0, 2, 3, 1)).astype(jnp.bfloat16)       # NHWC
    x = jnp.pad(x, ((0, 0), (0, 0), (0, 0), (0, cin_pad - c)))

    # 2-bit in-window code of each max: a = row parity, b = col parity of the
    # flat unpooled index (valid because MaxPool2d(2,2) indices stay inside
    # their own 2x2 window).  Padded channels carry zero values, so any code
    # value is harmless there.
    code = ((idx_nchw // ow) % 2) * 2 + (idx_nchw % 2)
    code = jnp.transpose(code, (0, 2, 3, 1)).astype(jnp.int32)
    code = jnp.pad(code, ((0, 0), (0, 0), (0, 0), (0, cin_pad - c)))

    p0 = packed_params[0]
    out = unpool_conv_bn_relu_pallas(x, code, p0["w"], p0["scale"], p0["bias"])
    for p in packed_params[1:]:
        out = conv_bn_relu_pallas(out, p["w"], p["scale"], p["bias"])

    out = out[..., :n_out]                                 # drop channel padding
    return jnp.transpose(out, (0, 3, 1, 2)).astype(jnp.float32)        # NCHW


# ----------------------------------------------------------------------------
# Deterministic parameter init (shapes from Decoder.__init__) + packing
# ----------------------------------------------------------------------------
def init_decoder_params(key, n_in, n_out, l, eps=1e-5):
    dims = [(n_in, n_in)] * l + [(n_in, n_out)]
    params = []
    for i, (ci, co) in enumerate(dims):
        k = jax.random.fold_in(key, i)
        kw, kb, kg, kbt, km, kv = jax.random.split(k, 6)
        w_hwio = 0.1 * jax.random.normal(kw, (3, 3, ci, co), jnp.float32)
        b_conv = 0.05 * jax.random.normal(kb, (co,), jnp.float32)
        gamma = 1.0 + 0.1 * jax.random.normal(kg, (co,), jnp.float32)
        beta = 0.05 * jax.random.normal(kbt, (co,), jnp.float32)
        mean = 0.1 * jax.random.normal(km, (co,), jnp.float32)
        var = jax.random.uniform(kv, (co,), jnp.float32, 0.5, 1.5)
        params.append(dict(w_hwio=w_hwio, b=b_conv, gamma=gamma, beta=beta,
                           mean=mean, var=var, eps=eps))
    return params


def pack_params(params, lane=LANE):
    """Fold BN into scale/bias, pad channels to one lane group, bf16 weights."""
    packed = []
    for p in params:
        _, _, ci, co = p["w_hwio"].shape
        cip, cop = _round_up(ci, lane), _round_up(co, lane)
        w9 = p["w_hwio"].reshape(9, ci, co)                # tap t = ki*3+kj
        w9 = jnp.pad(w9, ((0, 0), (0, cip - ci), (0, cop - co)))
        w_packed = w9.reshape(9 * cip, cop).astype(jnp.bfloat16)
        scale = p["gamma"] / jnp.sqrt(p["var"] + p["eps"])
        bias = p["beta"] + scale * (p["b"] - p["mean"])
        scale = jnp.pad(scale, (0, cop - co)).reshape(1, cop).astype(jnp.float32)
        bias = jnp.pad(bias, (0, cop - co)).reshape(1, cop).astype(jnp.float32)
        packed.append(dict(w=w_packed, scale=scale, bias=bias))
    return packed


# ----------------------------------------------------------------------------
# Pure-JAX f32 reference (independent check of the Pallas path)
# ----------------------------------------------------------------------------
def decoder_reference(params, x_nchw, idx_nchw):
    n, c, h, w = x_nchw.shape
    oh, ow = 2 * h, 2 * w
    xf = x_nchw.reshape(n, c, h * w)
    idxf = idx_nchw.reshape(n, c, h * w)
    out = jnp.zeros((n, c, oh * ow), jnp.float32)
    nn_ = jnp.arange(n)[:, None, None]
    cc_ = jnp.arange(c)[None, :, None]
    out = out.at[nn_, cc_, idxf].set(xf).reshape(n, c, oh, ow)
    out = jnp.transpose(out, (0, 2, 3, 1))                             # NHWC
    for p in params:
        y = jax.lax.conv_general_dilated(
            out, p["w_hwio"], window_strides=(1, 1), padding=((1, 1), (1, 1)),
            dimension_numbers=("NHWC", "HWIO", "NHWC"),
            precision=jax.lax.Precision.HIGHEST)
        scale = p["gamma"] / jnp.sqrt(p["var"] + p["eps"])
        bias = p["beta"] + scale * (p["b"] - p["mean"])
        out = jnp.maximum(y * scale + bias, 0.0)
    return jnp.transpose(out, (0, 3, 1, 2))


# ----------------------------------------------------------------------------
if __name__ == "__main__":
    key = jax.random.PRNGKey(0)
    N, n_in, n_out, l = 2, 8, 4, 2
    H = W = 8                               # pooled spatial; unpooled is 16x16

    kx, ka, kb2, kp = jax.random.split(key, 4)
    x = jax.random.normal(kx, (N, n_in, H, W), jnp.float32)
    # Valid MaxPool2d(2,2) indices: each points inside its own 2x2 window.
    a = jax.random.randint(ka, (N, n_in, H, W), 0, 2)
    b = jax.random.randint(kb2, (N, n_in, H, W), 0, 2)
    row = jnp.arange(H)[None, None, :, None]
    col = jnp.arange(W)[None, None, None, :]
    idx = ((2 * row + a) * (2 * W) + (2 * col + b)).astype(jnp.int32)

    params = init_decoder_params(kp, n_in, n_out, l)
    packed = pack_params(params)

    fwd = jax.jit(lambda pk, xx, ii: decoder_forward(pk, xx, ii, n_out))
    out = fwd(packed, x, idx)
    jax.block_until_ready(out)

    ref = decoder_reference(params, x, idx)
    # Tolerance sized for bf16 matmul inputs / bf16 inter-layer activations
    # accumulated across l+1 = 3 layers.
    np.testing.assert_allclose(np.asarray(out), np.asarray(ref),
                               rtol=2.5e-2, atol=2.5e-2)
    assert out.shape == (N, n_out, 2 * H, 2 * W)

    print("KERNEL_OK")
</pallas_src>

<mosaic_0001>
module attributes {stable_mosaic.version = 11 : i64} {
  func.func @_conv_bn_relu_kernel(%arg0: i32, %arg1: memref<1x16x16x128xbf16, #tpu.memory_space<vmem>>, %arg2: memref<1152x128xbf16, #tpu.memory_space<vmem>>, %arg3: memref<1x128xf32, #tpu.memory_space<vmem>>, %arg4: memref<1x128xf32, #tpu.memory_space<vmem>>, %arg5: memref<1x16x16x128xbf16, #tpu.memory_space<vmem>>) attributes {dimension_semantics = [#tpu.dimension_semantics<parallel>], iteration_bounds = array<i64: 2>, scalar_prefetch = 0 : i64, scratch_operands = 0 : i64, tpu.core_type = #tpu.core_type<tc>, window_params = [{transform_indices = @transform_0, window_bounds = array<i64: 1, 16, 16, 128>}, {pipeline_mode = #tpu.pipeline_mode<synchronous>, transform_indices = @transform_1, window_bounds = array<i64: 1152, 128>}, {pipeline_mode = #tpu.pipeline_mode<synchronous>, transform_indices = @transform_2, window_bounds = array<i64: 1, 128>}, {pipeline_mode = #tpu.pipeline_mode<synchronous>, transform_indices = @transform_3, window_bounds = array<i64: 1, 128>}, {transform_indices = @transform_4, window_bounds = array<i64: 1, 16, 16, 128>}]} {
    %c0 = arith.constant 0 : index
    %c0_0 = arith.constant 0 : index
    %c0_1 = arith.constant 0 : index
    %c0_2 = arith.constant 0 : index
    %0 = vector.load %arg1[%c0, %c0_0, %c0_1, %c0_2] : memref<1x16x16x128xbf16, #tpu.memory_space<vmem>>, vector<1x16x16x128xbf16>
    %c0_3 = arith.constant 0 : index
    %c0_4 = arith.constant 0 : index
    %1 = vector.load %arg3[%c0_3, %c0_4] : memref<1x128xf32, #tpu.memory_space<vmem>>, vector<1x128xf32>
    %c0_5 = arith.constant 0 : index
    %c0_6 = arith.constant 0 : index
    %2 = vector.load %arg4[%c0_5, %c0_6] : memref<1x128xf32, #tpu.memory_space<vmem>>, vector<1x128xf32>
    %cst = arith.constant 0.000000e+00 : bf16
    %3 = vector.broadcast %cst : bf16 to vector<1x16x1x128xbf16>
    %4 = tpu.concatenate %3, %0, %3 in 2 : vector<1x16x1x128xbf16>, vector<1x16x16x128xbf16>, vector<1x16x1x128xbf16> -> vector<1x16x18x128xbf16>
    %cst_7 = arith.constant 0.000000e+00 : bf16
    %5 = vector.broadcast %cst_7 : bf16 to vector<1x1x18x128xbf16>
    %6 = tpu.concatenate %5, %4, %5 in 1 : vector<1x1x18x128xbf16>, vector<1x16x18x128xbf16>, vector<1x1x18x128xbf16> -> vector<1x18x18x128xbf16>
    %7 = vector.extract_strided_slice %6 {offsets = [0, 0, 0, 0], sizes = [1, 18, 16, 128], strides = [1, 1, 1, 1]} : vector<1x18x18x128xbf16> to vector<1x18x16x128xbf16>
    %8 = vector.extract_strided_slice %6 {offsets = [0, 0, 1, 0], sizes = [1, 18, 16, 128], strides = [1, 1, 1, 1]} : vector<1x18x18x128xbf16> to vector<1x18x16x128xbf16>
    %9 = vector.extract_strided_slice %6 {offsets = [0, 0, 2, 0], sizes = [1, 18, 16, 128], strides = [1, 1, 1, 1]} : vector<1x18x18x128xbf16> to vector<1x18x16x128xbf16>
    %10 = tpu.concatenate %7, %8, %9 in 3 : vector<1x18x16x128xbf16>, vector<1x18x16x128xbf16>, vector<1x18x16x128xbf16> -> vector<1x18x16x384xbf16>
    %cst_8 = arith.constant 0.000000e+00 : f32
    %11 = vector.broadcast %cst_8 : f32 to vector<256x128xf32>
    %12 = vector.extract_strided_slice %10 {offsets = [0, 0, 0, 0], sizes = [1, 16, 16, 384], strides = [1, 1, 1, 1]} : vector<1x18x16x384xbf16> to vector<1x16x16x384xbf16>
    %13 = vector.shape_cast %12 : vector<1x16x16x384xbf16> to vector<256x384xbf16>
    %c0_9 = arith.constant 0 : index
    %c0_10 = arith.constant 0 : index
    %14 = vector.load %arg2[%c0_9, %c0_10] : memref<1152x128xbf16, #tpu.memory_space<vmem>>, vector<384x128xbf16>
    %cst_11 = arith.constant dense<0.000000e+00> : vector<256x128xf32>
    %15 = tpu.matmul %13, %14, %cst_11 {dimension_numbers = #tpu.dot_dimension_numbers<[1], [0], [0], [1], [0, 0, 1, 1], [], []>} : vector<256x384xbf16>, vector<384x128xbf16>, vector<256x128xf32> -> vector<256x128xf32>
    %16 = arith.addf %11, %15 : vector<256x128xf32>
    %17 = vector.extract_strided_slice %10 {offsets = [0, 1, 0, 0], sizes = [1, 16, 16, 384], strides = [1, 1, 1, 1]} : vector<1x18x16x384xbf16> to vector<1x16x16x384xbf16>
    %18 = vector.shape_cast %17 : vector<1x16x16x384xbf16> to vector<256x384xbf16>
    %c384 = arith.constant 384 : index
    %c0_12 = arith.constant 0 : index
    %19 = vector.load %arg2[%c384, %c0_12] : memref<1152x128xbf16, #tpu.memory_space<vmem>>, vector<384x128xbf16>
    %cst_13 = arith.constant dense<0.000000e+00> : vector<256x128xf32>
    %20 = tpu.matmul %18, %19, %cst_13 {dimension_numbers = #tpu.dot_dimension_numbers<[1], [0], [0], [1], [0, 0, 1, 1], [], []>} : vector<256x384xbf16>, vector<384x128xbf16>, vector<256x128xf32> -> vector<256x128xf32>
    %21 = arith.addf %16, %20 : vector<256x128xf32>
    %22 = vector.extract_strided_slice %10 {offsets = [0, 2, 0, 0], sizes = [1, 16, 16, 384], strides = [1, 1, 1, 1]} : vector<1x18x16x384xbf16> to vector<1x16x16x384xbf16>
    %23 = vector.shape_cast %22 : vector<1x16x16x384xbf16> to vector<256x384xbf16>
    %c768 = arith.constant 768 : index
    %c0_14 = arith.constant 0 : index
    %24 = vector.load %arg2[%c768, %c0_14] : memref<1152x128xbf16, #tpu.memory_space<vmem>>, vector<384x128xbf16>
    %cst_15 = arith.constant dense<0.000000e+00> : vector<256x128xf32>
    %25 = tpu.matmul %23, %24, %cst_15 {dimension_numbers = #tpu.dot_dimension_numbers<[1], [0], [0], [1], [0, 0, 1, 1], [], []>} : vector<256x384xbf16>, vector<384x128xbf16>, vector<256x128xf32> -> vector<256x128xf32>
    %26 = arith.addf %21, %25 : vector<256x128xf32>
    %27 = vector.broadcast %1 : vector<1x128xf32> to vector<256x128xf32>
    %28 = arith.mulf %26, %27 : vector<256x128xf32>
    %29 = vector.broadcast %2 : vector<1x128xf32> to vector<256x128xf32>
    %30 = arith.addf %28, %29 : vector<256x128xf32>
    %cst_16 = arith.constant 0.000000e+00 : f32
    %31 = vector.broadcast %cst_16 : f32 to vector<256x128xf32>
    %32 = arith.maximumf %30, %31 : vector<256x128xf32>
    %33 = vector.shape_cast %32 : vector<256x128xf32> to vector<1x16x16x128xf32>
    %34 = arith.truncf %33 : vector<1x16x16x128xf32> to vector<1x16x16x128xbf16>
    %c0_17 = arith.constant 0 : index
    %c0_18 = arith.constant 0 : index
    %c0_19 = arith.constant 0 : index
    %c0_20 = arith.constant 0 : index
    %35 = vector.load %arg5[%c0_17, %c0_18, %c0_19, %c0_20] : memref<1x16x16x128xbf16, #tpu.memory_space<vmem>>, vector<1x16x16x128xbf16>
    tpu.vector_store %arg5[%c0_17, %c0_18, %c0_19, %c0_20], %34 {strides = array<i32>} : memref<1x16x16x128xbf16, #tpu.memory_space<vmem>>, vector<1x16x16x128xbf16>,
    return
  }
  func.func @transform_0(%arg0: i32) -> (i32, i32, i32, i32) {
    %c0_i32 = arith.constant 0 : i32
    %c0_i32_0 = arith.constant 0 : i32
    %c0_i32_1 = arith.constant 0 : i32
    %c0_i32_2 = arith.constant 0 : i32
    return %arg0, %c0_i32, %c0_i32_0, %c0_i32_1 : i32, i32, i32, i32
  }
  func.func @transform_1(%arg0: i32) -> (i32, i32) {
    %c0_i32 = arith.constant 0 : i32
    %c0_i32_0 = arith.constant 0 : i32
    %c0_i32_1 = arith.constant 0 : i32
    return %c0_i32, %c0_i32_0 : i32, i32
  }
  func.func @transform_2(%arg0: i32) -> (i32, i32) {
    %c0_i32 = arith.constant 0 : i32
    %c0_i32_0 = arith.constant 0 : i32
    %c0_i32_1 = arith.constant 0 : i32
    return %c0_i32, %c0_i32_0 : i32, i32
  }
  func.func @transform_3(%arg0: i32) -> (i32, i32) {
    %c0_i32 = arith.constant 0 : i32
    %c0_i32_0 = arith.constant 0 : i32
    %c0_i32_1 = arith.constant 0 : i32
    return %c0_i32, %c0_i32_0 : i32, i32
  }
  func.func @transform_4(%arg0: i32) -> (i32, i32, i32, i32) {
    %c0_i32 = arith.constant 0 : i32
    %c0_i32_0 = arith.constant 0 : i32
    %c0_i32_1 = arith.constant 0 : i32
    %c0_i32_2 = arith.constant 0 : i32
    return %arg0, %c0_i32, %c0_i32_0, %c0_i32_1 : i32, i32, i32, i32
  }
}

module attributes {stable_mosaic.version = 11 : i64} {
  func.func @_unpool_conv_bn_relu_kernel(%arg0: i32, %arg1: memref<1x8x8x128xbf16, #tpu.memory_space<vmem>>, %arg2: memref<1x8x8x128xi32, #tpu.memory_space<vmem>>, %arg3: memref<1152x128xbf16, #tpu.memory_space<vmem>>, %arg4: memref<1x128xf32, #tpu.memory_space<vmem>>, %arg5: memref<1x128xf32, #tpu.memory_space<vmem>>, %arg6: memref<1x16x16x128xbf16, #tpu.memory_space<vmem>>) attributes {dimension_semantics = [#tpu.dimension_semantics<parallel>], iteration_bounds = array<i64: 2>, scalar_prefetch = 0 : i64, scratch_operands = 0 : i64, tpu.core_type = #tpu.core_type<tc>, window_params = [{transform_indices = @transform_0, window_bounds = array<i64: 1, 8, 8, 128>}, {transform_indices = @transform_1, window_bounds = array<i64: 1, 8, 8, 128>}, {pipeline_mode = #tpu.pipeline_mode<synchronous>, transform_indices = @transform_2, window_bounds = array<i64: 1152, 128>}, {pipeline_mode = #tpu.pipeline_mode<synchronous>, transform_indices = @transform_3, window_bounds = array<i64: 1, 128>}, {pipeline_mode = #tpu.pipeline_mode<synchronous>, transform_indices = @transform_4, window_bounds = array<i64: 1, 128>}, {transform_indices = @transform_5, window_bounds = array<i64: 1, 16, 16, 128>}]} {
    %c0 = arith.constant 0 : index
    %c0_0 = arith.constant 0 : index
    %c0_1 = arith.constant 0 : index
    %c0_2 = arith.constant 0 : index
    %0 = vector.load %arg1[%c0, %c0_0, %c0_1, %c0_2] : memref<1x8x8x128xbf16, #tpu.memory_space<vmem>>, vector<1x8x8x128xbf16>
    %1 = vector.shape_cast %0 : vector<1x8x8x128xbf16> to vector<8x8x128xbf16>
    %c0_3 = arith.constant 0 : index
    %c0_4 = arith.constant 0 : index
    %c0_5 = arith.constant 0 : index
    %c0_6 = arith.constant 0 : index
    %2 = vector.load %arg2[%c0_3, %c0_4, %c0_5, %c0_6] : memref<1x8x8x128xi32, #tpu.memory_space<vmem>>, vector<1x8x8x128xi32>
    %3 = vector.shape_cast %2 : vector<1x8x8x128xi32> to vector<8x8x128xi32>
    %c0_i32 = arith.constant 0 : i32
    %4 = vector.broadcast %c0_i32 : i32 to vector<8x8x128xi32>
    %5 = arith.cmpi eq, %3, %4 : vector<8x8x128xi32>
    %cst = arith.constant 0.000000e+00 : bf16
    %6 = vector.broadcast %cst : bf16 to vector<8x8x128xbf16>
    %7 = arith.select %5, %1, %6 : vector<8x8x128xi1>, vector<8x8x128xbf16>
    %c1_i32 = arith.constant 1 : i32
    %8 = vector.broadcast %c1_i32 : i32 to vector<8x8x128xi32>
    %9 = arith.cmpi eq, %3, %8 : vector<8x8x128xi32>
    %cst_7 = arith.constant 0.000000e+00 : bf16
    %10 = vector.broadcast %cst_7 : bf16 to vector<8x8x128xbf16>
    %11 = arith.select %9, %1, %10 : vector<8x8x128xi1>, vector<8x8x128xbf16>
    %12 = vector.shape_cast %7 : vector<8x8x128xbf16> to vector<8x8x1x128xbf16>
    %13 = vector.shape_cast %11 : vector<8x8x128xbf16> to vector<8x8x1x128xbf16>
    %14 = tpu.concatenate %12, %13 in 2 : vector<8x8x1x128xbf16>, vector<8x8x1x128xbf16> -> vector<8x8x2x128xbf16>
    %15 = vector.shape_cast %14 : vector<8x8x2x128xbf16> to vector<8x16x128xbf16>
    %c2_i32 = arith.constant 2 : i32
    %16 = vector.broadcast %c2_i32 : i32 to vector<8x8x128xi32>
    %17 = arith.cmpi eq, %3, %16 : vector<8x8x128xi32>
    %cst_8 = arith.constant 0.000000e+00 : bf16
    %18 = vector.broadcast %cst_8 : bf16 to vector<8x8x128xbf16>
    %19 = arith.select %17, %1, %18 : vector<8x8x128xi1>, vector<8x8x128xbf16>
    %c3_i32 = arith.constant 3 : i32
    %20 = vector.broadcast %c3_i32 : i32 to vector<8x8x128xi32>
    %21 = arith.cmpi eq, %3, %20 : vector<8x8x128xi32>
    %cst_9 = arith.constant 0.000000e+00 : bf16
    %22 = vector.broadcast %cst_9 : bf16 to vector<8x8x128xbf16>
    %23 = arith.select %21, %1, %22 : vector<8x8x128xi1>, vector<8x8x128xbf16>
    %24 = vector.shape_cast %19 : vector<8x8x128xbf16> to vector<8x8x1x128xbf16>
    %25 = vector.shape_cast %23 : vector<8x8x128xbf16> to vector<8x8x1x128xbf16>
    %26 = tpu.concatenate %24, %25 in 2 : vector<8x8x1x128xbf16>, vector<8x8x1x128xbf16> -> vector<8x8x2x128xbf16>
    %27 = vector.shape_cast %26 : vector<8x8x2x128xbf16> to vector<8x16x128xbf16>
    %28 = vector.shape_cast %15 : vector<8x16x128xbf16> to vector<8x1x16x128xbf16>
    %29 = vector.shape_cast %27 : vector<8x16x128xbf16> to vector<8x1x16x128xbf16>
    %30 = tpu.concatenate %28, %29 in 1 : vector<8x1x16x128xbf16>, vector<8x1x16x128xbf16> -> vector<8x2x16x128xbf16>
    %31 = vector.shape_cast %30 : vector<8x2x16x128xbf16> to vector<16x16x128xbf16>
    %32 = vector.shape_cast %31 : vector<16x16x128xbf16> to vector<1x16x16x128xbf16>
    %c0_10 = arith.constant 0 : index
    %c0_11 = arith.constant 0 : index
    %33 = vector.load %arg4[%c0_10, %c0_11] : memref<1x128xf32, #tpu.memory_space<vmem>>, vector<1x128xf32>
    %c0_12 = arith.constant 0 : index
    %c0_13 = arith.constant 0 : index
    %34 = vector.load %arg5[%c0_12, %c0_13] : memref<1x128xf32, #tpu.memory_space<vmem>>, vector<1x128xf32>
    %cst_14 = arith.constant 0.000000e+00 : bf16
    %35 = vector.broadcast %cst_14 : bf16 to vector<1x16x1x128xbf16>
    %36 = tpu.concatenate %35, %32, %35 in 2 : vector<1x16x1x128xbf16>, vector<1x16x16x128xbf16>, vector<1x16x1x128xbf16> -> vector<1x16x18x128xbf16>
    %cst_15 = arith.constant 0.000000e+00 : bf16
    %37 = vector.broadcast %cst_15 : bf16 to vector<1x1x18x128xbf16>
    %38 = tpu.concatenate %37, %36, %37 in 1 : vector<1x1x18x128xbf16>, vector<1x16x18x128xbf16>, vector<1x1x18x128xbf16> -> vector<1x18x18x128xbf16>
    %39 = vector.extract_strided_slice %38 {offsets = [0, 0, 0, 0], sizes = [1, 18, 16, 128], strides = [1, 1, 1, 1]} : vector<1x18x18x128xbf16> to vector<1x18x16x128xbf16>
    %40 = vector.extract_strided_slice %38 {offsets = [0, 0, 1, 0], sizes = [1, 18, 16, 128], strides = [1, 1, 1, 1]} : vector<1x18x18x128xbf16> to vector<1x18x16x128xbf16>
    %41 = vector.extract_strided_slice %38 {offsets = [0, 0, 2, 0], sizes = [1, 18, 16, 128], strides = [1, 1, 1, 1]} : vector<1x18x18x128xbf16> to vector<1x18x16x128xbf16>
    %42 = tpu.concatenate %39, %40, %41 in 3 : vector<1x18x16x128xbf16>, vector<1x18x16x128xbf16>, vector<1x18x16x128xbf16> -> vector<1x18x16x384xbf16>
    %cst_16 = arith.constant 0.000000e+00 : f32
    %43 = vector.broadcast %cst_16 : f32 to vector<256x128xf32>
    %44 = vector.extract_strided_slice %42 {offsets = [0, 0, 0, 0], sizes = [1, 16, 16, 384], strides = [1, 1, 1, 1]} : vector<1x18x16x384xbf16> to vector<1x16x16x384xbf16>
    %45 = vector.shape_cast %44 : vector<1x16x16x384xbf16> to vector<256x384xbf16>
    %c0_17 = arith.constant 0 : index
    %c0_18 = arith.constant 0 : index
    %46 = vector.load %arg3[%c0_17, %c0_18] : memref<1152x128xbf16, #tpu.memory_space<vmem>>, vector<384x128xbf16>
    %cst_19 = arith.constant dense<0.000000e+00> : vector<256x128xf32>
    %47 = tpu.matmul %45, %46, %cst_19 {dimension_numbers = #tpu.dot_dimension_numbers<[1], [0], [0], [1], [0, 0, 1, 1], [], []>} : vector<256x384xbf16>, vector<384x128xbf16>, vector<256x128xf32> -> vector<256x128xf32>
    %48 = arith.addf %43, %47 : vector<256x128xf32>
    %49 = vector.extract_strided_slice %42 {offsets = [0, 1, 0, 0], sizes = [1, 16, 16, 384], strides = [1, 1, 1, 1]} : vector<1x18x16x384xbf16> to vector<1x16x16x384xbf16>
    %50 = vector.shape_cast %49 : vector<1x16x16x384xbf16> to vector<256x384xbf16>
    %c384 = arith.constant 384 : index
    %c0_20 = arith.constant 0 : index
    %51 = vector.load %arg3[%c384, %c0_20] : memref<1152x128xbf16, #tpu.memory_space<vmem>>, vector<384x128xbf16>
    %cst_21 = arith.constant dense<0.000000e+00> : vector<256x128xf32>
    %52 = tpu.matmul %50, %51, %cst_21 {dimension_numbers = #tpu.dot_dimension_numbers<[1], [0], [0], [1], [0, 0, 1, 1], [], []>} : vector<256x384xbf16>, vector<384x128xbf16>, vector<256x128xf32> -> vector<256x128xf32>
    %53 = arith.addf %48, %52 : vector<256x128xf32>
    %54 = vector.extract_strided_slice %42 {offsets = [0, 2, 0, 0], sizes = [1, 16, 16, 384], strides = [1, 1, 1, 1]} : vector<1x18x16x384xbf16> to vector<1x16x16x384xbf16>
    %55 = vector.shape_cast %54 : vector<1x16x16x384xbf16> to vector<256x384xbf16>
    %c768 = arith.constant 768 : index
    %c0_22 = arith.constant 0 : index
    %56 = vector.load %arg3[%c768, %c0_22] : memref<1152x128xbf16, #tpu.memory_space<vmem>>, vector<384x128xbf16>
    %cst_23 = arith.constant dense<0.000000e+00> : vector<256x128xf32>
    %57 = tpu.matmul %55, %56, %cst_23 {dimension_numbers = #tpu.dot_dimension_numbers<[1], [0], [0], [1], [0, 0, 1, 1], [], []>} : vector<256x384xbf16>, vector<384x128xbf16>, vector<256x128xf32> -> vector<256x128xf32>
    %58 = arith.addf %53, %57 : vector<256x128xf32>
    %59 = vector.broadcast %33 : vector<1x128xf32> to vector<256x128xf32>
    %60 = arith.mulf %58, %59 : vector<256x128xf32>
    %61 = vector.broadcast %34 : vector<1x128xf32> to vector<256x128xf32>
    %62 = arith.addf %60, %61 : vector<256x128xf32>
    %cst_24 = arith.constant 0.000000e+00 : f32
    %63 = vector.broadcast %cst_24 : f32 to vector<256x128xf32>
    %64 = arith.maximumf %62, %63 : vector<256x128xf32>
    %65 = vector.shape_cast %64 : vector<256x128xf32> to vector<1x16x16x128xf32>
    %66 = arith.truncf %65 : vector<1x16x16x128xf32> to vector<1x16x16x128xbf16>
    %c0_25 = arith.constant 0 : index
    %c0_26 = arith.constant 0 : index
    %c0_27 = arith.constant 0 : index
    %c0_28 = arith.constant 0 : index
    %67 = vector.load %arg6[%c0_25, %c0_26, %c0_27, %c0_28] : memref<1x16x16x128xbf16, #tpu.memory_space<vmem>>, vector<1x16x16x128xbf16>
    tpu.vector_store %arg6[%c0_25, %c0_26, %c0_27, %c0_28], %66 {strides = array<i32>} : memref<1x16x16x128xbf16, #tpu.memory_space<vmem>>, vector<1x16x16x128xbf16>,
    return
  }
  func.func @transform_0(%arg0: i32) -> (i32, i32, i32, i32) {
    %c0_i32 = arith.constant 0 : i32
    %c0_i32_0 = arith.constant 0 : i32
    %c0_i32_1 = arith.constant 0 : i32
    %c0_i32_2 = arith.constant 0 : i32
    return %arg0, %c0_i32, %c0_i32_0, %c0_i32_1 : i32, i32, i32, i32
  }
  func.func @transform_1(%arg0: i32) -> (i32, i32, i32, i32) {
    %c0_i32 = arith.constant 0 : i32
    %c0_i32_0 = arith.constant 0 : i32
    %c0_i32_1 = arith.constant 0 : i32
    %c0_i32_2 = arith.constant 0 : i32
    return %arg0, %c0_i32, %c0_i32_0, %c0_i32_1 : i32, i32, i32, i32
  }
  func.func @transform_2(%arg0: i32) -> (i32, i32) {
    %c0_i32 = arith.constant 0 : i32
    %c0_i32_0 = arith.constant 0 : i32
    %c0_i32_1 = arith.constant 0 : i32
    return %c0_i32, %c0_i32_0 : i32, i32
  }
  func.func @transform_3(%arg0: i32) -> (i32, i32) {
    %c0_i32 = arith.constant 0 : i32
    %c0_i32_0 = arith.constant 0 : i32
    %c0_i32_1 = arith.constant 0 : i32
    return %c0_i32, %c0_i32_0 : i32, i32
  }
  func.func @transform_4(%arg0: i32) -> (i32, i32) {
    %c0_i32 = arith.constant 0 : i32
    %c0_i32_0 = arith.constant 0 : i32
    %c0_i32_1 = arith.constant 0 : i32
    return %c0_i32, %c0_i32_0 : i32, i32
  }
  func.func @transform_5(%arg0: i32) -> (i32, i32, i32, i32) {
    %c0_i32 = arith.constant 0 : i32
    %c0_i32_0 = arith.constant 0 : i32
    %c0_i32_1 = arith.constant 0 : i32
    %c0_i32_2 = arith.constant 0 : i32
    return %arg0, %c0_i32, %c0_i32_0, %c0_i32_1 : i32, i32, i32, i32
  }
}

</mosaic_0001>

<bundles_post_ra>
// kernel: _lambda_.4
= control target key start
LH: loop header
LB: loop body
LE: loop exit
PB: predicated region body
PF: predicated region fallthrough
CT: control target
= control target key end

     0   :  { %s3058_s15 = smov 0   ;;  %s4051_s0 = inlined_call_operand.vmem [shape: bf16[2,16,16,128], index: 0, kind: input, shape index: {}]   ;;  %s4052_s1 = inlined_call_operand.vmem [shape: bf16[1152,128], index: 1, kind: input, shape index: {}]   ;;  %s4053_s2 = inlined_call_operand.vmem [shape: f32[1,128], index: 2, kind: input, shape index: {}]   ;;  %s4054_s3 = inlined_call_operand.vmem [shape: f32[1,128], index: 3, kind: input, shape index: {}]   ;;  %s4055_s4 = inlined_call_operand.vmem [shape: bf16[2,16,16,128], index: 4, kind: output, shape index: {}]  }
   0x1 LB: > { %s2441_s16 = sadd.s32 4294967295, %s3030_s15   ;;  %p2445_p0 = scmp.ge.s32.totalorder %s3030_s15, 1  ;;  %s3030_s15 = sphi %s3058_s15, %s14_s15  }
   0x2   : > { %p162_p1 = scmp.lt.s32.totalorder %s3030_s15, 3 }
   0x4   : > { %p163_p2 = pnand %p2445_p0, %p162_p1 }
   0x6   : > { %166 = sbr.rel (%p163_p2) target bundleno = 759 (0x2f7), region = 36 }
   0xb   : > { %v2853_v0 = vld [vmem:[%s4052_s1 + $0xf8] sm:$0xff]  ;;  %p188_p3 = scmp.lt.s32.totalorder %s2441_s16, 1  ;;  %v2852_v1 = vld [vmem:[%s4052_s1 + $0xf0] sm:$0xff]  ;;  %v2851_v2 = vld [vmem:[%s4052_s1 + $0xe8] sm:$0xff]  ;;  %vm457_vm0 = vcmask 1040384   ;;  %vm743_vm4 = vcmask 1046528  }
   0xc   : > { %1051 = vmatpush.bf16.msra.mxu0 %v2853_v0  ;;  %2989 = vmatpush.bf16.msra.mxu1 %v2853_v0  ;;  %v2850_v3 = vld [vmem:[%s4052_s1 + $0xe0] sm:$0xff]  ;;  %v2849_v4 = vld [vmem:[%s4052_s1 + $0xd8] sm:$0xff]  ;;  %v2848_v9 = vld [vmem:[%s4052_s1 + $0xd0] sm:$0xff]  ;;  %vm458_vm1 = vsmask.f32 256 }
   0xd   : > { %2990 = vmatpush.bf16.msra.mxu2 %v2853_v0  ;;  %2991 = vmatpush.bf16.msra.mxu3 %v2853_v0  ;;  %s4163_s16 = smov (!%p188_p3, %s2441_s16), 1  ;;  %v2847_v14 = vld [vmem:[%s4052_s1 + $0xc8] sm:$0xff]  ;;  %v2846_v23 = vld [vmem:[%s4052_s1 + $0xc0] sm:$0xff]  ;;  %vm3114_vm2 = vmand %vm457_vm0, %vm458_vm1  ;;  %vm492_vm3 = vsmask.f32 7424 }
   0xe   : > { %s2804_s23 = sshll.u32 %s4163_s16, 7  ;;  %v2869_v29 = vld [vmem:[%s4052_s1 + $0x178] sm:$0xff]  ;;  %v2868_v41 = vld [vmem:[%s4052_s1 + $0x170] sm:$0xff]  ;;  %v2867_v49 = vld [vmem:[%s4052_s1 + $0x168] sm:$0xff] }
   0xf   : > { %s3086_s28 = scalar_lea.vmem %s4051_s0, %s2804_s23  ;;  %v2829_v30 = vld [vmem:[%s4052_s1 + $0x38] sm:$0xff]  ;;  %v2828_v42 = vld [vmem:[%s4052_s1 + $0x30] sm:$0xff]  ;;  %v2827_v50 = vld [vmem:[%s4052_s1 + $0x28] sm:$0xff]  ;;  %s3916_s10 = scalar_lea.vmem %s4055_s4, %s2804_s23 }
  0x10   : > { %1052 = vmatpush.bf16.msra.mxu0 %v2852_v1  ;;  %2992 = vmatpush.bf16.msra.mxu1 %v2852_v1  ;;  %v2806_v5 = vld [vmem:[%s3086_s28] sm:$0xff]  ;;  %v2861_v33 = vld [vmem:[%s4052_s1 + $0x138] sm:$0xff]  ;;  %v2807_v34 = vld [vmem:[%s3086_s28 + $0x8] sm:$0xff] }
  0x11   : > { %2993 = vmatpush.bf16.msra.mxu2 %v2852_v1  ;;  %2994 = vmatpush.bf16.msra.mxu3 %v2852_v1  ;;  %v2810_v6 = vld [vmem:[%s3086_s28 + $0x20] sm:$0xff]  ;;  %v314_v10 = vshrl.u32 %v2806_v5, 16  ;;  %v317_v16 = vshll.u32 %v2806_v5, 16  ;;  %v2811_v35 = vld [vmem:[%s3086_s28 + $0x28] sm:$0xff]  ;;  %v2837_v38 = vld [vmem:[%s4052_s1 + $0x78] sm:$0xff]  ;;  %v321_v43 = vshrl.u32 %v2807_v34, 16 }
  0x12   : > { %v2814_v7 = vld [vmem:[%s3086_s28 + $0x40] sm:$0xff]  ;;  %v342_v11 = vshrl.u32 %v2810_v6, 16  ;;  %v345_v18 = vshll.u32 %v2810_v6, 16  ;;  %v2815_v39 = vld [vmem:[%s3086_s28 + $0x48] sm:$0xff]  ;;  %v349_v44 = vshrl.u32 %v2811_v35, 16  ;;  %v2860_v47 = vld [vmem:[%s4052_s1 + $0x130] sm:$0xff] }
  0x13   : > { %v2818_v8 = vld [vmem:[%s3086_s28 + $0x60] sm:$0xff]  ;;  %v370_v12 = vshrl.u32 %v2814_v7, 16  ;;  %v3101_v15 = vrot.slane %v314_v10, 7  ;;  %v373_v20 = vshll.u32 %v2814_v7, 16  ;;  %v2819_v40 = vld [vmem:[%s3086_s28 + $0x68] sm:$0xff]  ;;  %v377_v45 = vshrl.u32 %v2815_v39, 16 }
  0x14   : > { %1053 = vmatpush.bf16.msra.mxu0 %v2851_v2  ;;  %2995 = vmatpush.bf16.msra.mxu1 %v2851_v2  ;;  %v398_v13 = vshrl.u32 %v2818_v8, 16  ;;  %v3103_v17 = vrot.slane %v342_v11, 7  ;;  %v401_v22 = vshll.u32 %v2818_v8, 16  ;;  %v405_v46 = vshrl.u32 %v2819_v40, 16  ;;  %v2836_v48 = vld [vmem:[%s4052_s1 + $0x70] sm:$0xff]  ;;  %v2859_v59 = vld [vmem:[%s4052_s1 + $0x128] sm:$0xff] }
  0x15   : > { %2996 = vmatpush.bf16.msra.mxu2 %v2851_v2  ;;  %2997 = vmatpush.bf16.msra.mxu3 %v2851_v2  ;;  %v3105_v19 = vrot.slane %v370_v12, 7  ;;  %v319_v24 = vor.u32 %v317_v16, %v3101_v15  ;;  %v3174_v51 = vrot.slane %v321_v43, 7  ;;  %v324_v52 = vshll.u32 %v2807_v34, 16  ;;  %v2835_v60 = vld [vmem:[%s4052_s1 + $0x68] sm:$0xff]  ;;  %v2866_v61 = vld [vmem:[%s4052_s1 + $0x160] sm:$0xff]  ;;  %v2865_v5 = vld [vmem:[%s4052_s1 + $0x158] sm:$0xff] }
  0x16   : > { %v3107_v21 = vrot.slane %v398_v13, 7  ;;  %v347_v25 = vor.u32 %v345_v18, %v3103_v17  ;;  %v3176_v53 = vrot.slane %v349_v44, 7  ;;  %v352_v54 = vshll.u32 %v2811_v35, 16  ;;  %v2826_v62 = vld [vmem:[%s4052_s1 + $0x20] sm:$0xff]  ;;  %v2825_v6 = vld [vmem:[%s4052_s1 + $0x18] sm:$0xff]  ;;  %v2812_v10 = vld [vmem:[%s3086_s28 + $0x30] sm:$0xff] }
  0x17   : > { %v375_v27 = vor.u32 %v373_v20, %v3105_v19  ;;  %v3128_v31 = vsel %vm3114_vm2, 0, %v319_v24  ;;  %v3178_v55 = vrot.slane %v377_v45, 7  ;;  %v380_v56 = vshll.u32 %v2815_v39, 16  ;;  %v2816_v11 = vld [vmem:[%s3086_s28 + $0x50] sm:$0xff]  ;;  %v2857_v16 = vld [vmem:[%s4052_s1 + $0x118] sm:$0xff]  ;;  %v2855_v44 = vld [vmem:[%s4052_s1 + $0x108] sm:$0xff] }
  0x18   : > { %1054 = vmatpush.bf16.msra.mxu0 %v2850_v3  ;;  %2998 = vmatpush.bf16.msra.mxu1 %v2850_v3  ;;  %v403_v28 = vor.u32 %v401_v22, %v3107_v21  ;;  %v3132_v32 = vsel %vm3114_vm2, 0, %v347_v25  ;;  %v3180_v57 = vrot.slane %v405_v46, 7  ;;  %v408_v58 = vshll.u32 %v2819_v40, 16  ;;  %v2833_v18 = vld [vmem:[%s4052_s1 + $0x58] sm:$0xff]  ;;  %v2864_v20 = vld [vmem:[%s4052_s1 + $0x150] sm:$0xff]  ;;  %v2831_v45 = vld [vmem:[%s4052_s1 + $0x48] sm:$0xff] }
  0x19   : > { %2999 = vmatpush.bf16.msra.mxu2 %v2850_v3  ;;  %3000 = vmatpush.bf16.msra.mxu3 %v2850_v3  ;;  %4083 = vst [vmem:[#allocation2_spill] sm:$0xff] %v3132_v32  ;;  %v3141_v36 = vsel %vm3114_vm2, 0, %v375_v27  ;;  %v326_v63 = vor.u32 %v324_v52, %v3174_v51  ;;  %v354_v0 = vor.u32 %v352_v54, %v3176_v53  ;;  %v2858_v3 = vld [vmem:[%s4052_s1 + $0x120] sm:$0xff]  ;;  %v2824_v22 = vld [vmem:[%s4052_s1 + $0x10] sm:$0xff]  ;;  %v356_v24 = vshrl.u32 %v2812_v10, 16 }
  0x1a   : > { %v3145_v37 = vsel %vm3114_vm2, 0, %v403_v28  ;;  %v382_v1 = vor.u32 %v380_v56, %v3178_v55  ;;  %v410_v2 = vor.u32 %v408_v58, %v3180_v57  ;;  %v384_v25 = vshrl.u32 %v2816_v11, 16  ;;  %v2856_v28 = vld [vmem:[%s4052_s1 + $0x110] sm:$0xff]  ;;  %v2862_v46 = vld [vmem:[%s4052_s1 + $0x140] sm:$0xff] }
  0x1b   : > { %v3212_v7 = vsel %vm3114_vm2, 0, %v326_v63  ;;  %v3216_v8 = vsel %vm3114_vm2, 0, %v354_v0  ;;  %v359_v39 = vshll.u32 %v2812_v10, 16  ;;  %v2854_v54 = vld [vmem:[%s4052_s1 + $0x100] sm:$0xff]  ;;  %v2817_v0 = vld [vmem:[%s3086_s28 + $0x58] sm:$0xff] }
  0x1c   : > { %1055 = vmatpush.bf16.msra.mxu0 %v2849_v4  ;;  %3001 = vmatpush.bf16.msra.mxu1 %v2849_v4  ;;  %4084 = vst [vmem:[#allocation3_spill] sm:$0xff] %v3216_v8  ;;  %v3223_v12 = vsel %vm3114_vm2, 0, %v382_v1  ;;  %v3227_v13 = vsel %vm3114_vm2, 0, %v410_v2  ;;  %v3262_v40 = vrot.slane %v384_v25, 7  ;;  %v2830_v56 = vld [vmem:[%s4052_s1 + $0x40] sm:$0xff]  ;;  %v2821_v1 = vld [vmem:[%s3086_s28 + $0x78] sm:$0xff] }
  0x1d   : > { %3002 = vmatpush.bf16.msra.mxu2 %v2849_v4  ;;  %3003 = vmatpush.bf16.msra.mxu3 %v2849_v4  ;;  %v2834_v4 = vld [vmem:[%s4052_s1 + $0x60] sm:$0xff]  ;;  %v419_v10 = vshrl.u32 %v2821_v1, 16  ;;  %v422_v25 = vshll.u32 %v2821_v1, 16  ;;  %v2884_v1 = vld [vmem:[%s4052_s1 + $0x1f0] sm:$0xff] }
  0x20   : > { %1056 = vmatpush.bf16.msra.mxu0 %v2848_v9  ;;  %3004 = vmatpush.bf16.msra.mxu1 %v2848_v9 }
  0x21   : > { %3005 = vmatpush.bf16.msra.mxu2 %v2848_v9  ;;  %3006 = vmatpush.bf16.msra.mxu3 %v2848_v9  ;;  %v2808_v9 = vld [vmem:[%s3086_s28 + $0x10] sm:$0xff] }
  0x22   : > { %v331_v35 = vshll.u32 %v2808_v9, 16 }
  0x24   : > { %1057 = vmatpush.bf16.msra.mxu0 %v2847_v14  ;;  %3007 = vmatpush.bf16.msra.mxu1 %v2847_v14 }
  0x25   : > { %3008 = vmatpush.bf16.msra.mxu2 %v2847_v14  ;;  %3009 = vmatpush.bf16.msra.mxu3 %v2847_v14  ;;  %v2820_v14 = vld [vmem:[%s3086_s28 + $0x70] sm:$0xff] }
  0x26   : > { %v412_v27 = vshrl.u32 %v2820_v14, 16  ;;  %v415_v43 = vshll.u32 %v2820_v14, 16 }
  0x28   : > { %1058 = vmatpush.bf16.msra.mxu0 %v2846_v23  ;;  %3010 = vmatpush.bf16.msra.mxu1 %v2846_v23 }
  0x29   : > { %3011 = vmatpush.bf16.msra.mxu2 %v2846_v23  ;;  %3012 = vmatpush.bf16.msra.mxu3 %v2846_v23  ;;  %v328_v23 = vshrl.u32 %v2808_v9, 16  ;;  %v391_v9 = vshrl.u32 %v2817_v0, 16 }
  0x2b   : > { %1059 = vmatmul.bf16.vlgmr.msra.gmra.mxu0 %v3128_v31  ;;  %1079 = vmatmul.bf16.vlgmr.msra.gmra.mxu1 %v3132_v32  ;;  %v3258_v34 = vrot.slane %v328_v23, 7  ;;  %v394_v23 = vshll.u32 %v2817_v0, 16  ;;  %v2876_v0 = vld [vmem:[%s4052_s1 + $0x1b0] sm:$0xff] }
  0x2c   : > { %1099 = vmatmul.bf16.vlgmr.msra.gmra.mxu2 %v3141_v36  ;;  %1119 = vmatmul.bf16.vlgmr.msra.gmra.mxu3 %v3145_v37 }
  0x2d   : > { %1229 = vmatpush.bf16.msrb.mxu2 %v2869_v29  ;;  %1462 = vmatpush.bf16.msrb.mxu3 %v2829_v30  ;;  %v2832_v29 = vld [vmem:[%s4052_s1 + $0x50] sm:$0xff]  ;;  %v2863_v30 = vld [vmem:[%s4052_s1 + $0x148] sm:$0xff] }
  0x2e   : > { %1140 = vmatpush.bf16.msrb.mxu1 %v2861_v33  ;;  %1551 = vmatpush.bf16.msrb.mxu0 %v2837_v38  ;;  %v2823_v33 = vld [vmem:[%s4052_s1 + $0x8] sm:$0xff]  ;;  %v3260_v38 = vrot.slane %v356_v24, 7  ;;  %v3330_v24 = vrot.slane %v419_v10, 7 }
  0x31   : > { %1230 = vmatpush.bf16.msrb.mxu2 %v2868_v41  ;;  %1463 = vmatpush.bf16.msrb.mxu3 %v2828_v42  ;;  %v387_v41 = vshll.u32 %v2816_v11, 16  ;;  %v3264_v42 = vrot.slane %v412_v27, 7  ;;  %v2893_v11 = vld [vmem:[%s4052_s1 + $0x238] sm:$0xff] }
  0x32   : > { %1141 = vmatpush.bf16.msrb.mxu1 %v2860_v47  ;;  %1552 = vmatpush.bf16.msrb.mxu0 %v2836_v48  ;;  %v2822_v47 = vld [vmem:[%s4052_s1] sm:$0xff]  ;;  %v333_v48 = vor.u32 %v331_v35, %v3258_v34 }
  0x33   : > { %v417_v52 = vor.u32 %v415_v43, %v3264_v42  ;;  %v504_v43 = vshll.u32 %v3128_v31, 16 }
  0x34   : > { %v3290_v58 = vsel %vm3114_vm2, 0, %v333_v48 }
  0x35   : > { %1231 = vmatpush.bf16.msrb.mxu2 %v2867_v49  ;;  %1464 = vmatpush.bf16.msrb.mxu3 %v2827_v50  ;;  %v361_v49 = vor.u32 %v359_v39, %v3260_v38  ;;  %v389_v50 = vor.u32 %v387_v41, %v3262_v40  ;;  %v3304_v63 = vsel %vm3114_vm2, 0, %v417_v52 }
  0x36   : > { %1142 = vmatpush.bf16.msrb.mxu1 %v2859_v59  ;;  %1553 = vmatpush.bf16.msrb.mxu0 %v2835_v60  ;;  %v2809_v60 = vld [vmem:[%s3086_s28 + $0x18] sm:$0xff] }
  0x37   : > { %v3294_v59 = vsel %vm3114_vm2, 0, %v361_v49  ;;  %v335_v2 = vshrl.u32 %v2809_v60, 16 }
  0x38   : > { %4085 = vst [vmem:[#allocation4_spill] sm:$0xff] %v3294_v59 }
  0x39   : > { %1232 = vmatpush.bf16.msrb.mxu2 %v2866_v61  ;;  %1465 = vmatpush.bf16.msrb.mxu3 %v2826_v62  ;;  %v2813_v61 = vld [vmem:[%s3086_s28 + $0x38] sm:$0xff]  ;;  %v3300_v62 = vsel %vm3114_vm2, 0, %v389_v50  ;;  %v3324_v14 = vrot.slane %v335_v2, 7  ;;  %v746_v50 = vrot.slane %v3128_v31, 1  ;;  %v2844_v2 = vld [vmem:[%s4052_s1 + $0xb0] sm:$0xff] }
  0x3a   : > { %1143 = vmatpush.bf16.msrb.mxu1 %v2858_v3  ;;  %1554 = vmatpush.bf16.msrb.mxu0 %v2834_v4  ;;  %v363_v3 = vshrl.u32 %v2813_v61, 16  ;;  %v2877_v4 = vld [vmem:[%s4052_s1 + $0x1b8] sm:$0xff] }
  0x3b   : > { %1064 = vmatmul.bf16.gmra.mxu0 %v3212_v7  ;;  %1084 = vmatmul.bf16.gmra.mxu1 %v3216_v8 }
  0x3c   : > { %1104 = vmatmul.bf16.gmra.mxu2 %v3223_v12  ;;  %1124 = vmatmul.bf16.gmra.mxu3 %v3227_v13 }
  0x3d   : > { %1233 = vmatpush.bf16.msrb.mxu2 %v2865_v5  ;;  %1466 = vmatpush.bf16.msrb.mxu3 %v2825_v6  ;;  %v2885_v5 = vld [vmem:[%s4052_s1 + $0x1f8] sm:$0xff] }
  0x3e   : > { %1144 = vmatpush.bf16.msrb.mxu1 %v2857_v16  ;;  %1555 = vmatpush.bf16.msrb.mxu0 %v2833_v18  ;;  %v2845_v6 = vld [vmem:[%s4052_s1 + $0xb8] sm:$0xff]  ;;  %v338_v16 = vshll.u32 %v2809_v60, 16  ;;  %v3326_v18 = vrot.slane %v363_v3, 7  ;;  %v477_v3 = vsel %vm3114_vm2, %v3174_v51, 0 }
  0x40   : > { %v340_v27 = vor.u32 %v338_v16, %v3324_v14  ;;  %v749_v16 = vrot.slane %v3212_v7, 1 }
  0x41   : > { %1234 = vmatpush.bf16.msrb.mxu2 %v2864_v20  ;;  %1467 = vmatpush.bf16.msrb.mxu3 %v2824_v22  ;;  %v366_v20 = vshll.u32 %v2813_v61, 16  ;;  %v3328_v22 = vrot.slane %v391_v9, 7  ;;  %v521_v9 = vshll.u32 %v477_v3, 16 }
  0x42   : > { %1145 = vmatpush.bf16.msrb.mxu1 %v2856_v28  ;;  %1556 = vmatpush.bf16.msrb.mxu0 %v2832_v29 }
  0x43   : > { %v368_v28 = vor.u32 %v366_v20, %v3326_v18  ;;  %v396_v29 = vor.u32 %v394_v23, %v3328_v22  ;;  %v750_v20 = vrot.slane %v477_v3, 1 }
  0x45   : > { %1235 = vmatpush.bf16.msrb.mxu2 %v2863_v30  ;;  %1468 = vmatpush.bf16.msrb.mxu3 %v2823_v33  ;;  %v424_v30 = vor.u32 %v422_v25, %v3330_v24  ;;  %v3338_v33 = vsel %vm3114_vm2, 0, %v340_v27  ;;  %v3342_v35 = vsel %vm3114_vm2, 0, %v368_v28  ;;  %v3346_v39 = vsel %vm3114_vm2, 0, %v396_v29 }
  0x46   : > { %1146 = vmatpush.bf16.msrb.mxu1 %v2855_v44  ;;  %1557 = vmatpush.bf16.msrb.mxu0 %v2831_v45  ;;  %4086 = vst [vmem:[#allocation5_spill] sm:$0xff] %v3338_v33  ;;  %v476_v44 = vsel %vm3114_vm2, %v3101_v15, 0  ;;  %v502_v45 = vshrl.u32 %v3128_v31, 16  ;;  %v516_v15 = vshll.u32 %v3212_v7, 16  ;;  %v3394_v51 = vsel %vm743_vm4, %v749_v16, %v750_v20 }
  0x47   : > { %4087 = vst [vmem:[#allocation6_spill] sm:$0xff] %v3342_v35  ;;  %v3350_v41 = vsel %vm3114_vm2, 0, %v424_v30  ;;  %v747_v52 = vrot.slane %v476_v44, 1  ;;  %v528_v25 = vshll.u32 %v3290_v58, 16  ;;  %v478_v27 = vsel %vm3114_vm2, %v3258_v34, 0 }
  0x48   : > { %v526_v28 = vshrl.u32 %v3290_v58, 16  ;;  %v533_v30 = vshll.u32 %v478_v27, 16  ;;  %v540_v34 = vshll.u32 %v3338_v33, 16 }
  0x49   : > { %1236 = vmatpush.bf16.msrb.mxu2 %v2862_v46  ;;  %1469 = vmatpush.bf16.msrb.mxu3 %v2822_v47  ;;  %v506_v46 = vrot.slane %v504_v43, 1  ;;  %v509_v47 = vshll.u32 %v476_v44, 16  ;;  %v3367_v61 = vsel %vm743_vm4, %v746_v50, %v747_v52  ;;  %v530_v29 = vrot.slane %v528_v25, 1 }
  0x4a   : > { %1147 = vmatpush.bf16.msrb.mxu1 %v2854_v54  ;;  %1558 = vmatpush.bf16.msrb.mxu0 %v2830_v56  ;;  %v4056_v54 = vmov 0   ;;  %v535_v44 = vrot.slane %v533_v30, 1  ;;  %v479_v50 = vsel %vm3114_vm2, %v3324_v14, 0  ;;  %v538_v52 = vshrl.u32 %v3338_v33, 16 }
  0x4b   : > { %1069 = vmatmul.bf16.gmra.mxu0 %v3290_v58  ;;  %1089 = vmatmul.bf16.gmra.mxu1 %v3294_v59  ;;  %v507_v48 = vor.u32 %v506_v46, %v502_v45  ;;  %v511_v49 = vrot.slane %v509_v47, 1  ;;  %v3363_v56 = vrot.slane %v4056_v54, 1  ;;  %v531_v43 = vor.u32 %v530_v29, %v526_v28 }
  0x4c   : > { %1109 = vmatmul.bf16.gmra.mxu2 %v3300_v62  ;;  %1129 = vmatmul.bf16.gmra.mxu3 %v3304_v63  ;;  %v752_v45 = vrot.slane %v3290_v58, 1  ;;  %v753_v46 = vrot.slane %v478_v27, 1  ;;  %v755_v14 = vrot.slane %v3338_v33, 1  ;;  %v758_v28 = vrot.slane %v3132_v32, 1 }
  0x4d   : > { %1921 = vmatpush.bf16.msra.mxu2 %v2877_v4  ;;  %2010 = vmatpush.bf16.msra.mxu3 %v2885_v5  ;;  %v512_v60 = vsel %vm492_vm3, %v507_v48, %v511_v49  ;;  %v2892_v4 = vld [vmem:[%s4052_s1 + $0x230] sm:$0xff]  ;;  %v514_v5 = vshrl.u32 %v3212_v7, 16  ;;  %v3406_v47 = vsel %vm492_vm3, %v531_v43, %v535_v44  ;;  %v2875_v48 = vld [vmem:[%s4052_s1 + $0x1a8] sm:$0xff] }
  0x4e   : > { %1640 = vmatpush.bf16.msra.mxu1 %v2845_v6  ;;  %2099 = vmatpush.bf16.msra.mxu0 %v2893_v11  ;;  %v518_v6 = vrot.slane %v516_v15, 1  ;;  %v523_v11 = vrot.slane %v521_v9, 1  ;;  %v2883_v49 = vld [vmem:[%s4052_s1 + $0x1e8] sm:$0xff]  ;;  %v545_v15 = vshll.u32 %v479_v50, 16  ;;  %v552_v9 = vshll.u32 %v3132_v32, 16 }
  0x50   : > { %v519_v10 = vor.u32 %v518_v6, %v514_v5  ;;  %v547_v3 = vrot.slane %v545_v15, 1  ;;  %v554_v16 = vrot.slane %v552_v9, 1  ;;  %v562_v15 = vshrl.u32 %v3216_v8, 16 }
  0x51   : > { %1922 = vmatpush.bf16.msra.mxu2 %v2876_v0  ;;  %2011 = vmatpush.bf16.msra.mxu3 %v2884_v1  ;;  %v2843_v0 = vld [vmem:[%s4052_s1 + $0xa8] sm:$0xff] }
  0x52   : > { %1641 = vmatpush.bf16.msra.mxu1 %v2844_v2  ;;  %2100 = vmatpush.bf16.msra.mxu0 %v2892_v4  ;;  %v3391_v23 = vsel %vm492_vm3, %v519_v10, %v523_v11  ;;  %v2891_v1 = vld [vmem:[%s4052_s1 + $0x228] sm:$0xff]  ;;  %v756_v4 = vrot.slane %v479_v50, 1  ;;  %v480_v10 = vsel %vm3114_vm2, %v3103_v17, 0  ;;  %v550_v11 = vshrl.u32 %v3132_v32, 16 }
  0x53   : > { %v557_v20 = vshll.u32 %v480_v10, 16  ;;  %v759_v29 = vrot.slane %v480_v10, 1  ;;  %v564_v17 = vshll.u32 %v3216_v8, 16 }
  0x54   : > { %v3437_v6 = vsel %vm743_vm4, %v755_v14, %v756_v4  ;;  %v555_v25 = vor.u32 %v554_v16, %v550_v11  ;;  %v761_v4 = vrot.slane %v3216_v8, 1 }
  0x55   : > { %1923 = vmatpush.bf16.msra.mxu2 %v2875_v48  ;;  %2012 = vmatpush.bf16.msra.mxu3 %v2883_v49  ;;  %4089 = vst [vmem:[#allocation8_spill] sm:$0xff] %v3437_v6  ;;  %v559_v27 = vrot.slane %v557_v20, 1  ;;  %v481_v48 = vsel %vm3114_vm2, %v3176_v53, 0  ;;  %v2890_v53 = vld [vmem:[%s4052_s1 + $0x220] sm:$0xff] }
  0x56   : > { %1642 = vmatpush.bf16.msra.mxu1 %v2843_v0  ;;  %2101 = vmatpush.bf16.msra.mxu0 %v2891_v1  ;;  %v566_v0 = vrot.slane %v564_v17, 1  ;;  %v569_v1 = vshll.u32 %v481_v48, 16  ;;  %v762_v9 = vrot.slane %v481_v48, 1 }
  0x57   : > { %v3454_v44 = vsel %vm492_vm3, %v555_v25, %v559_v27 }
  0x58   : > { %4090 = vst [vmem:[#allocation9_spill] sm:$0xff] %v3454_v44  ;;  %v571_v14 = vrot.slane %v569_v1, 1  ;;  %v3501_v27 = vsel %vm743_vm4, %v761_v4, %v762_v9 }
  0x59   : > { %4095 = vst [vmem:[#allocation14_spill] sm:$0xff] %v3501_v27 }
  0x5a   : > { %2102 = vmatpush.bf16.msra.mxu0 %v2890_v53 }
  0x5b   : > { %1074 = vmatmul.bf16.gmra.mxu0 %v3338_v33  ;;  %1094 = vmatmul.bf16.gmra.mxu1 %v3342_v35 }
  0x5c   : > { %1114 = vmatmul.bf16.gmra.mxu2 %v3346_v39  ;;  %1134 = vmatmul.bf16.gmra.mxu3 %v3350_v41 }
  0x6b   : > { %1148 = vmatmul.bf16.vlgmr.msrb.gmra.mxu1 %v512_v60  ;;  %1559 = vmatmul.bf16.vlgmr.msrb.gmra.mxu0 %v3363_v56 }
  0x6c   : > { %1237 = vmatmul.bf16.vlgmr.msrb.gmra.mxu2 %v3367_v61  ;;  %1470 = vmatmul.bf16.vlgmr.msrb.gmra.mxu3 %v4056_v54 }
  0x7b   : > { %1153 = vmatmul.bf16.gmra.mxu1 %v3391_v23  ;;  %1564 = vmatmul.bf16.gmra.mxu0 %v512_v60  ;;  %v542_v60 = vrot.slane %v540_v34, 1  ;;  %v2882_v34 = vld [vmem:[%s4052_s1 + $0x1e0] sm:$0xff] }
  0x7c   : > { %1242 = vmatmul.bf16.gmra.mxu2 %v3394_v51  ;;  %1475 = vmatmul.bf16.gmra.mxu3 %v3128_v31  ;;  %v3409_v31 = vsel %vm743_vm4, %v752_v45, %v753_v46  ;;  %v3457_v45 = vsel %vm743_vm4, %v758_v28, %v759_v29  ;;  %v2874_v46 = vld [vmem:[%s4052_s1 + $0x1a0] sm:$0xff]  ;;  %v576_v28 = vshll.u32 %v3294_v59, 16  ;;  %v482_v29 = vsel %vm3114_vm2, %v3260_v38, 0 }
  0x7d   : > { %v543_v2 = vor.u32 %v542_v60, %v538_v52  ;;  %4091 = vst [vmem:[#allocation10_spill] sm:$0xff] %v3457_v45  ;;  %1924 = vmatpush.bf16.msra.mxu2 %v2874_v46  ;;  %2013 = vmatpush.bf16.msra.mxu3 %v2882_v34  ;;  %v581_v1 = vshll.u32 %v482_v29, 16 }
  0x7f   : > { %v3434_v5 = vsel %vm492_vm3, %v543_v2, %v547_v3  ;;  %v2842_v2 = vld [vmem:[%s4052_s1 + $0xa0] sm:$0xff]  ;;  %v567_v3 = vor.u32 %v566_v0, %v562_v15  ;;  %v574_v15 = vshrl.u32 %v3294_v59, 16  ;;  %v578_v0 = vrot.slane %v576_v28, 1 }
  0x80   : > { %4088 = vst [vmem:[#allocation7_spill] sm:$0xff] %v3434_v5  ;;  %1643 = vmatpush.bf16.msra.mxu1 %v2842_v2  ;;  %v583_v53 = vrot.slane %v581_v1, 1  ;;  %v588_v28 = vshll.u32 %v3342_v35, 16 }
  0x81   : > { %v3498_v25 = vsel %vm492_vm3, %v567_v3, %v571_v14  ;;  %v579_v2 = vor.u32 %v578_v0, %v574_v15  ;;  %v764_v3 = vrot.slane %v3294_v59, 1  ;;  %v765_v14 = vrot.slane %v482_v29, 1  ;;  %v2873_v29 = vld [vmem:[%s4052_s1 + $0x198] sm:$0xff] }
  0x82   : > { %4094 = vst [vmem:[#allocation13_spill] sm:$0xff] %v3498_v25  ;;  %v2881_v15 = vld [vmem:[%s4052_s1 + $0x1d8] sm:$0xff]  ;;  %v483_v0 = vsel %vm3114_vm2, %v3326_v18, 0  ;;  %1925 = vmatpush.bf16.msra.mxu2 %v2873_v29 }
  0x83   : > { %2014 = vmatpush.bf16.msra.mxu3 %v2881_v15  ;;  %v2889_v18 = vld [vmem:[%s4052_s1 + $0x218] sm:$0xff] }
  0x84   : > { %2103 = vmatpush.bf16.msra.mxu0 %v2889_v18 }
  0x8b   : > { %1158 = vmatmul.bf16.gmra.mxu1 %v3406_v47  ;;  %1569 = vmatmul.bf16.gmra.mxu0 %v3391_v23 }
  0x8c   : > { %1247 = vmatmul.bf16.gmra.mxu2 %v3409_v31  ;;  %1480 = vmatmul.bf16.gmra.mxu3 %v3212_v7 }
  0x9b   : > { %1163 = vmatmul.bf16.gmra.mxu1 %v3434_v5  ;;  %1574 = vmatmul.bf16.gmra.mxu0 %v3406_v47 }
  0x9c   : > { %1252 = vmatmul.bf16.gmra.mxu2 %v3437_v6  ;;  %1485 = vmatmul.bf16.gmra.mxu3 %v3290_v58 }
  0xa8   : > { %v3449_v30 = vpop.f32.mrf.mxu0  ;;  %v3451_v43 = vpop.f32.mrf.mxu1 }
  0xab   : > { %1168 = vmatmul.bf16.gmra.mxu1 %v3454_v44  ;;  %1579 = vmatmul.bf16.gmra.mxu0 %v3434_v5 }
  0xac   : > { %1257 = vmatmul.bf16.gmra.mxu2 %v3457_v45  ;;  %1490 = vmatmul.bf16.gmra.mxu3 %v3338_v33 }
  0xaf   : > { %v3473_v49 = vpop.f32.mrf.mxu2  ;;  %v3475_v50 = vpop.f32.mrf.mxu3 }
  0xb0   : > { %4092 = vst [vmem:[#allocation11_spill] sm:$0xff] %v3475_v50  ;;  %v3477_v52 = vpop.f32.mrf.mxu0  ;;  %v3479_v60 = vpop.f32.mrf.mxu1  ;;  %v2841_v50 = vld [vmem:[%s4052_s1 + $0x98] sm:$0xff] }
  0xb1   : > { %1644 = vmatpush.bf16.msra.mxu1 %v2841_v50  ;;  %v600_v50 = vshll.u32 %v3141_v36, 16 }
  0xb3   : > { %v602_v18 = vrot.slane %v600_v50, 1  ;;  %v612_v50 = vshll.u32 %v3223_v12, 16 }
  0xb7   : > { %v3489_v10 = vpop.f32.mrf.mxu2  ;;  %v3491_v11 = vpop.f32.mrf.mxu3 }
  0xb8   : > { %4093 = vst [vmem:[#allocation12_spill] sm:$0xff] %v3491_v11  ;;  %v3493_v16 = vpop.f32.mrf.mxu0  ;;  %v3495_v20 = vpop.f32.mrf.mxu1  ;;  %v3533_v11 = vsel %vm743_vm4, %v764_v3, %v765_v14  ;;  %v586_v14 = vshrl.u32 %v3342_v35, 16 }
  0xb9   : > { %4099 = vst [vmem:[#allocation18_spill] sm:$0xff] %v3533_v11 }
  0xbb   : > { %1173 = vmatmul.bf16.gmra.mxu1 %v3498_v25  ;;  %1584 = vmatmul.bf16.gmra.mxu0 %v3454_v44 }
  0xbc   : > { %1262 = vmatmul.bf16.gmra.mxu2 %v3501_v27  ;;  %1495 = vmatmul.bf16.gmra.mxu3 %v3132_v32 }
  0xbf   : > { %v3511_v17 = vpop.f32.mrf.mxu2  ;;  %v3513_v46 = vpop.f32.mrf.mxu3 }
  0xc0   : > { %4096 = vst [vmem:[#allocation15_spill] sm:$0xff] %v3513_v46  ;;  %v3515_v34 = vpop.f32.mrf.mxu0  ;;  %v3517_v48 = vpop.f32.mrf.mxu1  ;;  %v3530_v46 = vsel %vm492_vm3, %v579_v2, %v583_v53 }
  0xc1   : > { %4098 = vst [vmem:[#allocation17_spill] sm:$0xff] %v3530_v46 }
  0xc7   : > { %v3521_v4 = vpop.f32.mrf.mxu2  ;;  %v3523_v38 = vpop.f32.mrf.mxu3 }
  0xc8   : > { %4097 = vst [vmem:[#allocation16_spill] sm:$0xff] %v3523_v38  ;;  %v3525_v9 = vpop.f32.mrf.mxu0  ;;  %v3527_v54 = vpop.f32.mrf.mxu1  ;;  %v590_v38 = vrot.slane %v588_v28, 1 }
  0xca   : > { %v591_v29 = vor.u32 %v590_v38, %v586_v14  ;;  %v598_v14 = vshrl.u32 %v3141_v36, 16 }
  0xcb   : > { %1178 = vmatmul.bf16.gmra.mxu1 %v3530_v46  ;;  %1589 = vmatmul.bf16.gmra.mxu0 %v3498_v25  ;;  %v768_v25 = vrot.slane %v483_v0, 1 }
  0xcc   : > { %1267 = vmatmul.bf16.gmra.mxu2 %v3533_v11  ;;  %1500 = vmatmul.bf16.gmra.mxu3 %v3216_v8  ;;  %v593_v11 = vshll.u32 %v483_v0, 16 }
  0xce   : > { %v595_v15 = vrot.slane %v593_v11, 1  ;;  %v484_v11 = vsel %vm3114_vm2, %v3105_v19, 0 }
  0xcf   : > { %v3549_v1 = vpop.f32.mrf.mxu2  ;;  %v3551_v2 = vpop.f32.mrf.mxu3 }
  0xd0   : > { %4100 = vst [vmem:[#allocation19_spill] sm:$0xff] %v3549_v1  ;;  %v3553_v53 = vpop.f32.mrf.mxu0  ;;  %v3555_v3 = vpop.f32.mrf.mxu1  ;;  %v3574_v32 = vsel %vm492_vm3, %v591_v29, %v595_v15  ;;  %v605_v29 = vshll.u32 %v484_v11, 16  ;;  %v603_v15 = vor.u32 %v602_v18, %v598_v14 }
  0xd1   : > { %4101 = vst [vmem:[#allocation20_spill] sm:$0xff] %v3551_v2  ;;  %v767_v2 = vrot.slane %v3342_v35, 1 }
  0xd2   : > { %4104 = vst [vmem:[#allocation23_spill] sm:$0xff] %v3574_v32 }
  0xd3   : > { %v3577_v45 = vsel %vm743_vm4, %v767_v2, %v768_v25 }
  0xd4   : > { %4105 = vst [vmem:[#allocation24_spill] sm:$0xff] %v3577_v45 }
  0xd7   : > { %v3565_v8 = vpop.f32.mrf.mxu2  ;;  %v3567_v27 = vpop.f32.mrf.mxu3 }
  0xd8   : > { %4102 = vst [vmem:[#allocation21_spill] sm:$0xff] %v3565_v8  ;;  %v3569_v28 = vpop.f32.mrf.mxu0  ;;  %v3571_v44 = vpop.f32.mrf.mxu1 }
  0xd9   : > { %4103 = vst [vmem:[#allocation22_spill] sm:$0xff] %v3567_v27  ;;  %v607_v27 = vrot.slane %v605_v29, 1  ;;  %v610_v29 = vshrl.u32 %v3223_v12, 16 }
  0xdb   : > { %1183 = vmatmul.bf16.gmra.mxu1 %v3574_v32  ;;  %1594 = vmatmul.bf16.gmra.mxu0 %v3530_v46  ;;  %v771_v46 = vrot.slane %v484_v11, 1 }
  0xdc   : > { %1272 = vmatmul.bf16.gmra.mxu2 %v3577_v45  ;;  %1505 = vmatmul.bf16.gmra.mxu3 %v3294_v59  ;;  %v770_v45 = vrot.slane %v3141_v36, 1 }
  0xde   : > { %v3606_v5 = vsel %vm743_vm4, %v770_v45, %v771_v46  ;;  %v485_v45 = vsel %vm3114_vm2, %v3178_v55, 0  ;;  %v2888_v55 = vld [vmem:[%s4052_s1 + $0x210] sm:$0xff] }
  0xdf   : > { %v3587_v38 = vpop.f32.mrf.mxu2  ;;  %v3589_v0 = vpop.f32.mrf.mxu3  ;;  %4110 = vst [vmem:[#allocation29_spill] sm:$0xff] %v3606_v5  ;;  %2104 = vmatpush.bf16.msra.mxu0 %v2888_v55  ;;  %v622_v55 = vshrl.u32 %v3300_v62, 16 }
  0xe0   : > { %4106 = vst [vmem:[#allocation25_spill] sm:$0xff] %v3587_v38  ;;  %v3591_v25 = vpop.f32.mrf.mxu0  ;;  %v3593_v2 = vpop.f32.mrf.mxu1 }
  0xe1   : > { %4107 = vst [vmem:[#allocation26_spill] sm:$0xff] %v3589_v0  ;;  %v3602_v0 = vsel %vm492_vm3, %v603_v15, %v607_v27  ;;  %v2872_v27 = vld [vmem:[%s4052_s1 + $0x190] sm:$0xff]  ;;  %v614_v15 = vrot.slane %v612_v50, 1  ;;  %v773_v50 = vrot.slane %v3223_v12, 1 }
  0xe2   : > { %1926 = vmatpush.bf16.msra.mxu2 %v2872_v27 }
  0xe3   : > { %v615_v27 = vor.u32 %v614_v15, %v610_v29 }
  0xe7   : > { %v3597_v59 = vpop.f32.mrf.mxu2  ;;  %v3599_v19 = vpop.f32.mrf.mxu3 }
  0xe8   : > { %4108 = vst [vmem:[#allocation27_spill] sm:$0xff] %v3597_v59  ;;  %v1149_v38 = vpop.f32.mrf.mxu1  ;;  %v1560_v8 = vpop.f32.mrf.mxu0 }
  0xe9   : > { %4109 = vst [vmem:[#allocation28_spill] sm:$0xff] %v3599_v19  ;;  %v1150_v1 = vadd.f32 %v1149_v38, %v3449_v30  ;;  %v2880_v30 = vld [vmem:[%s4052_s1 + $0x1d0] sm:$0xff]  ;;  %v617_v19 = vshll.u32 %v485_v45, 16 }
  0xea   : > { %2015 = vmatpush.bf16.msra.mxu3 %v2880_v30 }
  0xeb   : > { %1188 = vmatmul.bf16.gmra.mxu1 %v3602_v0  ;;  %1599 = vmatmul.bf16.gmra.mxu0 %v3574_v32  ;;  %v619_v30 = vrot.slane %v617_v19, 1 }
  0xec   : > { %1277 = vmatmul.bf16.gmra.mxu2 %v3606_v5  ;;  %1510 = vmatmul.bf16.gmra.mxu3 %v3342_v35  ;;  %v2840_v35 = vld [vmem:[%s4052_s1 + $0x90] sm:$0xff] }
  0xed   : > { %1645 = vmatpush.bf16.msra.mxu1 %v2840_v35  ;;  %v3634_v33 = vsel %vm492_vm3, %v615_v27, %v619_v30 }
  0xef   : > { %v1238_v46 = vpop.f32.mrf.mxu2  ;;  %v1471_v11 = vpop.f32.mrf.mxu3 }
  0xf0   : > { %v1239_v38 = vadd.f32 %v1238_v46, %v1150_v1  ;;  %v1151_v14 = vpop.f32.mrf.mxu1  ;;  %v1562_v18 = vpop.f32.mrf.mxu0  ;;  %v774_v46 = vrot.slane %v485_v45, 1 }
  0xf1   : > { %v1152_v5 = vadd.f32 %v1151_v14, %v3477_v52 }
  0xf2   : > { %v1472_v32 = vadd.f32 %v1471_v11, %v1239_v38  ;;  %v3638_v29 = vsel %vm743_vm4, %v773_v50, %v774_v46 }
  0xf3   : > { %4112 = vst [vmem:[#allocation31_spill] sm:$0xff] %v3638_v29 }
  0xf4   : > { %v3630_v1 = vadd.f32 %v1560_v8, %v1472_v32  ;;  %v624_v32 = vshll.u32 %v3300_v62, 16 }
  0xf6   : > { %4111 = vst [vmem:[#allocation30_spill] sm:$0xff] %v3630_v1  ;;  %v626_v27 = vrot.slane %v624_v32, 1 }
  0xf7   : > { %v1240_v59 = vpop.f32.mrf.mxu2  ;;  %v1473_v52 = vpop.f32.mrf.mxu3 }
  0xf8   : > { %v1241_v11 = vadd.f32 %v1240_v59, %v1152_v5  ;;  %v1154_v38 = vpop.f32.mrf.mxu1  ;;  %v1565_v14 = vpop.f32.mrf.mxu0  ;;  %v486_v59 = vsel %vm3114_vm2, %v3262_v40, 0 }
  0xf9   : > { %v1155_v6 = vadd.f32 %v1154_v38, %v3493_v16  ;;  %v629_v30 = vshll.u32 %v486_v59, 16  ;;  %v776_v38 = vrot.slane %v3300_v62, 1 }
  0xfa   : > { %v1474_v35 = vadd.f32 %v1473_v52, %v1241_v11  ;;  %v627_v52 = vor.u32 %v626_v27, %v622_v55 }
  0xfb   : > { %1193 = vmatmul.bf16.gmra.mxu1 %v3634_v33  ;;  %1604 = vmatmul.bf16.gmra.mxu0 %v3602_v0  ;;  %v631_v11 = vrot.slane %v629_v30, 1 }
  0xfc   : > { %1282 = vmatmul.bf16.gmra.mxu2 %v3638_v29  ;;  %1515 = vmatmul.bf16.gmra.mxu3 %v3141_v36  ;;  %v3645_v8 = vadd.f32 %v1562_v18, %v1474_v35  ;;  %v777_v35 = vrot.slane %v486_v59, 1  ;;  %v2871_v59 = vld [vmem:[%s4052_s1 + $0x188] sm:$0xff] }
  0xfd   : > { %v3656_v29 = vsel %vm492_vm3, %v627_v52, %v631_v11  ;;  %1927 = vmatpush.bf16.msra.mxu2 %v2871_v59 }
  0xfe   : > { %4113 = vst [vmem:[#allocation32_spill] sm:$0xff] %v3645_v8 }
  0xff   : > { %v1243_v5 = vpop.f32.mrf.mxu2  ;;  %v1476_v16 = vpop.f32.mrf.mxu3 }
 0x100   : > { %v1244_v19 = vadd.f32 %v1243_v5, %v1155_v6  ;;  %v1156_v45 = vpop.f32.mrf.mxu1  ;;  %v1567_v15 = vpop.f32.mrf.mxu0 }
 0x101   : > { %v1157_v50 = vadd.f32 %v1156_v45, %v3515_v34  ;;  %v3660_v34 = vsel %vm743_vm4, %v776_v38, %v777_v35 }
 0x102   : > { %v1477_v46 = vadd.f32 %v1476_v16, %v1244_v19 }
 0x104   : > { %v3652_v18 = vadd.f32 %v1565_v14, %v1477_v46  ;;  %v636_v14 = vshll.u32 %v3346_v39, 16 }
 0x106   : > { %v638_v46 = vrot.slane %v636_v14, 1 }
 0x107   : > { %v1245_v40 = vpop.f32.mrf.mxu2  ;;  %v1478_v8 = vpop.f32.mrf.mxu3 }
 0x108   : > { %v1246_v1 = vadd.f32 %v1245_v40, %v1157_v50  ;;  %v1159_v6 = vpop.f32.mrf.mxu1  ;;  %v1570_v5 = vpop.f32.mrf.mxu0  ;;  %v634_v50 = vshrl.u32 %v3346_v39, 16 }
 0x109   : > { %v1160_v32 = vadd.f32 %v1159_v6, %v3525_v9  ;;  %v2879_v9 = vld [vmem:[%s4052_s1 + $0x1c8] sm:$0xff] }
 0x10a   : > { %v1479_v16 = vadd.f32 %v1478_v8, %v1246_v1  ;;  %v487_v1 = vsel %vm3114_vm2, %v3328_v22, 0  ;;  %2016 = vmatpush.bf16.msra.mxu3 %v2879_v9  ;;  %v2887_v22 = vld [vmem:[%s4052_s1 + $0x208] sm:$0xff]  ;;  %v639_v35 = vor.u32 %v638_v46, %v634_v50 }
 0x10b   : > { %1198 = vmatmul.bf16.gmra.mxu1 %v3656_v29  ;;  %1609 = vmatmul.bf16.gmra.mxu0 %v3634_v33  ;;  %v641_v52 = vshll.u32 %v487_v1, 16 }
 0x10c   : > { %1287 = vmatmul.bf16.gmra.mxu2 %v3660_v34  ;;  %1520 = vmatmul.bf16.gmra.mxu3 %v3223_v12  ;;  %v3673_v19 = vadd.f32 %v1567_v15, %v1479_v16  ;;  %v2839_v15 = vld [vmem:[%s4052_s1 + $0x88] sm:$0xff]  ;;  %v780_v16 = vrot.slane %v487_v1, 1 }
 0x10d   : > { %v643_v40 = vrot.slane %v641_v52, 1  ;;  %1646 = vmatpush.bf16.msra.mxu1 %v2839_v15  ;;  %2105 = vmatpush.bf16.msra.mxu0 %v2887_v22  ;;  %v646_v22 = vshrl.u32 %v3145_v37, 16 }
 0x10f   : > { %v1248_v8 = vpop.f32.mrf.mxu2  ;;  %v1481_v45 = vpop.f32.mrf.mxu3 }
 0x110   : > { %v1249_v55 = vadd.f32 %v1248_v8, %v1160_v32  ;;  %v1161_v27 = vpop.f32.mrf.mxu1  ;;  %v1572_v30 = vpop.f32.mrf.mxu0  ;;  %v779_v32 = vrot.slane %v3346_v39, 1 }
 0x111   : > { %v1162_v11 = vadd.f32 %v1161_v27, %v3553_v53 }
 0x112   : > { %v1482_v38 = vadd.f32 %v1481_v45, %v1249_v55  ;;  %v3690_v45 = vsel %vm492_vm3, %v639_v35, %v643_v40  ;;  %v3694_v27 = vsel %vm743_vm4, %v779_v32, %v780_v16 }
 0x114   : > { %v3686_v6 = vadd.f32 %v1570_v5, %v1482_v38  ;;  %v648_v5 = vshll.u32 %v3145_v37, 16 }
 0x116   : > { %4114 = vst [vmem:[#allocation33_spill] sm:$0xff] %v3686_v6  ;;  %v650_v35 = vrot.slane %v648_v5, 1 }
 0x117   : > { %v1250_v14 = vpop.f32.mrf.mxu2  ;;  %v1483_v53 = vpop.f32.mrf.mxu3 }
 0x118   : > { %v1251_v59 = vadd.f32 %v1250_v14, %v1162_v11  ;;  %v1164_v9 = vpop.f32.mrf.mxu1  ;;  %v1575_v8 = vpop.f32.mrf.mxu0  ;;  %v651_v14 = vor.u32 %v650_v35, %v646_v22 }
 0x119   : > { %v1165_v55 = vadd.f32 %v1164_v9, %v3569_v28  ;;  %v488_v28 = vsel %vm3114_vm2, %v3107_v21, 0 }
 0x11a   : > { %v1484_v50 = vadd.f32 %v1483_v53, %v1251_v59  ;;  %v653_v40 = vshll.u32 %v488_v28, 16  ;;  %v782_v59 = vrot.slane %v3145_v37, 1  ;;  %v783_v9 = vrot.slane %v488_v28, 1  ;;  %v2870_v28 = vld [vmem:[%s4052_s1 + $0x180] sm:$0xff] }
 0x11b   : > { %1203 = vmatmul.bf16.gmra.mxu1 %v3690_v45  ;;  %1614 = vmatmul.bf16.gmra.mxu0 %v3656_v29 }
 0x11c   : > { %1292 = vmatmul.bf16.gmra.mxu2 %v3694_v27  ;;  %1525 = vmatmul.bf16.gmra.mxu3 %v3300_v62  ;;  %v3701_v1 = vadd.f32 %v1572_v30, %v1484_v50  ;;  %v655_v53 = vrot.slane %v653_v40, 1  ;;  %v3715_v5 = vsel %vm743_vm4, %v782_v59, %v783_v9 }
 0x11d   : > { %1928 = vmatpush.bf16.msra.mxu2 %v2870_v28 }
 0x11e   : > { %4115 = vst [vmem:[#allocation34_spill] sm:$0xff] %v3701_v1  ;;  %v3712_v6 = vsel %vm492_vm3, %v651_v14, %v655_v53  ;;  %v658_v14 = vshrl.u32 %v3227_v13, 16 }
 0x11f   : > { %v1253_v46 = vpop.f32.mrf.mxu2  ;;  %v1486_v52 = vpop.f32.mrf.mxu3 }
 0x120   : > { %v1254_v11 = vadd.f32 %v1253_v46, %v1165_v55  ;;  %v1166_v38 = vpop.f32.mrf.mxu1  ;;  %v1577_v15 = vpop.f32.mrf.mxu0 }
 0x121   : > { %v1167_v32 = vadd.f32 %v1166_v38, %v3591_v25 }
 0x122   : > { %v1487_v16 = vadd.f32 %v1486_v52, %v1254_v11  ;;  %v2878_v52 = vld [vmem:[%s4052_s1 + $0x1c0] sm:$0xff] }
 0x123   : > { %2017 = vmatpush.bf16.msra.mxu3 %v2878_v52 }
 0x124   : > { %v3708_v30 = vadd.f32 %v1575_v8, %v1487_v16  ;;  %v660_v8 = vshll.u32 %v3227_v13, 16 }
 0x126   : > { %v662_v53 = vrot.slane %v660_v8, 1 }
 0x127   : > { %v1255_v21 = vpop.f32.mrf.mxu2  ;;  %v1488_v50 = vpop.f32.mrf.mxu3 }
 0x128   : > { %v1256_v1 = vadd.f32 %v1255_v21, %v1167_v32  ;;  %v1169_v55 = vpop.f32.mrf.mxu1  ;;  %v1580_v46 = vpop.f32.mrf.mxu0 }
 0x129   : > { %v1170_v38 = vadd.f32 %v1169_v55, %v3451_v43  ;;  %v663_v43 = vor.u32 %v662_v53, %v658_v14  ;;  %v785_v55 = vrot.slane %v3227_v13, 1 }
 0x12a   : > { %v1489_v25 = vadd.f32 %v1488_v50, %v1256_v1  ;;  %v489_v1 = vsel %vm3114_vm2, %v3180_v57, 0  ;;  %v2886_v57 = vld [vmem:[%s4052_s1 + $0x200] sm:$0xff] }
 0x12b   : > { %1208 = vmatmul.bf16.gmra.mxu1 %v3712_v6  ;;  %1619 = vmatmul.bf16.gmra.mxu0 %v3690_v45  ;;  %v665_v59 = vshll.u32 %v489_v1, 16 }
 0x12c   : > { %1297 = vmatmul.bf16.gmra.mxu2 %v3715_v5  ;;  %1530 = vmatmul.bf16.gmra.mxu3 %v3346_v39  ;;  %v3728_v11 = vadd.f32 %v1577_v15, %v1489_v25  ;;  %v2838_v15 = vld [vmem:[%s4052_s1 + $0x80] sm:$0xff]  ;;  %v786_v25 = vrot.slane %v489_v1, 1  ;;  %v490_v1 = vsel %vm3114_vm2, %v3264_v42, 0 }
 0x12d   : > { %v667_v21 = vrot.slane %v665_v59, 1  ;;  %1647 = vmatpush.bf16.msra.mxu1 %v2838_v15  ;;  %2106 = vmatpush.bf16.msra.mxu0 %v2886_v57 }
 0x12e   : > { %v3749_v14 = vsel %vm743_vm4, %v785_v55, %v786_v25  ;;  %v677_v25 = vshll.u32 %v490_v1, 16 }
 0x12f   : > { %v1258_v22 = vpop.f32.mrf.mxu2  ;;  %v1491_v35 = vpop.f32.mrf.mxu3 }
 0x130   : > { %v1259_v40 = vadd.f32 %v1258_v22, %v1170_v38  ;;  %v1171_v32 = vpop.f32.mrf.mxu1  ;;  %v1582_v16 = vpop.f32.mrf.mxu0 }
 0x131   : > { %v1172_v8 = vadd.f32 %v1171_v32, %v3479_v60  ;;  %v672_v60 = vshll.u32 %v3304_v63, 16 }
 0x132   : > { %v1492_v9 = vadd.f32 %v1491_v35, %v1259_v40  ;;  %v3746_v40 = vsel %vm492_vm3, %v663_v43, %v667_v21  ;;  %v670_v21 = vshrl.u32 %v3304_v63, 16 }
 0x133   : > { %v674_v55 = vrot.slane %v672_v60, 1 }
 0x134   : > { %v3741_v50 = vadd.f32 %v1580_v46, %v1492_v9 }
 0x136   : > { %4116 = vst [vmem:[#allocation35_spill] sm:$0xff] %v3741_v50 }
 0x137   : > { %v1260_v28 = vpop.f32.mrf.mxu2  ;;  %v1493_v52 = vpop.f32.mrf.mxu3 }
 0x138   : > { %v1261_v38 = vadd.f32 %v1260_v28, %v1172_v8  ;;  %v1174_v22 = vpop.f32.mrf.mxu1  ;;  %v1585_v35 = vpop.f32.mrf.mxu0  ;;  %v675_v28 = vor.u32 %v674_v55, %v670_v21 }
 0x139   : > { %v1175_v32 = vadd.f32 %v1174_v22, %v3495_v20 }
 0x13a   : > { %v1494_v53 = vadd.f32 %v1493_v52, %v1261_v38  ;;  %v679_v52 = vrot.slane %v677_v25, 1  ;;  %v788_v38 = vrot.slane %v3304_v63, 1 }
 0x13b   : > { %1213 = vmatmul.bf16.gmra.mxu1 %v3746_v40  ;;  %1624 = vmatmul.bf16.gmra.mxu0 %v3712_v6 }
 0x13c   : > { %1302 = vmatmul.bf16.gmra.mxu2 %v3749_v14  ;;  %1535 = vmatmul.bf16.gmra.mxu3 %v3145_v37  ;;  %v3756_v46 = vadd.f32 %v1582_v16, %v1494_v53  ;;  %v789_v53 = vrot.slane %v490_v1, 1  ;;  %v3768_v50 = vsel %vm492_vm3, %v675_v28, %v679_v52  ;;  %v491_v1 = vsel %vm3114_vm2, %v3330_v24, 0 }
 0x13d   : > { %v689_v52 = vshll.u32 %v491_v1, 16  ;;  %v792_v26 = vrot.slane %v491_v1, 1 }
 0x13e   : > { %4117 = vst [vmem:[#allocation36_spill] sm:$0xff] %v3756_v46  ;;  %v3771_v60 = vsel %vm743_vm4, %v788_v38, %v789_v53 }
 0x13f   : > { %v1263_v59 = vpop.f32.mrf.mxu2  ;;  %v1496_v9 = vpop.f32.mrf.mxu3 }
 0x140   : > { %v1264_v15 = vadd.f32 %v1263_v59, %v1175_v32  ;;  %v1176_v57 = vpop.f32.mrf.mxu1  ;;  %v1587_v43 = vpop.f32.mrf.mxu0 }
 0x141   : > { %v1177_v42 = vadd.f32 %v1176_v57, %v3517_v48  ;;  %v684_v48 = vshll.u32 %v3350_v41, 16 }
 0x142   : > { %v1497_v8 = vadd.f32 %v1496_v9, %v1264_v15 }
 0x143   : > { %v686_v28 = vrot.slane %v684_v48, 1 }
 0x144   : > { %v3763_v16 = vadd.f32 %v1585_v35, %v1497_v8  ;;  %v682_v8 = vshrl.u32 %v3350_v41, 16 }
 0x146   : > { %v687_v53 = vor.u32 %v686_v28, %v682_v8 }
 0x147   : > { %v1265_v20 = vpop.f32.mrf.mxu2  ;;  %v1498_v22 = vpop.f32.mrf.mxu3 }
 0x148   : > { %v1266_v46 = vadd.f32 %v1265_v20, %v1177_v42  ;;  %v1179_v32 = vpop.f32.mrf.mxu1  ;;  %v1590_v59 = vpop.f32.mrf.mxu0  ;;  %v691_v42 = vrot.slane %v689_v52, 1  ;;  %v791_v20 = vrot.slane %v3350_v41, 1 }
 0x149   : > { %v1180_v15 = vadd.f32 %v1179_v32, %v3527_v54 }
 0x14a   : > { %v1499_v9 = vadd.f32 %v1498_v22, %v1266_v46  ;;  %v3793_v48 = vsel %vm743_vm4, %v791_v20, %v792_v26 }
 0x14b   : > { %1218 = vmatmul.bf16.gmra.mxu1 %v3768_v50  ;;  %1629 = vmatmul.bf16.gmra.mxu0 %v3746_v40 }
 0x14c   : > { %1307 = vmatmul.bf16.gmra.mxu2 %v3771_v60  ;;  %1540 = vmatmul.bf16.gmra.mxu3 %v3227_v13  ;;  %v3778_v35 = vadd.f32 %v1587_v43, %v1499_v9 }
 0x14f   : > { %v1268_v57 = vpop.f32.mrf.mxu2  ;;  %v1501_v46 = vpop.f32.mrf.mxu3 }
 0x150   : > { %v1269_v21 = vadd.f32 %v1268_v57, %v1180_v15  ;;  %v1181_v55 = vpop.f32.mrf.mxu1  ;;  %v1592_v25 = vpop.f32.mrf.mxu0  ;;  %v3790_v57 = vsel %vm492_vm3, %v687_v53, %v691_v42 }
 0x151   : > { %v1182_v24 = vadd.f32 %v1181_v55, %v3555_v3 }
 0x152   : > { %v1502_v38 = vadd.f32 %v1501_v46, %v1269_v21 }
 0x154   : > { %v3785_v43 = vadd.f32 %v1590_v59, %v1502_v38 }
 0x157   : > { %v1270_v54 = vpop.f32.mrf.mxu2  ;;  %v1503_v22 = vpop.f32.mrf.mxu3 }
 0x158   : > { %v1271_v32 = vadd.f32 %v1270_v54, %v1182_v24  ;;  %v1184_v9 = vpop.f32.mrf.mxu1  ;;  %v1595_v15 = vpop.f32.mrf.mxu0 }
 0x159   : > { %v1185_v59 = vadd.f32 %v1184_v9, %v3571_v44 }
 0x15a   : > { %v1504_v46 = vadd.f32 %v1503_v22, %v1271_v32 }
 0x15b   : > { %1223 = vmatmul.bf16.gmra.mxu1 %v3790_v57  ;;  %1634 = vmatmul.bf16.gmra.mxu0 %v3768_v50 }
 0x15c   : > { %1312 = vmatmul.bf16.gmra.mxu2 %v3793_v48  ;;  %1545 = vmatmul.bf16.gmra.mxu3 %v3304_v63  ;;  %v3799_v3 = vadd.f32 %v1592_v25, %v1504_v46 }
 0x15f   : > { %v1273_v1 = vpop.f32.mrf.mxu2  ;;  %v1506_v21 = vpop.f32.mrf.mxu3 }
 0x160   : > { %v1274_v55 = vadd.f32 %v1273_v1, %v1185_v59  ;;  %v1186_v8 = vpop.f32.mrf.mxu1  ;;  %v1597_v28 = vpop.f32.mrf.mxu0 }
 0x161   : > { %v1187_v53 = vadd.f32 %v1186_v8, %v3593_v2 }
 0x162   : > { %v1507_v52 = vadd.f32 %v1506_v21, %v1274_v55 }
 0x164   : > { %v3802_v38 = vadd.f32 %v1595_v15, %v1507_v52 }
 0x167   : > { %v1275_v42 = vpop.f32.mrf.mxu2  ;;  %v1508_v20 = vpop.f32.mrf.mxu3 }
 0x168   : > { %v1276_v26 = vadd.f32 %v1275_v42, %v1187_v53  ;;  %v1189_v24 = vpop.f32.mrf.mxu1  ;;  %v1600_v54 = vpop.f32.mrf.mxu0 }
 0x169   : > { %v1190_v25 = vadd.f32 %v1189_v24, %v3473_v49 }
 0x16a   : > { %v1509_v22 = vadd.f32 %v1508_v20, %v1276_v26 }
 0x16b   : > { %1648 = vmatmul.bf16.vlgmr.msra.gmra.mxu1 %v3363_v56  ;;  %2107 = vmatmul.bf16.vlgmr.msra.gmra.mxu0 %v3394_v51 }
 0x16c   : > { %1929 = vmatmul.bf16.vlgmr.msra.gmra.mxu2 %v3212_v7  ;;  %2018 = vmatmul.bf16.vlgmr.msra.gmra.mxu3 %v3391_v23  ;;  %v3809_v44 = vadd.f32 %v1597_v28, %v1509_v22 }
 0x16f   : > { %v1278_v32 = vpop.f32.mrf.mxu2  ;;  %v1511_v2 = vpop.f32.mrf.mxu3 }
 0x170   : > { %v1279_v9 = vadd.f32 %v1278_v32, %v1190_v25  ;;  %v1191_v15 = vpop.f32.mrf.mxu1  ;;  %v1602_v46 = vpop.f32.mrf.mxu0 }
 0x171   : > { %v1192_v21 = vadd.f32 %v1191_v15, %v3489_v10  ;;  %v4118_v15 = vld [vmem:[#allocation8_spill] sm:$0xff] }
 0x172   : > { %v1512_v59 = vadd.f32 %v1511_v2, %v1279_v9 }
 0x174   : > { %v3812_v1 = vadd.f32 %v1600_v54, %v1512_v59 }
 0x177   : > { %v1280_v55 = vpop.f32.mrf.mxu2  ;;  %v1513_v8 = vpop.f32.mrf.mxu3 }
 0x178   : > { %v1281_v52 = vadd.f32 %v1280_v55, %v1192_v21  ;;  %v1194_v7 = vpop.f32.mrf.mxu1  ;;  %v1605_v53 = vpop.f32.mrf.mxu0  ;;  %v4121_v21 = vld [vmem:[#allocation19_spill] sm:$0xff] }
 0x179   : > { %v1195_v28 = vadd.f32 %v1194_v7, %v3511_v17  ;;  %v4119_v17 = vld [vmem:[#allocation5_spill] sm:$0xff] }
 0x17a   : > { %v1514_v23 = vadd.f32 %v1513_v8, %v1281_v52 }
 0x17b   : > { %1653 = vmatmul.bf16.gmra.mxu1 %v3367_v61  ;;  %2112 = vmatmul.bf16.gmra.mxu0 %v3409_v31 }
 0x17c   : > { %1934 = vmatmul.bf16.gmra.mxu2 %v3290_v58  ;;  %2023 = vmatmul.bf16.gmra.mxu3 %v3406_v47  ;;  %v3819_v49 = vadd.f32 %v1602_v46, %v1514_v23  ;;  %v4120_v46 = vld [vmem:[#allocation7_spill] sm:$0xff] }
 0x17f   : > { %v1283_v42 = vpop.f32.mrf.mxu2  ;;  %v1516_v10 = vpop.f32.mrf.mxu3 }
 0x180   : > { %v1284_v20 = vadd.f32 %v1283_v42, %v1195_v28  ;;  %v1196_v26 = vpop.f32.mrf.mxu1  ;;  %v1607_v24 = vpop.f32.mrf.mxu0  ;;  %v4122_v42 = vld [vmem:[#allocation21_spill] sm:$0xff] }
 0x181   : > { %v1197_v61 = vadd.f32 %v1196_v26, %v3521_v4 }
 0x182   : > { %v1517_v54 = vadd.f32 %v1516_v10, %v1284_v20 }
 0x184   : > { %v3822_v22 = vadd.f32 %v1605_v53, %v1517_v54 }
 0x187   : > { %v1285_v25 = vpop.f32.mrf.mxu2  ;;  %v1518_v32 = vpop.f32.mrf.mxu3 }
 0x188   : > { %v1286_v2 = vadd.f32 %v1285_v25, %v1197_v61  ;;  %v1199_v58 = vpop.f32.mrf.mxu1  ;;  %v1610_v9 = vpop.f32.mrf.mxu0 }
 0x189   : > { %v1200_v55 = vadd.f32 %v1199_v58, %v4121_v21 }
 0x18a   : > { %v1519_v47 = vadd.f32 %v1518_v32, %v1286_v2  ;;  %v4124_v32 = vld [vmem:[#allocation2_spill] sm:$0xff]  ;;  %v4125_v2 = vld [vmem:[#allocation9_spill] sm:$0xff] }
 0x18b   : > { %1658 = vmatmul.bf16.gmra.mxu1 %v3394_v51  ;;  %2117 = vmatmul.bf16.gmra.mxu0 %v4118_v15 }
 0x18c   : > { %1939 = vmatmul.bf16.gmra.mxu2 %v4119_v17  ;;  %2028 = vmatmul.bf16.gmra.mxu3 %v4120_v46  ;;  %v3829_v59 = vadd.f32 %v1607_v24, %v1519_v47  ;;  %v4123_v24 = vld [vmem:[#allocation10_spill] sm:$0xff] }
 0x18f   : > { %v1288_v8 = vpop.f32.mrf.mxu2  ;;  %v1521_v4 = vpop.f32.mrf.mxu3 }
 0x190   : > { %v1289_v52 = vadd.f32 %v1288_v8, %v1200_v55  ;;  %v1201_v7 = vpop.f32.mrf.mxu1  ;;  %v1612_v53 = vpop.f32.mrf.mxu0 }
 0x191   : > { %v1202_v51 = vadd.f32 %v1201_v7, %v4122_v42  ;;  %v4127_v7 = vld [vmem:[#allocation27_spill] sm:$0xff] }
 0x192   : > { %v1522_v23 = vadd.f32 %v1521_v4, %v1289_v52 }
 0x194   : > { %v3832_v28 = vadd.f32 %v1610_v9, %v1522_v23  ;;  %v4126_v9 = vld [vmem:[#allocation25_spill] sm:$0xff] }
 0x197   : > { %v1290_v10 = vpop.f32.mrf.mxu2  ;;  %v1523_v20 = vpop.f32.mrf.mxu3 }
 0x198   : > { %v1291_v26 = vadd.f32 %v1290_v10, %v1202_v51  ;;  %v1204_v54 = vpop.f32.mrf.mxu1  ;;  %v1615_v61 = vpop.f32.mrf.mxu0 }
 0x199   : > { %v1205_v47 = vadd.f32 %v1204_v54, %v4126_v9  ;;  %v4129_v54 = vld [vmem:[#allocation3_spill] sm:$0xff] }
 0x19a   : > { %v1524_v25 = vadd.f32 %v1523_v20, %v1291_v26 }
 0x19b   : > { %1663 = vmatmul.bf16.gmra.mxu1 %v3409_v31  ;;  %2122 = vmatmul.bf16.gmra.mxu0 %v4123_v24 }
 0x19c   : > { %1944 = vmatmul.bf16.gmra.mxu2 %v4124_v32  ;;  %2033 = vmatmul.bf16.gmra.mxu3 %v4125_v2  ;;  %v3839_v58 = vadd.f32 %v1612_v53, %v1524_v25  ;;  %v4128_v53 = vld [vmem:[#allocation14_spill] sm:$0xff]  ;;  %v4130_v25 = vld [vmem:[#allocation13_spill] sm:$0xff] }
 0x19f   : > { %v1293_v17 = vpop.f32.mrf.mxu2  ;;  %v1526_v46 = vpop.f32.mrf.mxu3 }
 0x1a0   : > { %v1294_v21 = vadd.f32 %v1293_v17, %v1205_v47  ;;  %v1206_v55 = vpop.f32.mrf.mxu1  ;;  %v1617_v8 = vpop.f32.mrf.mxu0 }
 0x1a1   : > { %v1207_v31 = vadd.f32 %v1206_v55, %v4127_v7  ;;  %v4134_v7 = vld [vmem:[#allocation12_spill] sm:$0xff] }
 0x1a2   : > { %v1527_v4 = vadd.f32 %v1526_v46, %v1294_v21 }
 0x1a4   : > { %v3842_v52 = vadd.f32 %v1615_v61, %v1527_v4  ;;  %v4132_v61 = vld [vmem:[#allocation11_spill] sm:$0xff] }
 0x1a7   : > { %v1295_v23 = vpop.f32.mrf.mxu2  ;;  %v1528_v42 = vpop.f32.mrf.mxu3 }
 0x1a8   : > { %v1296_v51 = vadd.f32 %v1295_v23, %v1207_v31  ;;  %v1209_v10 = vpop.f32.mrf.mxu1  ;;  %v1620_v20 = vpop.f32.mrf.mxu0 }
 0x1a9   : > { %v1210_v2 = vadd.f32 %v1209_v10, %v4132_v61  ;;  %v4136_v10 = vld [vmem:[#allocation4_spill] sm:$0xff] }
 0x1aa   : > { %v1529_v26 = vadd.f32 %v1528_v42, %v1296_v51 }
 0x1ab   : > { %1668 = vmatmul.bf16.gmra.mxu1 %v4118_v15  ;;  %2127 = vmatmul.bf16.gmra.mxu0 %v4128_v53 }
 0x1ac   : > { %1949 = vmatmul.bf16.gmra.mxu2 %v4129_v54  ;;  %2038 = vmatmul.bf16.gmra.mxu3 %v4130_v25  ;;  %v3849_v32 = vadd.f32 %v1617_v8, %v1529_v26  ;;  %v4135_v8 = vld [vmem:[#allocation18_spill] sm:$0xff]  ;;  %v4137_v26 = vld [vmem:[#allocation17_spill] sm:$0xff] }
 0x1ae   : > { %4131 = vst [vmem:[#allocation8_spill] sm:$0xff] %v3849_v32 }
 0x1af   : > { %v1298_v9 = vpop.f32.mrf.mxu2  ;;  %v1531_v47 = vpop.f32.mrf.mxu3 }
 0x1b0   : > { %v1299_v17 = vadd.f32 %v1298_v9, %v1210_v2  ;;  %v1211_v46 = vpop.f32.mrf.mxu1  ;;  %v1622_v21 = vpop.f32.mrf.mxu0 }
 0x1b1   : > { %v1212_v15 = vadd.f32 %v1211_v46, %v4134_v7 }
 0x1b2   : > { %v1532_v55 = vadd.f32 %v1531_v47, %v1299_v17 }
 0x1b4   : > { %v3852_v4 = vadd.f32 %v1620_v20, %v1532_v55  ;;  %v4139_v20 = vld [vmem:[#allocation15_spill] sm:$0xff] }
 0x1b6   : > { %4133 = vst [vmem:[#allocation5_spill] sm:$0xff] %v3852_v4 }
 0x1b7   : > { %v1300_v31 = vpop.f32.mrf.mxu2  ;;  %v1533_v23 = vpop.f32.mrf.mxu3 }
 0x1b8   : > { %v1301_v42 = vadd.f32 %v1300_v31, %v1212_v15  ;;  %v1214_v51 = vpop.f32.mrf.mxu1  ;;  %v1625_v54 = vpop.f32.mrf.mxu0  ;;  %v4141_v31 = vld [vmem:[#allocation16_spill] sm:$0xff] }
 0x1b9   : > { %v1215_v2 = vadd.f32 %v1214_v51, %v4139_v20  ;;  %v4143_v51 = vld [vmem:[#allocation6_spill] sm:$0xff] }
 0x1ba   : > { %v1534_v25 = vadd.f32 %v1533_v23, %v1301_v42 }
 0x1bb   : > { %1673 = vmatmul.bf16.gmra.mxu1 %v4123_v24  ;;  %2132 = vmatmul.bf16.gmra.mxu0 %v4135_v8 }
 0x1bc   : > { %1954 = vmatmul.bf16.gmra.mxu2 %v4136_v10  ;;  %2043 = vmatmul.bf16.gmra.mxu3 %v4137_v26  ;;  %v3859_v61 = vadd.f32 %v1622_v21, %v1534_v25  ;;  %v4142_v21 = vld [vmem:[#allocation24_spill] sm:$0xff]  ;;  %v4144_v25 = vld [vmem:[#allocation23_spill] sm:$0xff] }
 0x1be   : > { %4138 = vst [vmem:[#allocation7_spill] sm:$0xff] %v3859_v61 }
 0x1bf   : > { %v1303_v9 = vpop.f32.mrf.mxu2  ;;  %v1536_v47 = vpop.f32.mrf.mxu3 }
 0x1c0   : > { %v1304_v17 = vadd.f32 %v1303_v9, %v1215_v2  ;;  %v1216_v46 = vpop.f32.mrf.mxu1  ;;  %v1627_v55 = vpop.f32.mrf.mxu0 }
 0x1c1   : > { %v1217_v24 = vadd.f32 %v1216_v46, %v4141_v31 }
 0x1c2   : > { %v1537_v7 = vadd.f32 %v1536_v47, %v1304_v17 }
 0x1c4   : > { %v3862_v15 = vadd.f32 %v1625_v54, %v1537_v7  ;;  %v4145_v54 = vld [vmem:[#allocation20_spill] sm:$0xff] }
 0x1c6   : > { %4140 = vst [vmem:[#allocation19_spill] sm:$0xff] %v3862_v15 }
 0x1c7   : > { %v1305_v23 = vpop.f32.mrf.mxu2  ;;  %v1538_v42 = vpop.f32.mrf.mxu3 }
 0x1c8   : > { %v1306_v4 = vadd.f32 %v1305_v23, %v1217_v24  ;;  %v1219_v10 = vpop.f32.mrf.mxu1  ;;  %v1630_v32 = vpop.f32.mrf.mxu0 }
 0x1c9   : > { %v1220_v2 = vadd.f32 %v1219_v10, %v4145_v54 }
 0x1ca   : > { %v1539_v26 = vadd.f32 %v1538_v42, %v1306_v4  ;;  %v4146_v4 = vld [vmem:[#allocation22_spill] sm:$0xff] }
 0x1cb   : > { %1678 = vmatmul.bf16.gmra.mxu1 %v4128_v53  ;;  %2137 = vmatmul.bf16.gmra.mxu0 %v4142_v21 }
 0x1cc   : > { %1959 = vmatmul.bf16.gmra.mxu2 %v4143_v51  ;;  %2048 = vmatmul.bf16.gmra.mxu3 %v4144_v25  ;;  %v3869_v20 = vadd.f32 %v1627_v55, %v1539_v26  ;;  %v4147_v55 = vld [vmem:[#allocation29_spill] sm:$0xff] }
 0x1cf   : > { %v1308_v9 = vpop.f32.mrf.mxu2  ;;  %v1541_v47 = vpop.f32.mrf.mxu3 }
 0x1d0   : > { %v1309_v17 = vadd.f32 %v1308_v9, %v1220_v2  ;;  %v1221_v46 = vpop.f32.mrf.mxu1  ;;  %v1632_v7 = vpop.f32.mrf.mxu0 }
 0x1d1   : > { %v1222_v53 = vadd.f32 %v1221_v46, %v4146_v4 }
 0x1d2   : > { %v1542_v31 = vadd.f32 %v1541_v47, %v1309_v17 }
 0x1d4   : > { %v3872_v24 = vadd.f32 %v1630_v32, %v1542_v31  ;;  %v4148_v32 = vld [vmem:[#allocation26_spill] sm:$0xff] }
 0x1d7   : > { %v1310_v23 = vpop.f32.mrf.mxu2  ;;  %v1543_v42 = vpop.f32.mrf.mxu3 }
 0x1d8   : > { %v1311_v15 = vadd.f32 %v1310_v23, %v1222_v53  ;;  %v1224_v51 = vpop.f32.mrf.mxu1  ;;  %v1635_v61 = vpop.f32.mrf.mxu0 }
 0x1d9   : > { %v1225_v26 = vadd.f32 %v1224_v51, %v4148_v32 }
 0x1da   : > { %v1544_v25 = vadd.f32 %v1543_v42, %v1311_v15  ;;  %v4149_v15 = vld [vmem:[#allocation28_spill] sm:$0xff] }
 0x1db   : > { %1683 = vmatmul.bf16.gmra.mxu1 %v4135_v8  ;;  %2142 = vmatmul.bf16.gmra.mxu0 %v4147_v55 }
 0x1dc   : > { %1964 = vmatmul.bf16.gmra.mxu2 %v3141_v36  ;;  %2053 = vmatmul.bf16.gmra.mxu3 %v3602_v0  ;;  %v3879_v10 = vadd.f32 %v1632_v7, %v1544_v25  ;;  %v4150_v7 = vld [vmem:[#allocation31_spill] sm:$0xff] }
 0x1df   : > { %v1313_v54 = vpop.f32.mrf.mxu2  ;;  %v1546_v2 = vpop.f32.mrf.mxu3 }
 0x1e0   : > { %v1314_v9 = vadd.f32 %v1313_v54, %v1225_v26  ;;  %v1226_v47 = vpop.f32.mrf.mxu1  ;;  %v1637_v17 = vpop.f32.mrf.mxu0 }
 0x1e1   : > { %v1227_v8 = vadd.f32 %v1226_v47, %v4149_v15 }
 0x1e2   : > { %v1547_v46 = vadd.f32 %v1546_v2, %v1314_v9  ;;  %v4151_v9 = vld [vmem:[#allocation30_spill] sm:$0xff] }
 0x1e4   : > { %v3882_v31 = vadd.f32 %v1635_v61, %v1547_v46 }
 0x1e7   : > { %v1315_v4 = vpop.f32.mrf.mxu2  ;;  %v1548_v53 = vpop.f32.mrf.mxu3 }
 0x1e8   : > { %v1316_v23 = vadd.f32 %v1315_v4, %v1227_v8  ;;  %v1649_v36 = vpop.f32.mrf.mxu1  ;;  %v2108_v42 = vpop.f32.mrf.mxu0 }
 0x1e9   : > { %v1650_v47 = vadd.f32 %v1649_v36, %v4151_v9 }
 0x1ea   : > { %v1549_v0 = vadd.f32 %v1548_v53, %v1316_v23  ;;  %v3901_v53 = vld [vmem:[%s4054_s3] ss:$0 sm:$0xff]  ;;  %v4152_v23 = vld [vmem:[#allocation32_spill] sm:$0xff] }
 0x1eb   : > { %1688 = vmatmul.bf16.gmra.mxu1 %v4142_v21  ;;  %2147 = vmatmul.bf16.gmra.mxu0 %v4150_v7  ;;  %v3895_v21 = vld [vmem:[%s4053_s2] ss:$0 sm:$0xff] }
 0x1ec   : > { %1969 = vmatmul.bf16.gmra.mxu2 %v3223_v12  ;;  %2058 = vmatmul.bf16.gmra.mxu3 %v3634_v33  ;;  %v3889_v51 = vadd.f32 %v1637_v17, %v1549_v0 }
 0x1ef   : > { %v1930_v61 = vpop.f32.mrf.mxu2  ;;  %v2019_v25 = vpop.f32.mrf.mxu3 }
 0x1f0   : > { %v2020_v32 = vadd.f32 %v2019_v25, %v1930_v61  ;;  %v1651_v26 = vpop.f32.mrf.mxu1  ;;  %v2110_v54 = vpop.f32.mrf.mxu0 }
 0x1f1   : > { %v1652_v36 = vadd.f32 %v1651_v26, %v4152_v23 }
 0x1f2   : > { %v2109_v2 = vadd.f32 %v2108_v42, %v2020_v32 }
 0x1f4   : > { %v2188_v46 = vadd.f32 %v2109_v2, %v1650_v47 }
 0x1f6   : > { %v2223_v4 = vmul.f32 %v3895_v21, %v2188_v46 }
 0x1f7   : > { %v1932_v15 = vpop.f32.mrf.mxu2  ;;  %v2021_v12 = vpop.f32.mrf.mxu3 }
 0x1f8   : > { %v2022_v8 = vadd.f32 %v2021_v12, %v1932_v15  ;;  %v1654_v33 = vpop.f32.mrf.mxu1  ;;  %v2113_v17 = vpop.f32.mrf.mxu0  ;;  %v2258_v61 = vadd.f32 %v3901_v53, %v2223_v4 }
 0x1fa   : > { %v2111_v42 = vadd.f32 %v2110_v54, %v2022_v8 }
 0x1fb   : > { %1693 = vmatmul.bf16.gmra.mxu1 %v4147_v55  ;;  %2152 = vmatmul.bf16.gmra.mxu0 %v3660_v34  ;;  %v2290_v55 = vmax.f32 %v2258_v61, 0.0 }
 0x1fc   : > { %v2189_v0 = vadd.f32 %v2111_v42, %v1652_v36  ;;  %1974 = vmatmul.bf16.gmra.mxu2 %v3300_v62  ;;  %2063 = vmatmul.bf16.gmra.mxu3 %v3656_v29  ;;  %v1655_v29 = vadd.f32 %v1654_v33, %v3652_v18 }
 0x1fe   : > { %v2224_v25 = vmul.f32 %v3895_v21, %v2189_v0 }
 0x1ff   : > { %v1935_v32 = vpop.f32.mrf.mxu2  ;;  %v2024_v2 = vpop.f32.mrf.mxu3 }
 0x200   : > { %v2259_v9 = vadd.f32 %v3901_v53, %v2224_v25  ;;  %v2025_v26 = vadd.f32 %v2024_v2, %v1935_v32  ;;  %v1656_v54 = vpop.f32.mrf.mxu1  ;;  %v2115_v47 = vpop.f32.mrf.mxu0 }
 0x202   : > { %v2291_v46 = vmax.f32 %v2259_v9, 0.0  ;;  %v2114_v15 = vadd.f32 %v2113_v17, %v2025_v26  ;;  %v1657_v17 = vadd.f32 %v1656_v54, %v3673_v19 }
 0x204   : > { %v2897_v62 = vpack.c.bf16 %v2291_v46, %v2290_v55  ;;  %v2190_v12 = vadd.f32 %v2114_v15, %v1655_v29  ;;  %v4153_v15 = vld [vmem:[#allocation33_spill] sm:$0xff] }
 0x206   : > { %2898 = vst [vmem:[%s3916_s10] sm:$0xff] %v2897_v62   ;;  %v2225_v0 = vmul.f32 %v3895_v21, %v2190_v12 }
 0x207   : > { %v1937_v8 = vpop.f32.mrf.mxu2  ;;  %v2026_v4 = vpop.f32.mrf.mxu3 }
 0x208   : > { %v2027_v23 = vadd.f32 %v2026_v4, %v1937_v8  ;;  %v1659_v36 = vpop.f32.mrf.mxu1  ;;  %v2118_v42 = vpop.f32.mrf.mxu0  ;;  %v2260_v18 = vadd.f32 %v3901_v53, %v2225_v0  ;;  %v4154_v0 = vld [vmem:[#allocation34_spill] sm:$0xff] }
 0x209   : > { %v1660_v62 = vadd.f32 %v1659_v36, %v4153_v15 }
 0x20a   : > { %v2116_v61 = vadd.f32 %v2115_v47, %v2027_v23 }
 0x20b   : > { %1698 = vmatmul.bf16.gmra.mxu1 %v4150_v7  ;;  %2157 = vmatmul.bf16.gmra.mxu0 %v3694_v27  ;;  %v2292_v7 = vmax.f32 %v2260_v18, 0.0 }
 0x20c   : > { %v2191_v25 = vadd.f32 %v2116_v61, %v1657_v17  ;;  %1979 = vmatmul.bf16.gmra.mxu2 %v3346_v39  ;;  %2068 = vmatmul.bf16.gmra.mxu3 %v3690_v45 }
 0x20e   : > { %v2226_v33 = vmul.f32 %v3895_v21, %v2191_v25 }
 0x20f   : > { %v1940_v32 = vpop.f32.mrf.mxu2  ;;  %v2029_v2 = vpop.f32.mrf.mxu3 }
 0x210   : > { %v2261_v9 = vadd.f32 %v3901_v53, %v2226_v33  ;;  %v2030_v19 = vadd.f32 %v2029_v2, %v1940_v32  ;;  %v1661_v26 = vpop.f32.mrf.mxu1  ;;  %v2120_v54 = vpop.f32.mrf.mxu0 }
 0x211   : > { %v1662_v17 = vadd.f32 %v1661_v26, %v4154_v0 }
 0x212   : > { %v2293_v47 = vmax.f32 %v2261_v9, 0.0  ;;  %v2119_v55 = vadd.f32 %v2118_v42, %v2030_v19 }
 0x214   : > { %v2902_v46 = vpack.c.bf16 %v2293_v47, %v2292_v7  ;;  %v2192_v39 = vadd.f32 %v2119_v55, %v1660_v62 }
 0x216   : > { %2974 = vst [vmem:[%s3916_s10 + $0x8] sm:$0xff] %v2902_v46   ;;  %v2227_v23 = vmul.f32 %v3895_v21, %v2192_v39 }
 0x217   : > { %v1942_v45 = vpop.f32.mrf.mxu2  ;;  %v2031_v29 = vpop.f32.mrf.mxu3 }
 0x218   : > { %v2032_v12 = vadd.f32 %v2031_v29, %v1942_v45  ;;  %v1664_v8 = vpop.f32.mrf.mxu1  ;;  %v2123_v4 = vpop.f32.mrf.mxu0  ;;  %v2262_v36 = vadd.f32 %v3901_v53, %v2227_v23 }
 0x219   : > { %v1665_v47 = vadd.f32 %v1664_v8, %v3708_v30 }
 0x21a   : > { %v2121_v61 = vadd.f32 %v2120_v54, %v2032_v12 }
 0x21b   : > { %1703 = vmatmul.bf16.gmra.mxu1 %v3660_v34  ;;  %2162 = vmatmul.bf16.gmra.mxu0 %v3715_v5  ;;  %v2294_v34 = vmax.f32 %v2262_v36, 0.0 }
 0x21c   : > { %v2193_v42 = vadd.f32 %v2121_v61, %v1662_v17  ;;  %1984 = vmatmul.bf16.gmra.mxu2 %v3145_v37  ;;  %2073 = vmatmul.bf16.gmra.mxu3 %v3712_v6 }
 0x21e   : > { %v2228_v25 = vmul.f32 %v3895_v21, %v2193_v42 }
 0x21f   : > { %v1945_v18 = vpop.f32.mrf.mxu2  ;;  %v2034_v33 = vpop.f32.mrf.mxu3 }
 0x220   : > { %v2263_v32 = vadd.f32 %v3901_v53, %v2228_v25  ;;  %v2035_v2 = vadd.f32 %v2034_v33, %v1945_v18  ;;  %v1666_v9 = vpop.f32.mrf.mxu1  ;;  %v2125_v19 = vpop.f32.mrf.mxu0  ;;  %v4155_v18 = vld [vmem:[#allocation35_spill] sm:$0xff] }
 0x221   : > { %v1667_v45 = vadd.f32 %v1666_v9, %v3728_v11 }
 0x222   : > { %v2295_v26 = vmax.f32 %v2263_v32, 0.0  ;;  %v2124_v54 = vadd.f32 %v2123_v4, %v2035_v2 }
 0x224   : > { %v2907_v7 = vpack.c.bf16 %v2295_v26, %v2294_v34  ;;  %v2194_v37 = vadd.f32 %v2124_v54, %v1665_v47  ;;  %v4156_v26 = vld [vmem:[#allocation36_spill] sm:$0xff] }
 0x226   : > { %2975 = vst [vmem:[%s3916_s10 + $0x10] sm:$0xff] %v2907_v7   ;;  %v2229_v39 = vmul.f32 %v3895_v21, %v2194_v37 }
 0x227   : > { %v1947_v6 = vpop.f32.mrf.mxu2  ;;  %v2036_v55 = vpop.f32.mrf.mxu3 }
 0x228   : > { %v2037_v46 = vadd.f32 %v2036_v55, %v1947_v6  ;;  %v1669_v15 = vpop.f32.mrf.mxu1  ;;  %v2128_v62 = vpop.f32.mrf.mxu0  ;;  %v2264_v30 = vadd.f32 %v3901_v53, %v2229_v39 }
 0x229   : > { %v1670_v33 = vadd.f32 %v1669_v15, %v4155_v18 }
 0x22a   : > { %v2126_v29 = vadd.f32 %v2125_v19, %v2037_v46 }
 0x22b   : > { %1708 = vmatmul.bf16.gmra.mxu1 %v3694_v27  ;;  %2167 = vmatmul.bf16.gmra.mxu0 %v3749_v14  ;;  %v2296_v27 = vmax.f32 %v2264_v30, 0.0 }
 0x22c   : > { %v2195_v12 = vadd.f32 %v2126_v29, %v1667_v45  ;;  %1989 = vmatmul.bf16.gmra.mxu2 %v3227_v13  ;;  %2078 = vmatmul.bf16.gmra.mxu3 %v3746_v40 }
 0x22e   : > { %v2230_v8 = vmul.f32 %v3895_v21, %v2195_v12 }
 0x22f   : > { %v1950_v4 = vpop.f32.mrf.mxu2  ;;  %v2039_v23 = vpop.f32.mrf.mxu3 }
 0x230   : > { %v2265_v0 = vadd.f32 %v3901_v53, %v2230_v8  ;;  %v2040_v11 = vadd.f32 %v2039_v23, %v1950_v4  ;;  %v1671_v17 = vpop.f32.mrf.mxu1  ;;  %v2130_v61 = vpop.f32.mrf.mxu0 }
 0x231   : > { %v1672_v54 = vadd.f32 %v1671_v17, %v4156_v26 }
 0x232   : > { %v2297_v42 = vmax.f32 %v2265_v0, 0.0  ;;  %v2129_v36 = vadd.f32 %v2128_v62, %v2040_v11 }
 0x234   : > { %v2912_v25 = vpack.c.bf16 %v2297_v42, %v2296_v27  ;;  %v2196_v13 = vadd.f32 %v2129_v36, %v1670_v33 }
 0x236   : > { %2976 = vst [vmem:[%s3916_s10 + $0x18] sm:$0xff] %v2912_v25   ;;  %v2231_v34 = vmul.f32 %v3895_v21, %v2196_v13 }
 0x237   : > { %v1952_v40 = vpop.f32.mrf.mxu2  ;;  %v2041_v32 = vpop.f32.mrf.mxu3 }
 0x238   : > { %v2042_v2 = vadd.f32 %v2041_v32, %v1952_v40  ;;  %v1674_v9 = vpop.f32.mrf.mxu1  ;;  %v2133_v19 = vpop.f32.mrf.mxu0  ;;  %v2266_v37 = vadd.f32 %v3901_v53, %v2231_v34 }
 0x239   : > { %v1675_v8 = vadd.f32 %v1674_v9, %v3763_v16 }
 0x23a   : > { %v2131_v7 = vadd.f32 %v2130_v61, %v2042_v2 }
 0x23b   : > { %1713 = vmatmul.bf16.gmra.mxu1 %v3715_v5  ;;  %2172 = vmatmul.bf16.gmra.mxu0 %v3771_v60  ;;  %v2298_v5 = vmax.f32 %v2266_v37, 0.0 }
 0x23c   : > { %v2197_v47 = vadd.f32 %v2131_v7, %v1672_v54  ;;  %1994 = vmatmul.bf16.gmra.mxu2 %v3304_v63  ;;  %2083 = vmatmul.bf16.gmra.mxu3 %v3768_v50 }
 0x23e   : > { %v2232_v6 = vmul.f32 %v3895_v21, %v2197_v47 }
 0x23f   : > { %v1955_v55 = vpop.f32.mrf.mxu2  ;;  %v2044_v46 = vpop.f32.mrf.mxu3 }
 0x240   : > { %v2267_v15 = vadd.f32 %v3901_v53, %v2232_v6  ;;  %v2045_v62 = vadd.f32 %v2044_v46, %v1955_v55  ;;  %v1676_v39 = vpop.f32.mrf.mxu1  ;;  %v2135_v45 = vpop.f32.mrf.mxu0  ;;  %v4157_v55 = vmov 0  }
 0x241   : > { %v1677_v61 = vadd.f32 %v1676_v39, %v3778_v35 }
 0x242   : > { %v2299_v29 = vmax.f32 %v2267_v15, 0.0  ;;  %v2134_v12 = vadd.f32 %v2133_v19, %v2045_v62 }
 0x244   : > { %v2917_v30 = vpack.c.bf16 %v2299_v29, %v2298_v5  ;;  %v2198_v63 = vadd.f32 %v2134_v12, %v1675_v8 }
 0x246   : > { %2977 = vst [vmem:[%s3916_s10 + $0x20] sm:$0xff] %v2917_v30   ;;  %v2233_v17 = vmul.f32 %v3895_v21, %v2198_v63 }
 0x247   : > { %v1957_v50 = vpop.f32.mrf.mxu2  ;;  %v2046_v4 = vpop.f32.mrf.mxu3 }
 0x248   : > { %v2047_v23 = vadd.f32 %v2046_v4, %v1957_v50  ;;  %v1679_v0 = vpop.f32.mrf.mxu1  ;;  %v2138_v11 = vpop.f32.mrf.mxu0  ;;  %v2268_v16 = vadd.f32 %v3901_v53, %v2233_v17 }
 0x249   : > { %v1680_v9 = vadd.f32 %v1679_v0, %v3785_v43 }
 0x24a   : > { %v2136_v27 = vadd.f32 %v2135_v45, %v2047_v23 }
 0x24b   : > { %1718 = vmatmul.bf16.gmra.mxu1 %v3749_v14  ;;  %2177 = vmatmul.bf16.gmra.mxu0 %v3793_v48  ;;  %v2300_v14 = vmax.f32 %v2268_v16, 0.0 }
 0x24c   : > { %v2199_v42 = vadd.f32 %v2136_v27, %v1677_v61  ;;  %1999 = vmatmul.bf16.gmra.mxu2 %v3350_v41  ;;  %2088 = vmatmul.bf16.gmra.mxu3 %v3790_v57 }
 0x24e   : > { %v2234_v36 = vmul.f32 %v3895_v21, %v2199_v42 }
 0x24f   : > { %v1960_v25 = vpop.f32.mrf.mxu2  ;;  %v2049_v18 = vpop.f32.mrf.mxu3 }
 0x250   : > { %v2269_v33 = vadd.f32 %v3901_v53, %v2234_v36  ;;  %v2050_v35 = vadd.f32 %v2049_v18, %v1960_v25  ;;  %v1681_v13 = vpop.f32.mrf.mxu1  ;;  %v2140_v40 = vpop.f32.mrf.mxu0 }
 0x251   : > { %v1682_v47 = vadd.f32 %v1681_v13, %v3799_v3 }
 0x252   : > { %v2301_v32 = vmax.f32 %v2269_v33, 0.0  ;;  %v2139_v48 = vadd.f32 %v2138_v11, %v2050_v35 }
 0x254   : > { %v2922_v2 = vpack.c.bf16 %v2301_v32, %v2300_v14  ;;  %v2200_v41 = vadd.f32 %v2139_v48, %v1680_v9 }
 0x256   : > { %2978 = vst [vmem:[%s3916_s10 + $0x28] sm:$0xff] %v2922_v2   ;;  %v2235_v7 = vmul.f32 %v3895_v21, %v2200_v41 }
 0x257   : > { %v1962_v57 = vpop.f32.mrf.mxu2  ;;  %v2051_v19 = vpop.f32.mrf.mxu3 }
 0x258   : > { %v2052_v34 = vadd.f32 %v2051_v19, %v1962_v57  ;;  %v1684_v26 = vpop.f32.mrf.mxu1  ;;  %v2143_v54 = vpop.f32.mrf.mxu0  ;;  %v2270_v43 = vadd.f32 %v3901_v53, %v2235_v7 }
 0x259   : > { %v1685_v8 = vadd.f32 %v1684_v26, %v3802_v38 }
 0x25a   : > { %v2141_v37 = vadd.f32 %v2140_v40, %v2052_v34 }
 0x25b   : > { %1723 = vmatmul.bf16.gmra.mxu1 %v3771_v60  ;;  %2182 = vmatmul.bf16.gmra.mxu0 %v3363_v56  ;;  %v2302_v60 = vmax.f32 %v2270_v43, 0.0 }
 0x25c   : > { %v2201_v6 = vadd.f32 %v2141_v37, %v1682_v47  ;;  %2004 = vmatmul.bf16.gmra.mxu2 %v4157_v55  ;;  %2093 = vmatmul.bf16.gmra.mxu3 %v3363_v56 }
 0x25e   : > { %v2236_v46 = vmul.f32 %v3895_v21, %v2201_v6 }
 0x25f   : > { %v1965_v15 = vpop.f32.mrf.mxu2  ;;  %v2054_v62 = vpop.f32.mrf.mxu3 }
 0x260   : > { %v2271_v39 = vadd.f32 %v3901_v53, %v2236_v46  ;;  %v2055_v3 = vadd.f32 %v2054_v62, %v1965_v15  ;;  %v1686_v45 = vpop.f32.mrf.mxu1  ;;  %v2145_v5 = vpop.f32.mrf.mxu0 }
 0x261   : > { %v1687_v17 = vadd.f32 %v1686_v45, %v3809_v44 }
 0x262   : > { %v2303_v29 = vmax.f32 %v2271_v39, 0.0  ;;  %v2144_v12 = vadd.f32 %v2143_v54, %v2055_v3 }
 0x264   : > { %v2927_v30 = vpack.c.bf16 %v2303_v29, %v2302_v60  ;;  %v2202_v63 = vadd.f32 %v2144_v12, %v1685_v8 }
 0x266   : > { %2979 = vst [vmem:[%s3916_s10 + $0x30] sm:$0xff] %v2927_v30   ;;  %v2237_v11 = vmul.f32 %v3895_v21, %v2202_v63 }
 0x267   : > { %v1967_v56 = vpop.f32.mrf.mxu2  ;;  %v2056_v50 = vpop.f32.mrf.mxu3 }
 0x268   : > { %v2057_v4 = vadd.f32 %v2056_v50, %v1967_v56  ;;  %v1689_v23 = vpop.f32.mrf.mxu1  ;;  %v2148_v0 = vpop.f32.mrf.mxu0  ;;  %v2272_v42 = vadd.f32 %v3901_v53, %v2237_v11 }
 0x269   : > { %v1690_v44 = vadd.f32 %v1689_v23, %v3812_v1 }
 0x26a   : > { %v2146_v61 = vadd.f32 %v2145_v5, %v2057_v4  ;;  %v2304_v13 = vmax.f32 %v2272_v42, 0.0 }
 0x26c   : > { %v2203_v27 = vadd.f32 %v2146_v61, %v1687_v17 }
 0x26e   : > { %v2238_v16 = vmul.f32 %v3895_v21, %v2203_v27 }
 0x26f   : > { %v1970_v36 = vpop.f32.mrf.mxu2  ;;  %v2059_v38 = vpop.f32.mrf.mxu3 }
 0x270   : > { %v2273_v25 = vadd.f32 %v3901_v53, %v2238_v16  ;;  %v2060_v18 = vadd.f32 %v2059_v38, %v1970_v36  ;;  %v1691_v33 = vpop.f32.mrf.mxu1  ;;  %v2150_v35 = vpop.f32.mrf.mxu0 }
 0x271   : > { %v1692_v26 = vadd.f32 %v1691_v33, %v3819_v49 }
 0x272   : > { %v2305_v40 = vmax.f32 %v2273_v25, 0.0  ;;  %v2149_v14 = vadd.f32 %v2148_v0, %v2060_v18 }
 0x274   : > { %v2932_v32 = vpack.c.bf16 %v2305_v40, %v2304_v13  ;;  %v2204_v48 = vadd.f32 %v2149_v14, %v1690_v44 }
 0x276   : > { %2980 = vst [vmem:[%s3916_s10 + $0x38] sm:$0xff] %v2932_v32   ;;  %v2239_v34 = vmul.f32 %v3895_v21, %v2204_v48 }
 0x277   : > { %v1972_v2 = vpop.f32.mrf.mxu2  ;;  %v2061_v9 = vpop.f32.mrf.mxu3 }
 0x278   : > { %v2062_v41 = vadd.f32 %v2061_v9, %v1972_v2  ;;  %v1694_v57 = vpop.f32.mrf.mxu1  ;;  %v2153_v19 = vpop.f32.mrf.mxu0  ;;  %v2274_v47 = vadd.f32 %v3901_v53, %v2239_v34 }
 0x279   : > { %v1695_v49 = vadd.f32 %v1694_v57, %v3822_v22 }
 0x27a   : > { %v2151_v54 = vadd.f32 %v2150_v35, %v2062_v41  ;;  %v2306_v62 = vmax.f32 %v2274_v47, 0.0 }
 0x27c   : > { %v2205_v7 = vadd.f32 %v2151_v54, %v1692_v26 }
 0x27e   : > { %v2240_v37 = vmul.f32 %v3895_v21, %v2205_v7 }
 0x27f   : > { %v1975_v6 = vpop.f32.mrf.mxu2  ;;  %v2064_v1 = vpop.f32.mrf.mxu3 }
 0x280   : > { %v2275_v55 = vadd.f32 %v3901_v53, %v2240_v37  ;;  %v2065_v43 = vadd.f32 %v2064_v1, %v1975_v6  ;;  %v1696_v46 = vpop.f32.mrf.mxu1  ;;  %v2155_v15 = vpop.f32.mrf.mxu0 }
 0x281   : > { %v1697_v56 = vadd.f32 %v1696_v46, %v3829_v59 }
 0x282   : > { %v2307_v39 = vmax.f32 %v2275_v55, 0.0  ;;  %v2154_v3 = vadd.f32 %v2153_v19, %v2065_v43 }
 0x284   : > { %v2937_v45 = vpack.c.bf16 %v2307_v39, %v2306_v62  ;;  %v2206_v5 = vadd.f32 %v2154_v3, %v1695_v49  ;;  %v4158_v3 = vld [vmem:[#allocation8_spill] sm:$0xff] }
 0x286   : > { %2981 = vst [vmem:[%s3916_s10 + $0x40] sm:$0xff] %v2937_v45   ;;  %v2241_v63 = vmul.f32 %v3895_v21, %v2206_v5 }
 0x287   : > { %v1977_v60 = vpop.f32.mrf.mxu2  ;;  %v2066_v29 = vpop.f32.mrf.mxu3 }
 0x288   : > { %v2067_v12 = vadd.f32 %v2066_v29, %v1977_v60  ;;  %v1699_v30 = vpop.f32.mrf.mxu1  ;;  %v2158_v8 = vpop.f32.mrf.mxu0  ;;  %v2276_v23 = vadd.f32 %v3901_v53, %v2241_v63 }
 0x289   : > { %v1700_v59 = vadd.f32 %v1699_v30, %v3832_v28 }
 0x28a   : > { %v2156_v50 = vadd.f32 %v2155_v15, %v2067_v12  ;;  %v2308_v16 = vmax.f32 %v2276_v23, 0.0 }
 0x28c   : > { %v2207_v4 = vadd.f32 %v2156_v50, %v1697_v56 }
 0x28e   : > { %v2242_v0 = vmul.f32 %v3895_v21, %v2207_v4 }
 0x28f   : > { %v1980_v11 = vpop.f32.mrf.mxu2  ;;  %v2069_v22 = vpop.f32.mrf.mxu3 }
 0x290   : > { %v2277_v17 = vadd.f32 %v3901_v53, %v2242_v0  ;;  %v2070_v61 = vadd.f32 %v2069_v22, %v1980_v11  ;;  %v1701_v27 = vpop.f32.mrf.mxu1  ;;  %v2160_v42 = vpop.f32.mrf.mxu0  ;;  %v4159_v11 = vld [vmem:[#allocation5_spill] sm:$0xff] }
 0x291   : > { %v1702_v44 = vadd.f32 %v1701_v27, %v3839_v58 }
 0x292   : > { %v2309_v36 = vmax.f32 %v2277_v17, 0.0  ;;  %v2159_v38 = vadd.f32 %v2158_v8, %v2070_v61 }
 0x294   : > { %v2942_v25 = vpack.c.bf16 %v2309_v36, %v2308_v16  ;;  %v2208_v18 = vadd.f32 %v2159_v38, %v1700_v59 }
 0x296   : > { %2982 = vst [vmem:[%s3916_s10 + $0x48] sm:$0xff] %v2942_v25   ;;  %v2243_v32 = vmul.f32 %v3895_v21, %v2208_v18  ;;  %v4160_v25 = vld [vmem:[#allocation7_spill] sm:$0xff] }
 0x297   : > { %v1982_v33 = vpop.f32.mrf.mxu2  ;;  %v2071_v35 = vpop.f32.mrf.mxu3 }
 0x298   : > { %v2072_v13 = vadd.f32 %v2071_v35, %v1982_v33  ;;  %v1704_v40 = vpop.f32.mrf.mxu1  ;;  %v2163_v14 = vpop.f32.mrf.mxu0  ;;  %v2278_v9 = vadd.f32 %v3901_v53, %v2243_v32 }
 0x299   : > { %v1705_v58 = vadd.f32 %v1704_v40, %v3842_v52 }
 0x29a   : > { %v2161_v48 = vadd.f32 %v2160_v42, %v2072_v13  ;;  %v2310_v7 = vmax.f32 %v2278_v9, 0.0 }
 0x29c   : > { %v2209_v2 = vadd.f32 %v2161_v48, %v1702_v44 }
 0x29e   : > { %v2244_v41 = vmul.f32 %v3895_v21, %v2209_v2 }
 0x29f   : > { %v1985_v57 = vpop.f32.mrf.mxu2  ;;  %v2074_v28 = vpop.f32.mrf.mxu3 }
 0x2a0   : > { %v2279_v19 = vadd.f32 %v3901_v53, %v2244_v41  ;;  %v2075_v34 = vadd.f32 %v2074_v28, %v1985_v57  ;;  %v1706_v26 = vpop.f32.mrf.mxu1  ;;  %v2165_v54 = vpop.f32.mrf.mxu0 }
 0x2a1   : > { %v1707_v45 = vadd.f32 %v1706_v26, %v4158_v3 }
 0x2a2   : > { %v2311_v47 = vmax.f32 %v2279_v19, 0.0  ;;  %v2164_v37 = vadd.f32 %v2163_v14, %v2075_v34  ;;  %v4161_v19 = vld [vmem:[#allocation19_spill] sm:$0xff] }
 0x2a4   : > { %v2947_v6 = vpack.c.bf16 %v2311_v47, %v2310_v7  ;;  %v2210_v1 = vadd.f32 %v2164_v37, %v1705_v58 }
 0x2a6   : > { %2983 = vst [vmem:[%s3916_s10 + $0x50] sm:$0xff] %v2947_v6   ;;  %v2245_v39 = vmul.f32 %v3895_v21, %v2210_v1 }
 0x2a7   : > { %v1987_v55 = vpop.f32.mrf.mxu2  ;;  %v2076_v43 = vpop.f32.mrf.mxu3 }
 0x2a8   : > { %v2077_v46 = vadd.f32 %v2076_v43, %v1987_v55  ;;  %v1709_v15 = vpop.f32.mrf.mxu1  ;;  %v2168_v62 = vpop.f32.mrf.mxu0  ;;  %v2280_v60 = vadd.f32 %v3901_v53, %v2245_v39 }
 0x2a9   : > { %v1710_v22 = vadd.f32 %v1709_v15, %v4159_v11 }
 0x2aa   : > { %v2166_v49 = vadd.f32 %v2165_v54, %v2077_v46  ;;  %v2312_v50 = vmax.f32 %v2280_v60, 0.0 }
 0x2ac   : > { %v2211_v5 = vadd.f32 %v2166_v49, %v1707_v45 }
 0x2ae   : > { %v2246_v29 = vmul.f32 %v3895_v21, %v2211_v5 }
 0x2af   : > { %v1990_v12 = vpop.f32.mrf.mxu2  ;;  %v2079_v52 = vpop.f32.mrf.mxu3 }
 0x2b0   : > { %v2281_v30 = vadd.f32 %v3901_v53, %v2246_v29  ;;  %v2080_v8 = vadd.f32 %v2079_v52, %v1990_v12  ;;  %v1711_v63 = vpop.f32.mrf.mxu1  ;;  %v2170_v56 = vpop.f32.mrf.mxu0 }
 0x2b1   : > { %v1712_v59 = vadd.f32 %v1711_v63, %v4160_v25 }
 0x2b2   : > { %v2313_v4 = vmax.f32 %v2281_v30, 0.0  ;;  %v2169_v23 = vadd.f32 %v2168_v62, %v2080_v8 }
 0x2b4   : > { %v2952_v0 = vpack.c.bf16 %v2313_v4, %v2312_v50  ;;  %v2212_v17 = vadd.f32 %v2169_v23, %v1710_v22 }
 0x2b6   : > { %2984 = vst [vmem:[%s3916_s10 + $0x58] sm:$0xff] %v2952_v0   ;;  %v2247_v38 = vmul.f32 %v3895_v21, %v2212_v17 }
 0x2b7   : > { %v1992_v61 = vpop.f32.mrf.mxu2  ;;  %v2081_v27 = vpop.f32.mrf.mxu3 }
 0x2b8   : > { %v2082_v42 = vadd.f32 %v2081_v27, %v1992_v61  ;;  %v1714_v16 = vpop.f32.mrf.mxu1  ;;  %v2173_v36 = vpop.f32.mrf.mxu0  ;;  %v2282_v35 = vadd.f32 %v3901_v53, %v2247_v38 }
 0x2b9   : > { %v1715_v34 = vadd.f32 %v1714_v16, %v4161_v19 }
 0x2ba   : > { %v2171_v18 = vadd.f32 %v2170_v56, %v2082_v42  ;;  %v2314_v9 = vmax.f32 %v2282_v35, 0.0 }
 0x2bc   : > { %v2213_v33 = vadd.f32 %v2171_v18, %v1712_v59 }
 0x2be   : > { %v2248_v13 = vmul.f32 %v3895_v21, %v2213_v33 }
 0x2bf   : > { %v1995_v40 = vpop.f32.mrf.mxu2  ;;  %v2084_v14 = vpop.f32.mrf.mxu3 }
 0x2c0   : > { %v2283_v32 = vadd.f32 %v3901_v53, %v2248_v13  ;;  %v2085_v44 = vadd.f32 %v2084_v14, %v1995_v40  ;;  %v1716_v48 = vpop.f32.mrf.mxu1  ;;  %v2175_v2 = vpop.f32.mrf.mxu0 }
 0x2c1   : > { %v1717_v58 = vadd.f32 %v1716_v48, %v3869_v20 }
 0x2c2   : > { %v2315_v41 = vmax.f32 %v2283_v32, 0.0  ;;  %v2174_v57 = vadd.f32 %v2173_v36, %v2085_v44 }
 0x2c4   : > { %v2957_v28 = vpack.c.bf16 %v2315_v41, %v2314_v9  ;;  %v2214_v26 = vadd.f32 %v2174_v57, %v1715_v34 }
 0x2c6   : > { %2985 = vst [vmem:[%s3916_s10 + $0x60] sm:$0xff] %v2957_v28   ;;  %v2249_v6 = vmul.f32 %v3895_v21, %v2214_v26 }
 0x2c7   : > { %v1997_v54 = vpop.f32.mrf.mxu2  ;;  %v2086_v7 = vpop.f32.mrf.mxu3 }
 0x2c8   : > { %v2087_v47 = vadd.f32 %v2086_v7, %v1997_v54  ;;  %v1719_v37 = vpop.f32.mrf.mxu1  ;;  %v2178_v55 = vpop.f32.mrf.mxu0  ;;  %v2284_v46 = vadd.f32 %v3901_v53, %v2249_v6 }
 0x2c9   : > { %v1720_v20 = vadd.f32 %v1719_v37, %v3872_v24 }
 0x2ca   : > { %v2176_v1 = vadd.f32 %v2175_v2, %v2087_v47  ;;  %v2316_v49 = vmax.f32 %v2284_v46, 0.0 }
 0x2cc   : > { %v2215_v43 = vadd.f32 %v2176_v1, %v1717_v58 }
 0x2ce   : > { %v2250_v15 = vmul.f32 %v3895_v21, %v2215_v43 }
 0x2cf   : > { %v2000_v62 = vpop.f32.mrf.mxu2  ;;  %v2089_v39 = vpop.f32.mrf.mxu3 }
 0x2d0   : > { %v2285_v3 = vadd.f32 %v3901_v53, %v2250_v15  ;;  %v2090_v45 = vadd.f32 %v2089_v39, %v2000_v62  ;;  %v1721_v29 = vpop.f32.mrf.mxu1  ;;  %v2180_v52 = vpop.f32.mrf.mxu0 }
 0x2d1   : > { %v1722_v4 = vadd.f32 %v1721_v29, %v3879_v10 }
 0x2d2   : > { %v2317_v5 = vmax.f32 %v2285_v3, 0.0  ;;  %v2179_v60 = vadd.f32 %v2178_v55, %v2090_v45 }
 0x2d4   : > { %v2962_v12 = vpack.c.bf16 %v2317_v5, %v2316_v49  ;;  %v2216_v30 = vadd.f32 %v2179_v60, %v1720_v20 }
 0x2d6   : > { %2986 = vst [vmem:[%s3916_s10 + $0x68] sm:$0xff] %v2962_v12   ;;  %v2251_v50 = vmul.f32 %v3895_v21, %v2216_v30 }
 0x2d7   : > { %v2002_v8 = vpop.f32.mrf.mxu2  ;;  %v2091_v63 = vpop.f32.mrf.mxu3 }
 0x2d8   : > { %v2092_v56 = vadd.f32 %v2091_v63, %v2002_v8  ;;  %v1724_v11 = vpop.f32.mrf.mxu1  ;;  %v2286_v22 = vadd.f32 %v3901_v53, %v2251_v50  ;;  %v2183_v61 = vpop.f32.mrf.mxu0 }
 0x2d9   : > { %v1725_v10 = vadd.f32 %v1724_v11, %v3882_v31 }
 0x2da   : > { %v2181_v23 = vadd.f32 %v2180_v52, %v2092_v56  ;;  %v2318_v36 = vmax.f32 %v2286_v22, 0.0 }
 0x2dc   : > { %v2217_v0 = vadd.f32 %v2181_v23, %v1722_v4 }
 0x2de   : > { %v2252_v17 = vmul.f32 %v3895_v21, %v2217_v0 }
 0x2df   : > { %v2005_v24 = vpop.f32.mrf.mxu2  ;;  %v2094_v27 = vpop.f32.mrf.mxu3 }
 0x2e0   : > { %v2287_v42 = vadd.f32 %v3901_v53, %v2252_v17  ;;  %v2095_v16 = vadd.f32 %v2094_v27, %v2005_v24  ;;  %v1726_v33 = vpop.f32.mrf.mxu1  ;;  %v2185_v14 = vpop.f32.mrf.mxu0 }
 0x2e1   : > { %v1727_v44 = vadd.f32 %v1726_v33, %v3889_v51 }
 0x2e2   : > { %v2319_v38 = vmax.f32 %v2287_v42, 0.0  ;;  %v2184_v25 = vadd.f32 %v2183_v61, %v2095_v16 }
 0x2e4   : > { %v2967_v59 = vpack.c.bf16 %v2319_v38, %v2318_v36  ;;  %v2218_v18 = vadd.f32 %v2184_v25, %v1725_v10 }
 0x2e6   : > { %2987 = vst [vmem:[%s3916_s10 + $0x70] sm:$0xff] %v2967_v59   ;;  %v2253_v32 = vmul.f32 %v3895_v21, %v2218_v18 }
 0x2e7   : > { %v2007_v35 = vpop.f32.mrf.mxu2  ;;  %v2096_v13 = vpop.f32.mrf.mxu3 }
 0x2e8   : > { %v2097_v40 = vadd.f32 %v2096_v13, %v2007_v35  ;;  %v2288_v9 = vadd.f32 %v3901_v53, %v2253_v32 }
 0x2ea   : > { %v2186_v48 = vadd.f32 %v2185_v14, %v2097_v40  ;;  %v2320_v57 = vmax.f32 %v2288_v9, 0.0 }
 0x2ec   : > { %v2219_v2 = vadd.f32 %v2186_v48, %v1727_v44 }
 0x2ee   : > { %v2254_v41 = vmul.f32 %v3895_v21, %v2219_v2 }
 0x2f0   : > { %v2289_v31 = vadd.f32 %v3901_v53, %v2254_v41 }
 0x2f2   : > { %v2321_v28 = vmax.f32 %v2289_v31, 0.0 }
 0x2f4   : > { %v2972_v19 = vpack.c.bf16 %v2321_v28, %v2320_v57 }
 0x2f6   : > { %2988 = vst [vmem:[%s3916_s10 + $0x78] sm:$0xff] %v2972_v19  }
 0x2f7 PF: > { %s14_s15 = sadd.s32 1, %s3030_s15  }
 0x2f8   : > { %p11_p4 = scmp.ge.s32.totalorder %s14_s15, 4  }
 0x2fa   :  { %13 = sbr.rel (!%p11_p4) target bundleno = 1 (0x1), region = 66 }

// kernel: _lambda_.3
= control target key start
LH: loop header
LB: loop body
LE: loop exit
PB: predicated region body
PF: predicated region fallthrough
CT: control target
= control target key end

     0   :  { %s5072_s18 = smov 0   ;;  %s7620_s0 = inlined_call_operand.vmem [shape: bf16[2,8,8,128], index: 0, kind: input, shape index: {}]   ;;  %s7621_s1 = inlined_call_operand.vmem [shape: s32[2,8,8,128], index: 1, kind: input, shape index: {}]   ;;  %s7622_s2 = inlined_call_operand.vmem [shape: bf16[1152,128], index: 2, kind: input, shape index: {}]   ;;  %s7623_s3 = inlined_call_operand.vmem [shape: f32[1,128], index: 3, kind: input, shape index: {}]   ;;  %s7624_s4 = inlined_call_operand.vmem [shape: f32[1,128], index: 4, kind: input, shape index: {}]   ;;  %s7625_s5 = inlined_call_operand.vmem [shape: bf16[2,16,16,128], index: 5, kind: output, shape index: {}]  }
   0x1 LB: > { %s4399_s19 = sadd.s32 4294967295, %s5039_s18   ;;  %p4403_p0 = scmp.ge.s32.totalorder %s5039_s18, 1  ;;  %s5039_s18 = sphi %s5072_s18, %s15_s18  }
   0x2   : > { %p197_p1 = scmp.lt.s32.totalorder %s5039_s18, 3 }
   0x4   : > { %p198_p2 = pnand %p4403_p0, %p197_p1 }
   0x6   : > { %201 = sbr.rel (%p198_p2) target bundleno = 1005 (0x3ed), region = 40 }
   0xb   : > { %v4862_v0 = vld [vmem:[%s7622_s2 + $0xf8] sm:$0xff]  ;;  %v4861_v1 = vld [vmem:[%s7622_s2 + $0xf0] sm:$0xff]  ;;  %v4860_v2 = vld [vmem:[%s7622_s2 + $0xe8] sm:$0xff]  ;;  %p230_p3 = scmp.lt.s32.totalorder %s4399_s19, 1  ;;  %vm331_vm10 = vcmask 1041409   ;;  %vm335_vm11 = vcmask 1042434  }
   0xc   : > { %4998 = vmatpush.bf16.msra.mxu1 %v4862_v0  ;;  %4999 = vmatpush.bf16.msra.mxu2 %v4862_v0  ;;  %v4859_v3 = vld [vmem:[%s7622_s2 + $0xe0] sm:$0xff]  ;;  %v4858_v4 = vld [vmem:[%s7622_s2 + $0xd8] sm:$0xff]  ;;  %v4857_v5 = vld [vmem:[%s7622_s2 + $0xd0] sm:$0xff]  ;;  %vm339_vm12 = vcmask 1043459   ;;  %vm326_vm14 = vcmask 1040384  }
   0xd   : > { %2997 = vmatpush.bf16.msra.mxu0 %v4862_v0  ;;  %5000 = vmatpush.bf16.msra.mxu3 %v4862_v0  ;;  %s7852_s19 = smov (!%p230_p3, %s4399_s19), 1  ;;  %v4856_v7 = vld [vmem:[%s7622_s2 + $0xc8] sm:$0xff]  ;;  %v4855_v10 = vld [vmem:[%s7622_s2 + $0xc0] sm:$0xff] }
   0xe   : > { %s4829_s30 = sshll.u32 %s7852_s19, 6  ;;  %s4828_s11 = sshll.u32 %s7852_s19, 5 }
   0xf   : > { %s5101_s8 = scalar_lea.vmem %s7621_s1, %s4829_s30  ;;  %s5116_s16 = scalar_lea.vmem %s7620_s0, %s4828_s11 }
  0x10   : > { %5001 = vmatpush.bf16.msra.mxu1 %v4861_v1  ;;  %5002 = vmatpush.bf16.msra.mxu2 %v4861_v1  ;;  %v5108_v6 = vld [vmem:[%s5101_s8] sm:$0xff]  ;;  %v5120_v8 = vld [vmem:[%s5101_s8 + $0x8] sm:$0xff]  ;;  %v5123_v9 = vld [vmem:[%s5101_s8 + $0x10] sm:$0xff]  ;;  %s4830_s15 = sshll.u32 %s7852_s19, 7 }
  0x11   : > { %2998 = vmatpush.bf16.msra.mxu0 %v4861_v1  ;;  %5003 = vmatpush.bf16.msra.mxu3 %v4861_v1  ;;  %vm262_vm0 = vcmp.eq.s32.totalorder %v5108_v6, 0  ;;  %7681 = vst [vmem:[#allocation2_spill] sm:$0xff] %v5123_v9  ;;  %v5129_v11 = vld [vmem:[%s5116_s16] sm:$0xf]  ;;  %vm286_vm2 = vcmp.eq.s32.totalorder %v5108_v6, 1  ;;  %vm263_vm3 = vcmp.eq.s32.totalorder %v5120_v8, 0  ;;  %s7447_s20 = scalar_lea.vmem %s7625_s5, %s4830_s15 }
  0x12   : > { %vm270_vm1 = vmpackc.low %vm262_vm0, %vm262_vm0  ;;  %vm264_vm4 = vcmp.eq.s32.totalorder %v5123_v9, 0  ;;  %v5136_v13 = vld [vmem:[%s5116_s16 + $0x4] sm:$0xf]  ;;  %v5139_v14 = vld [vmem:[%s5116_s16 + $0x8] sm:$0xf]  ;;  %vm287_vm8 = vcmp.eq.s32.totalorder %v5120_v8, 1 }
  0x13   : > { %v278_v12 = vsel %vm270_vm1, %v5129_v11, 0  ;;  %vm294_vm5 = vmpackc.low %vm286_vm2, %vm286_vm2  ;;  %7682 = vst [vmem:[#allocation3_spill] sm:$0xff] %v5139_v14  ;;  %vm288_vm9 = vcmp.eq.s32.totalorder %v5123_v9, 1  ;;  %vm1067_vm0 = vsmask.f32 256  ;;  %vm1133_vm2 = vcmp.eq.s32.totalorder %v5108_v6, 2 }
  0x14   : > { %5004 = vmatpush.bf16.msra.mxu1 %v4860_v2  ;;  %5005 = vmatpush.bf16.msra.mxu2 %v4860_v2  ;;  %vm271_vm6 = vmpackc.low %vm263_vm3, %vm263_vm3  ;;  %v302_v15 = vsel %vm294_vm5, %v5129_v11, 0  ;;  %v318_v16 = vrot.slane %v278_v12, 3  ;;  %vm1157_vm3 = vcmp.eq.s32.totalorder %v5108_v6, 3 }
  0x15   : > { %2999 = vmatpush.bf16.msra.mxu0 %v4860_v2  ;;  %5006 = vmatpush.bf16.msra.mxu3 %v4860_v2  ;;  %vm272_vm7 = vmpackc.low %vm264_vm4, %vm264_vm4  ;;  %v279_v17 = vsel %vm271_vm6, %v5136_v13, 0  ;;  %v506_v19 = vrot.slane %v302_v15, 3  ;;  %vm1134_vm6 = vcmp.eq.s32.totalorder %v5120_v8, 2 }
  0x16   : > { %v280_v18 = vsel %vm272_vm7, %v5139_v14, 0  ;;  %vm295_vm13 = vmpackc.low %vm287_vm8, %vm287_vm8  ;;  %v319_v20 = vrot.slane %v279_v17, 3  ;;  %v332_v21 = vsel %vm331_vm10, %v278_v12, %v318_v16  ;;  %v336_v22 = vsel %vm335_vm11, %v278_v12, %v318_v16 }
  0x17   : > { %vm296_vm15 = vmpackc.low %vm288_vm9, %vm288_vm9  ;;  %v320_v23 = vrot.slane %v280_v18, 3  ;;  %v340_v24 = vsel %vm339_vm12, %v278_v12, %v318_v16  ;;  %v5150_v25 = vsel %vm295_vm13, %v5136_v13, 0  ;;  %v329_v26 = vsel %vm326_vm14, %v278_v12, %v318_v16 }
  0x18   : > { %5007 = vmatpush.bf16.msra.mxu1 %v4859_v3  ;;  %5008 = vmatpush.bf16.msra.mxu2 %v4859_v3  ;;  %v5154_v27 = vsel %vm296_vm15, %v5139_v14, 0  ;;  %v334_v28 = vrot.slane %v332_v21, 1  ;;  %v5156_v29 = vrot.slane %v336_v22, 2  ;;  %v518_v30 = vsel %vm331_vm10, %v302_v15, %v506_v19  ;;  %vm5213_vm1 = vmand %vm326_vm14, %vm1067_vm0 }
  0x19   : > { %3000 = vmatpush.bf16.msra.mxu0 %v4859_v3  ;;  %5009 = vmatpush.bf16.msra.mxu3 %v4859_v3  ;;  %v5159_v31 = vrot.slane %v340_v24, 3  ;;  %v347_v32 = vsel %vm331_vm10, %v279_v17, %v319_v20  ;;  %v350_v33 = vsel %vm335_vm11, %v279_v17, %v319_v20  ;;  %v353_v34 = vsel %vm339_vm12, %v279_v17, %v319_v20  ;;  %vm5272_vm4 = vmpackc.low %vm1133_vm2, %vm1133_vm2 }
  0x1a   : > { %v5165_v35 = vsel %vm326_vm14, %v279_v17, %v319_v20  ;;  %v5168_v36 = vsel %vm326_vm14, %v280_v18, %v320_v23  ;;  %v360_v37 = vsel %vm331_vm10, %v280_v18, %v320_v23  ;;  %v521_v38 = vsel %vm335_vm11, %v302_v15, %v506_v19  ;;  %vm1165_vm5 = vmpackc.low %vm1157_vm3, %vm1157_vm3 }
  0x1b   : > { %v363_v39 = vsel %vm335_vm11, %v280_v18, %v320_v23  ;;  %v366_v40 = vsel %vm339_vm12, %v280_v18, %v320_v23  ;;  %v516_v41 = vsel %vm326_vm14, %v302_v15, %v506_v19  ;;  %v520_v42 = vrot.slane %v518_v30, 1  ;;  %vm1142_vm8 = vmpackc.low %vm1134_vm6, %vm1134_vm6 }
  0x1c   : > { %5010 = vmatpush.bf16.msra.mxu1 %v4858_v4  ;;  %5011 = vmatpush.bf16.msra.mxu2 %v4858_v4  ;;  %v5175_v43 = vrot.slane %v347_v32, 1  ;;  %v5177_v44 = vrot.slane %v350_v33, 2  ;;  %v5179_v45 = vrot.slane %v353_v34, 3  ;;  %v524_v46 = vsel %vm339_vm12, %v302_v15, %v506_v19 }
  0x1d   : > { %3001 = vmatpush.bf16.msra.mxu0 %v4858_v4  ;;  %5012 = vmatpush.bf16.msra.mxu3 %v4858_v4  ;;  %v5182_v47 = vrot.slane %v360_v37, 1  ;;  %v435_v48 = vunpack.i.h.s16 %v329_v26  ;;  %v437_v49 = vunpack.i.h.s16 %v334_v28  ;;  %v523_v50 = vrot.slane %v521_v38, 2 }
  0x1e   : > { %v5184_v51 = vrot.slane %v363_v39, 2  ;;  %v5186_v52 = vrot.slane %v366_v40, 3  ;;  %v507_v53 = vrot.slane %v5150_v25, 3  ;;  %v619_v54 = vunpack.i.h.s16 %v516_v41 }
  0x1f   : > { %v439_v55 = vunpack.i.h.s16 %v5156_v29  ;;  %v441_v56 = vunpack.i.h.s16 %v5159_v31  ;;  %v526_v57 = vrot.slane %v524_v46, 3  ;;  %v621_v58 = vunpack.i.h.s16 %v520_v42 }
  0x20   : > { %5013 = vmatpush.bf16.msra.mxu1 %v4857_v5  ;;  %5014 = vmatpush.bf16.msra.mxu2 %v4857_v5  ;;  %v443_v59 = vunpack.i.h.s16 %v5165_v35  ;;  %v445_v60 = vunpack.i.h.s16 %v5175_v43  ;;  %v5194_v61 = vrot.slane %v5154_v27, 3  ;;  %v4410_v62 = vpack.i.b16 %v329_v26, %v329_v26 }
  0x21   : > { %3002 = vmatpush.bf16.msra.mxu0 %v4857_v5  ;;  %5015 = vmatpush.bf16.msra.mxu3 %v4857_v5  ;;  %v623_v63 = vunpack.i.h.s16 %v523_v50  ;;  %v683_v0 = vpack.i.b16 %v435_v48, %v435_v48  ;;  %v4411_v1 = vpack.i.b16 %v334_v28, %v334_v28  ;;  %v685_v2 = vpack.i.b16 %v437_v49, %v437_v49 }
  0x22   : > { %v531_v3 = vsel %vm331_vm10, %v5150_v25, %v507_v53  ;;  %v4442_v4 = vpack.i.b16 %v516_v41, %v516_v41  ;;  %v875_v5 = vpack.i.b16 %v619_v54, %v619_v54  ;;  %v537_v12 = vsel %vm339_vm12, %v5150_v25, %v507_v53 }
  0x23   : > { %v625_v15 = vunpack.i.h.s16 %v526_v57  ;;  %v877_v16 = vpack.i.b16 %v621_v58, %v621_v58  ;;  %v4412_v17 = vpack.i.b16 %v5156_v29, %v5156_v29  ;;  %v687_v18 = vpack.i.b16 %v439_v55, %v439_v55 }
  0x24   : > { %5016 = vmatpush.bf16.msra.mxu1 %v4856_v7  ;;  %5017 = vmatpush.bf16.msra.mxu2 %v4856_v7  ;;  %v4413_v19 = vpack.i.b16 %v5159_v31, %v5159_v31  ;;  %v4444_v20 = vpack.i.b16 %v523_v50, %v523_v50  ;;  %v746_v21 = vperm.slane %v4410_v62, 0  ;;  %v747_v22 = vperm.slane %v683_v0, 0 }
  0x25   : > { %3003 = vmatpush.bf16.msra.mxu0 %v4856_v7  ;;  %5018 = vmatpush.bf16.msra.mxu3 %v4856_v7  ;;  %v4443_v7 = vpack.i.b16 %v520_v42, %v520_v42  ;;  %v748_v23 = vperm.slane %v4411_v1, 0  ;;  %v879_v24 = vpack.i.b16 %v623_v63, %v623_v63  ;;  %v4445_v26 = vpack.i.b16 %v526_v57, %v526_v57 }
  0x26   : > { %v938_v28 = vperm.slane %v4442_v4, 0  ;;  %v939_v30 = vperm.slane %v875_v5, 0  ;;  %v689_v33 = vpack.i.b16 %v441_v56, %v441_v56  ;;  %v749_v34 = vperm.slane %v685_v2, 0 }
  0x27   : > { %v940_v32 = vperm.slane %v4443_v7, 0  ;;  %v881_v37 = vpack.i.b16 %v625_v15, %v625_v15  ;;  %v941_v38 = vperm.slane %v877_v16, 0  ;;  %v544_v29 = vsel %vm331_vm10, %v5154_v27, %v5194_v61 }
  0x28   : > { %5019 = vmatpush.bf16.msra.mxu1 %v4855_v10  ;;  %5020 = vmatpush.bf16.msra.mxu2 %v4855_v10  ;;  %v750_v39 = vperm.slane %v4412_v17, 0  ;;  %v942_v40 = vperm.slane %v4444_v20, 0  ;;  %v547_v31 = vsel %vm335_vm11, %v5154_v27, %v5194_v61  ;;  %v751_v41 = vperm.slane %v687_v18, 0 }
  0x29   : > { %3004 = vmatpush.bf16.msra.mxu0 %v4855_v10  ;;  %5021 = vmatpush.bf16.msra.mxu3 %v4855_v10  ;;  %v534_v10 = vsel %vm335_vm11, %v5150_v25, %v507_v53  ;;  %v752_v42 = vperm.slane %v4413_v19, 0  ;;  %v943_v46 = vperm.slane %v879_v24, 0  ;;  %v944_v49 = vperm.slane %v4445_v26, 0 }
  0x2a   : > { %v1069_v50 = vsel %vm5213_vm1, %v746_v21, %v938_v28  ;;  %v1070_v54 = vsel %vm5213_vm1, %v747_v22, %v939_v30  ;;  %v1071_v55 = vsel %vm5213_vm1, %v748_v23, %v940_v32  ;;  %v550_v56 = vsel %vm339_vm12, %v5154_v27, %v5194_v61 }
  0x2b   : > { %v753_v57 = vperm.slane %v689_v33, 0  ;;  %v945_v58 = vperm.slane %v881_v37, 0  ;;  %v1072_v62 = vsel %vm5213_vm1, %v749_v34, %v941_v38  ;;  %2000 = vst [vmem:[#allocation1] ss:$9 sm:$0xff] %v1069_v50  ;;  %v447_v63 = vunpack.i.h.s16 %v5177_v44 }
  0x2c   : > { %v5231_v0 = vsel %vm326_vm14, %v5150_v25, %v507_v53  ;;  %v5233_v1 = vrot.slane %v531_v3, 1  ;;  %v1073_v2 = vsel %vm5213_vm1, %v750_v39, %v942_v40  ;;  %2003 = vst [vmem:[#allocation1 + $0x1] ss:$9 sm:$0xff] %v1070_v54  ;;  %v5237_v4 = vrot.slane %v534_v10, 2 }
  0x2d   : > { %v5239_v5 = vrot.slane %v537_v12, 3  ;;  %v5241_v7 = vrot.slane %v544_v29, 1  ;;  %v1074_v15 = vsel %vm5213_vm1, %v751_v41, %v943_v46  ;;  %2006 = vst [vmem:[#allocation1 + $0x2] ss:$9 sm:$0xff] %v1071_v55  ;;  %v5245_v16 = vrot.slane %v547_v31, 2 }
  0x2e   : > { %v5247_v25 = vrot.slane %v550_v56, 3  ;;  %v1075_v53 = vsel %vm5213_vm1, %v752_v42, %v944_v49  ;;  %2009 = vst [vmem:[#allocation1 + $0x3] ss:$9 sm:$0xff] %v1072_v62  ;;  %v449_v3 = vunpack.i.h.s16 %v5179_v45  ;;  %v5256_v10 = vsel %vm326_vm14, %v5154_v27, %v5194_v61 }
  0x2f   : > { %v1076_v12 = vsel %vm5213_vm1, %v753_v57, %v945_v58  ;;  %2012 = vst [vmem:[#allocation1 + $0x4] ss:$9 sm:$0xff] %v1073_v2  ;;  %v451_v17 = vunpack.i.h.s16 %v5168_v36  ;;  %v453_v18 = vunpack.i.h.s16 %v5182_v47  ;;  %v455_v19 = vunpack.i.h.s16 %v5184_v51 }
  0x30   : > { %v457_v20 = vunpack.i.h.s16 %v5186_v52  ;;  %2015 = vst [vmem:[#allocation1 + $0x5] ss:$9 sm:$0xff] %v1074_v15  ;;  %v627_v21 = vunpack.i.h.s16 %v5231_v0  ;;  %v629_v27 = vunpack.i.h.s16 %v5233_v1  ;;  %v631_v61 = vunpack.i.h.s16 %v5237_v4 }
  0x31   : > { %v633_v22 = vunpack.i.h.s16 %v5239_v5  ;;  %2018 = vst [vmem:[#allocation1 + $0x6] ss:$9 sm:$0xff] %v1075_v53  ;;  %v635_v24 = vunpack.i.h.s16 %v5256_v10  ;;  %v637_v26 = vunpack.i.h.s16 %v5241_v7  ;;  %v639_v28 = vunpack.i.h.s16 %v5245_v16 }
  0x32   : > { %v641_v30 = vunpack.i.h.s16 %v5247_v25  ;;  %2021 = vst [vmem:[#allocation1 + $0x7] ss:$9 sm:$0xff] %v1076_v12  ;;  %v4414_v32 = vpack.i.b16 %v5165_v35, %v5165_v35  ;;  %v5288_v33 = vpack.i.b16 %v443_v59, %v443_v59  ;;  %v4415_v34 = vpack.i.b16 %v5175_v43, %v5175_v43 }
  0x33   : > { %v5295_v37 = vpack.i.b16 %v445_v60, %v445_v60  ;;  %v4416_v6 = vpack.i.b16 %v5177_v44, %v5177_v44  ;;  %v5299_v38 = vpack.i.b16 %v447_v63, %v447_v63  ;;  %v4417_v29 = vpack.i.b16 %v5179_v45, %v5179_v45 }
  0x34   : > { %v5303_v35 = vpack.i.b16 %v449_v3, %v449_v3  ;;  %v4418_v59 = vpack.i.b16 %v5168_v36, %v5168_v36  ;;  %v5307_v39 = vpack.i.b16 %v451_v17, %v451_v17  ;;  %v1149_v43 = vsel %vm5272_vm4, %v5129_v11, 0 }
  0x35   : > { %v1173_v60 = vsel %vm1165_vm5, %v5129_v11, 0  ;;  %v4419_v44 = vpack.i.b16 %v5182_v47, %v5182_v47  ;;  %v5315_v40 = vpack.i.b16 %v453_v18, %v453_v18  ;;  %v4420_v45 = vpack.i.b16 %v5184_v51, %v5184_v51 }
  0x36   : > { %v5319_v31 = vpack.i.b16 %v455_v19, %v455_v19  ;;  %v4421_v36 = vpack.i.b16 %v5186_v52, %v5186_v52  ;;  %v5323_v41 = vpack.i.b16 %v457_v20, %v457_v20  ;;  %v5325_v42 = vperm.slane %v4414_v32, 0 }
  0x37   : > { %v5328_v11 = vperm.slane %v4415_v34, 0  ;;  %v1189_v49 = vrot.slane %v1149_v43, 3  ;;  %v1373_v50 = vrot.slane %v1173_v60, 3  ;;  %v5331_v54 = vperm.slane %v4416_v6, 0 }
  0x38   : > { %7687 = vst [vmem:[#allocation4_spill] sm:$0xff] %v5319_v31  ;;  %v5334_v55 = vperm.slane %v4417_v29, 0  ;;  %v5337_v56 = vperm.slane %v4418_v59, 0  ;;  %v5340_v58 = vperm.slane %v4419_v44, 0  ;;  %v5343_v63 = vperm.slane %v4420_v45, 0 }
  0x39   : > { %7688 = vst [vmem:[#allocation5_spill] sm:$0xff] %v5323_v41  ;;  %v5346_v15 = vperm.slane %v4421_v36, 0  ;;  %v5351_v12 = vpack.i.b16 %v627_v21, %v627_v21  ;;  %v1201_v17 = vsel %vm331_vm10, %v1149_v43, %v1189_v49  ;;  %v1385_v18 = vsel %vm331_vm10, %v1173_v60, %v1373_v50 }
  0x3a   : > { %v5357_v20 = vpack.i.b16 %v629_v27, %v629_v27  ;;  %v1204_v32 = vsel %vm335_vm11, %v1149_v43, %v1189_v49  ;;  %v5362_v34 = vpack.i.b16 %v631_v61, %v631_v61  ;;  %v1199_v6 = vsel %vm326_vm14, %v1149_v43, %v1189_v49 }
  0x3b   : > { %7689 = vst [vmem:[#allocation6_spill] sm:$0xff] %v5346_v15  ;;  %v1388_v29 = vsel %vm335_vm11, %v1173_v60, %v1373_v50  ;;  %v5368_v59 = vpack.i.b16 %v633_v22, %v633_v22  ;;  %v1203_v44 = vrot.slane %v1201_v17, 1  ;;  %v1383_v27 = vsel %vm326_vm14, %v1173_v60, %v1373_v50 }
  0x3c   : > { %v1387_v45 = vrot.slane %v1385_v18, 1  ;;  %v1206_v53 = vrot.slane %v1204_v32, 2  ;;  %v1207_v61 = vsel %vm339_vm12, %v1149_v43, %v1189_v49  ;;  %v1391_v2 = vsel %vm339_vm12, %v1173_v60, %v1373_v50 }
  0x3d   : > { %v5378_v62 = vpack.i.b16 %v635_v24, %v635_v24  ;;  %v1302_v17 = vunpack.i.h.s16 %v1199_v6  ;;  %v1390_v57 = vrot.slane %v1388_v29, 2  ;;  %v5385_v18 = vpack.i.b16 %v637_v26, %v637_v26 }
  0x3e   : > { %v5392_v60 = vpack.i.b16 %v639_v28, %v639_v28  ;;  %v1486_v24 = vunpack.i.h.s16 %v1383_v27  ;;  %v1209_v49 = vrot.slane %v1207_v61, 3  ;;  %v1304_v50 = vunpack.i.h.s16 %v1203_v44 }
  0x3f   : > { %v1393_v32 = vrot.slane %v1391_v2, 3  ;;  %v1488_v52 = vunpack.i.h.s16 %v1387_v45  ;;  %v5399_v26 = vpack.i.b16 %v641_v30, %v641_v30  ;;  %v1306_v51 = vunpack.i.h.s16 %v1206_v53 }
  0x40   : > { %v1490_v47 = vunpack.i.h.s16 %v1390_v57  ;;  %v4474_v46 = vpack.i.b16 %v1199_v6, %v1199_v6  ;;  %v1550_v28 = vpack.i.b16 %v1302_v17, %v1302_v17  ;;  %v4475_v43 = vpack.i.b16 %v1203_v44, %v1203_v44 }
  0x41   : > { %vm1158_vm7 = vcmp.eq.s32.totalorder %v5120_v8, 3  ;;  %v4506_v61 = vpack.i.b16 %v1383_v27, %v1383_v27  ;;  %v1742_v2 = vpack.i.b16 %v1486_v24, %v1486_v24  ;;  %v4507_v22 = vpack.i.b16 %v1387_v45, %v1387_v45 }
  0x42   : > { %v1308_v36 = vunpack.i.h.s16 %v1209_v49  ;;  %v1492_v21 = vunpack.i.h.s16 %v1393_v32  ;;  %v1552_v29 = vpack.i.b16 %v1304_v50, %v1304_v50  ;;  %v1744_v23 = vpack.i.b16 %v1488_v52, %v1488_v52  ;;  %vm5418_vm9 = vmpackc.low %vm1158_vm7, %vm1158_vm7 }
  0x43   : > { %v4476_v19 = vpack.i.b16 %v1206_v53, %v1206_v53  ;;  %v1554_v3 = vpack.i.b16 %v1306_v51, %v1306_v51  ;;  %v4477_v30 = vpack.i.b16 %v1209_v49, %v1209_v49  ;;  %v4508_v41 = vpack.i.b16 %v1390_v57, %v1390_v57 }
  0x44   : > { %v1613_v14 = vperm.slane %v4474_v46, 0  ;;  %v1614_v15 = vperm.slane %v1550_v28, 0  ;;  %v1615_v31 = vperm.slane %v4475_v43, 0  ;;  %v1746_v9 = vpack.i.b16 %v1490_v47, %v1490_v47  ;;  %v5412_v43 = vld [vmem:[#allocation1] sm:$0xff] }
  0x45   : > { %v4509_v6 = vpack.i.b16 %v1393_v32, %v1393_v32  ;;  %v1805_v44 = vperm.slane %v4506_v61, 0  ;;  %v1806_v27 = vperm.slane %v1742_v2, 0  ;;  %v1807_v45 = vperm.slane %v4507_v22, 0 }
  0x46   : > { %v1556_v17 = vpack.i.b16 %v1308_v36, %v1308_v36  ;;  %v1616_v24 = vperm.slane %v1552_v29, 0  ;;  %v1748_v50 = vpack.i.b16 %v1492_v21, %v1492_v21  ;;  %v1808_v52 = vperm.slane %v1744_v23, 0 }
  0x47   : > { %v7690_v51 = vpack.i.b16 %v5231_v0, %v5231_v0  ;;  %v947_v46 = vperm.slane %v5351_v12, 0  ;;  %v1617_v47 = vperm.slane %v4476_v19, 0  ;;  %v1809_v53 = vperm.slane %v4508_v41, 0 }
  0x48   : > { %v1150_v49 = vsel %vm1142_vm8, %v5136_v13, 0  ;;  %v1618_v32 = vperm.slane %v1554_v3, 0  ;;  %v1619_v28 = vperm.slane %v4477_v30, 0  ;;  %v1810_v22 = vperm.slane %v1746_v9, 0 }
  0x49   : > { %v5409_v57 = vperm.slane %v7690_v51, 0  ;;  %v1811_v0 = vperm.slane %v4509_v6, 0  ;;  %v1933_v12 = vsel %vm5213_vm1, %v1613_v14, %v1805_v44  ;;  %v1934_v41 = vsel %vm5213_vm1, %v1614_v15, %v1806_v27 }
  0x4a   : > { %v1935_v19 = vsel %vm5213_vm1, %v1615_v31, %v1807_v45  ;;  %v7693_v9 = vpack.i.b16 %v5233_v1, %v5233_v1  ;;  %v1620_v8 = vperm.slane %v1556_v17, 0  ;;  %v1812_v21 = vperm.slane %v1748_v50, 0  ;;  %2024 = vst [vmem:[#allocation1] ss:$9 sm:$0xff] %v1933_v12 }
  0x4b   : > { %v1936_v36 = vsel %vm5213_vm1, %v1616_v24, %v1808_v52  ;;  %v949_v29 = vperm.slane %v5357_v20, 0  ;;  %v7694_v14 = vpack.i.b16 %v5237_v4, %v5237_v4  ;;  %v1190_v61 = vrot.slane %v1150_v49, 3  ;;  %2026 = vst [vmem:[#allocation1 + $0x1] ss:$9 sm:$0xff] %v1934_v41 }
  0x4c   : > { %v5431_v3 = vperm.slane %v7693_v9, 0  ;;  %v1937_v31 = vsel %vm5213_vm1, %v1617_v47, %v1809_v53  ;;  %v951_v1 = vperm.slane %v5362_v34, 0  ;;  %v7695_v2 = vpack.i.b16 %v5239_v5, %v5239_v5  ;;  %2028 = vst [vmem:[#allocation1 + $0x2] ss:$9 sm:$0xff] %v1935_v19 }
  0x4d   : > { %v5439_v15 = vperm.slane %v7694_v14, 0  ;;  %v1174_v20 = vsel %vm5418_vm9, %v5136_v13, 0  ;;  %v1938_v4 = vsel %vm5213_vm1, %v1618_v32, %v1810_v22  ;;  %v953_v6 = vperm.slane %v5368_v59, 0  ;;  %2030 = vst [vmem:[#allocation1 + $0x3] ss:$9 sm:$0xff] %v1936_v36 }
  0x4e   : > { %v5447_v30 = vperm.slane %v7695_v2, 0  ;;  %v7696_v44 = vpack.i.b16 %v5256_v10, %v5256_v10  ;;  %v955_v34 = vperm.slane %v5378_v62, 0  ;;  %v1939_v5 = vsel %vm5213_vm1, %v1619_v28, %v1811_v0  ;;  %2032 = vst [vmem:[#allocation1 + $0x4] ss:$9 sm:$0xff] %v1937_v31  ;;  %v7706_v31 = vld [vmem:[#allocation2_spill] sm:$0xff] }
  0x4f   : > { %v7697_v13 = vpack.i.b16 %v5241_v7, %v5241_v7  ;;  %v957_v17 = vperm.slane %v5385_v18, 0  ;;  %v7698_v59 = vpack.i.b16 %v5245_v16, %v5245_v16  ;;  %v1940_v10 = vsel %vm5213_vm1, %v1620_v8, %v1812_v21  ;;  %2034 = vst [vmem:[#allocation1 + $0x5] ss:$9 sm:$0xff] %v1938_v4 }
  0x50   : > { %v5458_v27 = vperm.slane %v7696_v44, 0  ;;  %v959_v62 = vperm.slane %v5392_v60, 0  ;;  %v1214_v50 = vsel %vm331_vm10, %v1150_v49, %v1190_v61  ;;  %v1217_v52 = vsel %vm335_vm11, %v1150_v49, %v1190_v61  ;;  %2036 = vst [vmem:[#allocation1 + $0x6] ss:$9 sm:$0xff] %v1939_v5 }
  0x51   : > { %v5466_v45 = vperm.slane %v7697_v13, 0  ;;  %v5472_v24 = vperm.slane %v7698_v59, 0  ;;  %v1374_v7 = vrot.slane %v1174_v20, 3  ;;  %v7699_v18 = vpack.i.b16 %v5247_v25, %v5247_v25  ;;  %2038 = vst [vmem:[#allocation1 + $0x7] ss:$9 sm:$0xff] %v1940_v10  ;;  %v7711_v10 = vld [vmem:[#allocation5_spill] sm:$0xff] }
  0x52   : > { %v961_v16 = vperm.slane %v5399_v26, 0  ;;  %v1077_v47 = vsel %vm5213_vm1, %v5325_v42, %v5409_v57  ;;  %v7700_v60 = vperm.slane %v5288_v33, 0  ;;  %v1079_v25 = vsel %vm5213_vm1, %v5328_v11, %v5431_v3 }
  0x53   : > { %v5482_v51 = vperm.slane %v7699_v18, 0  ;;  %v7701_v32 = vperm.slane %v5295_v37, 0  ;;  %v1212_v28 = vsel %vm326_vm14, %v1150_v49, %v1190_v61  ;;  %v1220_v42 = vsel %vm339_vm12, %v1150_v49, %v1190_v61 }
  0x54   : > { %v1078_v53 = vsel %vm5213_vm1, %v7700_v60, %v947_v46  ;;  %v1081_v33 = vsel %vm5213_vm1, %v5331_v54, %v5439_v15  ;;  %v7702_v57 = vperm.slane %v5299_v38, 0  ;;  %v1216_v46 = vrot.slane %v1214_v50, 1 }
  0x55   : > { %v1080_v26 = vsel %vm5213_vm1, %v7701_v32, %v949_v29  ;;  %v1219_v37 = vrot.slane %v1217_v52, 2  ;;  %v1083_v22 = vsel %vm5213_vm1, %v5334_v55, %v5447_v30  ;;  %v7703_v49 = vperm.slane %v5303_v35, 0 }
  0x56   : > { %v1082_v11 = vsel %vm5213_vm1, %v7702_v57, %v951_v1  ;;  %v1085_v38 = vsel %vm5213_vm1, %v5337_v56, %v5458_v27  ;;  %v1398_v54 = vsel %vm331_vm10, %v1174_v20, %v1374_v7  ;;  %v1222_v0 = vrot.slane %v1220_v42, 3 }
  0x57   : > { %v5519_v23 = vsel %vm5213_vm1, %v7703_v49, %v953_v6  ;;  %v1310_v12 = vunpack.i.h.s16 %v1212_v28  ;;  %v1401_v41 = vsel %vm335_vm11, %v1174_v20, %v1374_v7  ;;  %v1404_v19 = vsel %vm339_vm12, %v1174_v20, %v1374_v7 }
  0x58   : > { %v7704_v55 = vperm.slane %v5307_v39, 0  ;;  %v1087_v9 = vsel %vm5213_vm1, %v5340_v58, %v5466_v45  ;;  %v7705_v3 = vperm.slane %v5315_v40, 0  ;;  %v1089_v39 = vsel %vm5213_vm1, %v5343_v63, %v5472_v24  ;;  %v7707_v40 = vld [vmem:[#allocation4_spill] sm:$0xff]  ;;  %v5559_v44 = vld [vmem:[#allocation1] sm:$0xff] }
  0x59   : > { %v1312_v21 = vunpack.i.h.s16 %v1216_v46  ;;  %v1314_v36 = vunpack.i.h.s16 %v1219_v37  ;;  %v1396_v29 = vsel %vm326_vm14, %v1174_v20, %v1374_v7  ;;  %v1400_v14 = vrot.slane %v1398_v54, 1  ;;  %v7709_v20 = vld [vmem:[#allocation6_spill] sm:$0xff]  ;;  %2041 = vst [vmem:[#allocation1] ss:$9 sm:$0xff] %v1077_v47 }
  0x5a   : > { %v5532_v35 = vsel %vm5213_vm1, %v7704_v55, %v955_v34  ;;  %v5542_v8 = vsel %vm5213_vm1, %v7705_v3, %v957_v17  ;;  %v1403_v15 = vrot.slane %v1401_v41, 2  ;;  %v1406_v61 = vrot.slane %v1404_v19, 3  ;;  %v7710_v17 = vld [vmem:[#allocation3_spill] sm:$0xff]  ;;  %2043 = vst [vmem:[#allocation1 + $0x1] ss:$9 sm:$0xff] %v1078_v53 }
  0x5b   : > { %vm1135_vm13 = vcmp.eq.s32.totalorder %v7706_v31, 2  ;;  %vm1159_vm15 = vcmp.eq.s32.totalorder %v7706_v31, 3  ;;  %v7708_v1 = vperm.slane %v7707_v40, 0  ;;  %v1316_v30 = vunpack.i.h.s16 %v1222_v0  ;;  %2045 = vst [vmem:[#allocation1 + $0x2] ss:$9 sm:$0xff] %v1079_v25 }
  0x5c   : > { %v4478_v4 = vpack.i.b16 %v1212_v28, %v1212_v28  ;;  %v5557_v6 = vpack.i.b16 %v1310_v12, %v1310_v12  ;;  %vm1143_vm0 = vmpackc.low %vm1135_vm13, %vm1135_vm13  ;;  %v1091_v34 = vsel %vm5213_vm1, %v7709_v20, %v5482_v51  ;;  %v1494_v5 = vunpack.i.h.s16 %v1396_v29  ;;  %2047 = vst [vmem:[#allocation1 + $0x3] ss:$9 sm:$0xff] %v1080_v26 }
  0x5d   : > { %v5555_v2 = vsel %vm5213_vm1, %v7708_v1, %v959_v62  ;;  %v4479_v13 = vpack.i.b16 %v1216_v46, %v1216_v46  ;;  %v1151_v59 = vsel %vm1143_vm0, %v7710_v17, 0  ;;  %v7712_v62 = vperm.slane %v7711_v10, 0  ;;  %vm1167_vm2 = vmpackc.low %vm1159_vm15, %vm1159_vm15  ;;  %2049 = vst [vmem:[#allocation1 + $0x4] ss:$9 sm:$0xff] %v1081_v33 }
  0x5e   : > { %v1496_v52 = vunpack.i.h.s16 %v1400_v14  ;;  %v1560_v7 = vpack.i.b16 %v1312_v21, %v1312_v21  ;;  %v4480_v18 = vpack.i.b16 %v1219_v37, %v1219_v37  ;;  %v1498_v60 = vunpack.i.h.s16 %v1403_v15  ;;  %2051 = vst [vmem:[#allocation1 + $0x5] ss:$9 sm:$0xff] %v1082_v11 }
  0x5f   : > { %v5570_v50 = vsel %vm5213_vm1, %v7712_v62, %v961_v16  ;;  %v1500_v32 = vunpack.i.h.s16 %v1406_v61  ;;  %v1562_v28 = vpack.i.b16 %v1314_v36, %v1314_v36  ;;  %v1191_v47 = vrot.slane %v1151_v59, 3  ;;  %2053 = vst [vmem:[#allocation1 + $0x6] ss:$9 sm:$0xff] %v1083_v22 }
  0x60   : > { %v4481_v42 = vpack.i.b16 %v1222_v0, %v1222_v0  ;;  %v5575_v57 = vpack.i.b16 %v1316_v30, %v1316_v30  ;;  %v1621_v46 = vperm.slane %v4478_v4, 0  ;;  %v1622_v16 = vperm.slane %v5557_v6, 0  ;;  %2055 = vst [vmem:[#allocation1 + $0x7] ss:$9 sm:$0xff] %v5519_v23 }
  0x61   : > { %v1623_v49 = vperm.slane %v4479_v13, 0  ;;  %v4510_v54 = vpack.i.b16 %v1396_v29, %v1396_v29  ;;  %v1750_v37 = vpack.i.b16 %v1494_v5, %v1494_v5  ;;  %v1175_v53 = vsel %vm1167_vm2, %v7710_v17, 0 }
  0x62   : > { %v1624_v12 = vperm.slane %v1560_v7, 0  ;;  %v5579_v41 = vperm.slane %v4480_v18, 0  ;;  %v4511_v19 = vpack.i.b16 %v1400_v14, %v1400_v14  ;;  %v1752_v55 = vpack.i.b16 %v1496_v52, %v1496_v52 }
  0x63   : > { %v1626_v25 = vperm.slane %v1562_v28, 0  ;;  %v4512_v0 = vpack.i.b16 %v1403_v15, %v1403_v15  ;;  %v1754_v3 = vpack.i.b16 %v1498_v60, %v1498_v60  ;;  %v1227_v21 = vsel %vm331_vm10, %v1151_v59, %v1191_v47 }
  0x64   : > { %v5582_v36 = vperm.slane %v4481_v42, 0  ;;  %v4513_v26 = vpack.i.b16 %v1406_v61, %v1406_v61  ;;  %v1230_v33 = vsel %vm335_vm11, %v1151_v59, %v1191_v47  ;;  %v1375_v29 = vrot.slane %v1175_v53, 3 }
  0x65   : > { %v1756_v31 = vpack.i.b16 %v1500_v32, %v1500_v32  ;;  %v1813_v40 = vperm.slane %v4510_v54, 0  ;;  %v1814_v1 = vperm.slane %v1750_v37, 0  ;;  %v1233_v14 = vsel %vm339_vm12, %v1151_v59, %v1191_v47 }
  0x66   : > { %v1815_v11 = vperm.slane %v4511_v19, 0  ;;  %v1816_v30 = vperm.slane %v1752_v55, 0  ;;  %v1225_v15 = vsel %vm326_vm14, %v1151_v59, %v1191_v47  ;;  %v1229_v22 = vrot.slane %v1227_v21, 1  ;;  %v5614_v19 = vld [vmem:[%s5101_s8 + $0x18] sm:$0xff] }
  0x67   : > { %v1628_v4 = vperm.slane %v5575_v57, 0  ;;  %v1817_v6 = vperm.slane %v4512_v0, 0  ;;  %v1818_v5 = vperm.slane %v1754_v3, 0  ;;  %v1232_v61 = vrot.slane %v1230_v33, 2  ;;  %v5602_v47 = vld [vmem:[#allocation1] sm:$0xff] }
  0x68   : > { %v1819_v13 = vperm.slane %v4513_v26, 0  ;;  %v5589_v23 = vrot.slane %v1233_v14, 3  ;;  %v1411_v17 = vsel %vm331_vm10, %v1175_v53, %v1375_v29  ;;  %v1414_v10 = vsel %vm335_vm11, %v1175_v53, %v1375_v29  ;;  %v5626_v33 = vld [vmem:[%s5116_s16 + $0xc] sm:$0xf] }
  0x69   : > { %v1820_v62 = vperm.slane %v1756_v31, 0  ;;  %v1941_v52 = vsel %vm5213_vm1, %v1621_v46, %v1813_v40  ;;  %v1318_v7 = vunpack.i.h.s16 %v1225_v15  ;;  %v1417_v59 = vsel %vm339_vm12, %v1175_v53, %v1375_v29 }
  0x6a   : > { %v1942_v18 = vsel %vm5213_vm1, %v1622_v16, %v1814_v1  ;;  %v1943_v60 = vsel %vm5213_vm1, %v1623_v49, %v1815_v11  ;;  %v1944_v32 = vsel %vm5213_vm1, %v1624_v12, %v1816_v30  ;;  %v1320_v28 = vunpack.i.h.s16 %v1229_v22  ;;  %2058 = vst [vmem:[#allocation1] ss:$9 sm:$0xff] %v1941_v52 }
  0x6b   : > { %v1322_v42 = vunpack.i.h.s16 %v1232_v61  ;;  %v1409_v57 = vsel %vm326_vm14, %v1175_v53, %v1375_v29  ;;  %v1413_v46 = vrot.slane %v1411_v17, 1  ;;  %v1416_v54 = vrot.slane %v1414_v10, 2  ;;  %2060 = vst [vmem:[#allocation1 + $0x1] ss:$9 sm:$0xff] %v1942_v18 }
  0x6c   : > { %v1945_v37 = vsel %vm5213_vm1, %v5579_v41, %v1817_v6  ;;  %v1946_v16 = vsel %vm5213_vm1, %v1626_v25, %v1818_v5  ;;  %v1324_v49 = vunpack.i.h.s16 %v5589_v23  ;;  %v5611_v12 = vrot.slane %v1417_v59, 3  ;;  %2062 = vst [vmem:[#allocation1 + $0x2] ss:$9 sm:$0xff] %v1943_v60 }
  0x6d   : > { %v1947_v53 = vsel %vm5213_vm1, %v5582_v36, %v1819_v13  ;;  %v4482_v55 = vpack.i.b16 %v1225_v15, %v1225_v15  ;;  %v5619_v0 = vpack.i.b16 %v1318_v7, %v1318_v7  ;;  %v4483_v41 = vpack.i.b16 %v1229_v22, %v1229_v22  ;;  %2064 = vst [vmem:[#allocation1 + $0x3] ss:$9 sm:$0xff] %v1944_v32 }
  0x6e   : > { %v1948_v3 = vsel %vm5213_vm1, %v1628_v4, %v1820_v62  ;;  %v1502_v25 = vunpack.i.h.s16 %v1409_v57  ;;  %v5623_v21 = vpack.i.b16 %v1320_v28, %v1320_v28  ;;  %v4484_v26 = vpack.i.b16 %v1232_v61, %v1232_v61  ;;  %2066 = vst [vmem:[#allocation1 + $0x4] ss:$9 sm:$0xff] %v1945_v37 }
  0x6f   : > { %v1504_v29 = vunpack.i.h.s16 %v1413_v46  ;;  %v1506_v31 = vunpack.i.h.s16 %v1416_v54  ;;  %v5628_v40 = vpack.i.b16 %v1322_v42, %v1322_v42  ;;  %vm265_vm3 = vcmp.eq.s32.totalorder %v5614_v19, 0  ;;  %2068 = vst [vmem:[#allocation1 + $0x5] ss:$9 sm:$0xff] %v1946_v16 }
  0x70   : > { %v1508_v36 = vunpack.i.h.s16 %v5611_v12  ;;  %v4485_v1 = vpack.i.b16 %v5589_v23, %v5589_v23  ;;  %v5634_v14 = vpack.i.b16 %v1324_v49, %v1324_v49  ;;  %vm273_vm4 = vmpackc.low %vm265_vm3, %vm265_vm3  ;;  %vm289_vm5 = vcmp.eq.s32.totalorder %v5614_v19, 1  ;;  %2070 = vst [vmem:[#allocation1 + $0x6] ss:$9 sm:$0xff] %v1947_v53 }
  0x71   : > { %v5637_v11 = vperm.slane %v4482_v55, 0  ;;  %v1630_v30 = vperm.slane %v5619_v0, 0  ;;  %v5640_v15 = vperm.slane %v4483_v41, 0  ;;  %v281_v22 = vsel %vm273_vm4, %v5626_v33, 0  ;;  %vm297_vm6 = vmpackc.low %vm289_vm5, %vm289_vm5  ;;  %2072 = vst [vmem:[#allocation1 + $0x7] ss:$9 sm:$0xff] %v1948_v3 }
  0x72   : > { %v1632_v4 = vperm.slane %v5623_v21, 0  ;;  %v5644_v6 = vperm.slane %v4484_v26, 0  ;;  %v305_v5 = vsel %vm297_vm6, %v5626_v33, 0  ;;  %v321_v61 = vrot.slane %v281_v22, 3 }
  0x73   : > { %v1634_v13 = vperm.slane %v5628_v40, 0  ;;  %v4514_v23 = vpack.i.b16 %v1409_v57, %v1409_v57  ;;  %v1758_v17 = vpack.i.b16 %v1502_v25, %v1502_v25  ;;  %v4515_v10 = vpack.i.b16 %v1413_v46, %v1413_v46 }
  0x74   : > { %v1760_v62 = vpack.i.b16 %v1504_v29, %v1504_v29  ;;  %v4516_v52 = vpack.i.b16 %v1416_v54, %v1416_v54  ;;  %v373_v7 = vsel %vm331_vm10, %v281_v22, %v321_v61  ;;  %v509_v59 = vrot.slane %v305_v5, 3 }
  0x75   : > { %v5649_v18 = vperm.slane %v4485_v1, 0  ;;  %v1762_v60 = vpack.i.b16 %v1506_v31, %v1506_v31  ;;  %v4517_v32 = vpack.i.b16 %v5611_v12, %v5611_v12  ;;  %v376_v28 = vsel %vm335_vm11, %v281_v22, %v321_v61 }
  0x76   : > { %v1764_v42 = vpack.i.b16 %v1508_v36, %v1508_v36  ;;  %v371_v37 = vsel %vm326_vm14, %v281_v22, %v321_v61  ;;  %v375_v16 = vrot.slane %v373_v7, 1  ;;  %v379_v57 = vsel %vm339_vm12, %v281_v22, %v321_v61 }
  0x77   : > { %v1636_v46 = vperm.slane %v5634_v14, 0  ;;  %v5657_v54 = vperm.slane %v4514_v23, 0  ;;  %v1822_v49 = vperm.slane %v1758_v17, 0  ;;  %v5659_v53 = vperm.slane %v4515_v10, 0 }
  0x78   : > { %v1824_v55 = vperm.slane %v1760_v62, 0  ;;  %v5661_v0 = vperm.slane %v4516_v52, 0  ;;  %v378_v41 = vrot.slane %v376_v28, 2  ;;  %v557_v12 = vsel %vm331_vm10, %v305_v5, %v509_v59  ;;  %v5665_v29 = vld [vmem:[#allocation1] sm:$0xff] }
  0x79   : > { %v1826_v3 = vperm.slane %v1762_v60, 0  ;;  %v381_v25 = vrot.slane %v379_v57, 3  ;;  %v459_v21 = vunpack.i.h.s16 %v371_v37  ;;  %v560_v26 = vsel %vm335_vm11, %v305_v5, %v509_v59  ;;  %2075 = vst [vmem:[#allocation1] ss:$9 sm:$0xff] %v1085_v38 }
  0x7a   : > { %v5667_v31 = vperm.slane %v4517_v32, 0  ;;  %v1828_v40 = vperm.slane %v1764_v42, 0  ;;  %v461_v36 = vunpack.i.h.s16 %v375_v16  ;;  %v563_v1 = vsel %vm339_vm12, %v305_v5, %v509_v59  ;;  %2077 = vst [vmem:[#allocation1 + $0x1] ss:$9 sm:$0xff] %v5532_v35 }
  0x7b   : > { %v1949_v14 = vsel %vm5213_vm1, %v5637_v11, %v5657_v54  ;;  %v5681_v22 = vsel %vm5213_vm1, %v1630_v30, %v1822_v49  ;;  %v555_v61 = vsel %vm326_vm14, %v305_v5, %v509_v59  ;;  %v559_v23 = vrot.slane %v557_v12, 1  ;;  %2079 = vst [vmem:[#allocation1 + $0x2] ss:$9 sm:$0xff] %v1087_v9 }
  0x7c   : > { %v1951_v56 = vsel %vm5213_vm1, %v5640_v15, %v5659_v53  ;;  %v5691_v27 = vsel %vm5213_vm1, %v1632_v4, %v1824_v55  ;;  %v463_v38 = vunpack.i.h.s16 %v378_v41  ;;  %v562_v17 = vrot.slane %v560_v26, 2  ;;  %2081 = vst [vmem:[#allocation1 + $0x3] ss:$9 sm:$0xff] %v5542_v8 }
  0x7d   : > { %v465_v30 = vunpack.i.h.s16 %v381_v25  ;;  %v565_v5 = vrot.slane %v563_v1, 3  ;;  %v4422_v35 = vpack.i.b16 %v371_v37, %v371_v37  ;;  %v5698_v10 = vpack.i.b16 %v459_v21, %v459_v21  ;;  %2083 = vst [vmem:[#allocation1 + $0x4] ss:$9 sm:$0xff] %v1089_v39 }
  0x7e   : > { %v1953_v4 = vsel %vm5213_vm1, %v5644_v6, %v5661_v0  ;;  %v643_v62 = vunpack.i.h.s16 %v555_v61  ;;  %v4423_v52 = vpack.i.b16 %v375_v16, %v375_v16  ;;  %v5705_v7 = vpack.i.b16 %v461_v36, %v461_v36  ;;  %2085 = vst [vmem:[#allocation1 + $0x5] ss:$9 sm:$0xff] %v5555_v2  ;;  %v5738_v2 = vld [vmem:[%s5101_s8 + $0x20] sm:$0xff] }
  0x7f   : > { %v5714_v58 = vsel %vm5213_vm1, %v1634_v13, %v1826_v3  ;;  %v1955_v45 = vsel %vm5213_vm1, %v5649_v18, %v5667_v31  ;;  %v5722_v9 = vsel %vm5213_vm1, %v1636_v46, %v1828_v40  ;;  %v645_v8 = vunpack.i.h.s16 %v559_v23  ;;  %2087 = vst [vmem:[#allocation1 + $0x6] ss:$9 sm:$0xff] %v1091_v34  ;;  %v5745_v46 = vld [vmem:[%s5116_s16 + $0x10] sm:$0xf] }
  0x80   : > { %v647_v63 = vunpack.i.h.s16 %v562_v17  ;;  %v4424_v24 = vpack.i.b16 %v378_v41, %v378_v41  ;;  %v5725_v39 = vpack.i.b16 %v463_v38, %v463_v38  ;;  %v4425_v59 = vpack.i.b16 %v381_v25, %v381_v25  ;;  %2089 = vst [vmem:[#allocation1 + $0x7] ss:$9 sm:$0xff] %v5570_v50 }
  0x81   : > { %v649_v13 = vunpack.i.h.s16 %v565_v5  ;;  %v5732_v60 = vpack.i.b16 %v465_v30, %v465_v30  ;;  %v5734_v32 = vperm.slane %v4422_v35, 0  ;;  %v771_v28 = vperm.slane %v5698_v10, 0 }
  0x82   : > { %v5741_v42 = vperm.slane %v4423_v52, 0  ;;  %v773_v37 = vperm.slane %v5705_v7, 0  ;;  %v4454_v16 = vpack.i.b16 %v555_v61, %v555_v61  ;;  %v899_v57 = vpack.i.b16 %v643_v62, %v643_v62 }
  0x83   : > { %v4455_v51 = vpack.i.b16 %v559_v23, %v559_v23  ;;  %v901_v20 = vpack.i.b16 %v645_v8, %v645_v8  ;;  %vm266_vm7 = vcmp.eq.s32.totalorder %v5738_v2, 0  ;;  %vm290_vm8 = vcmp.eq.s32.totalorder %v5738_v2, 1 }
  0x84   : > { %v5749_v34 = vperm.slane %v4424_v24, 0  ;;  %v775_v49 = vperm.slane %v5725_v39, 0  ;;  %v5752_v55 = vperm.slane %v4425_v59, 0  ;;  %v4456_v50 = vpack.i.b16 %v562_v17, %v562_v17  ;;  %vm274_vm9 = vmpackc.low %vm266_vm7, %vm266_vm7 }
  0x85   : > { %v777_v41 = vperm.slane %v5732_v60, 0  ;;  %v903_v12 = vpack.i.b16 %v647_v63, %v647_v63  ;;  %v4457_v3 = vpack.i.b16 %v565_v5, %v565_v5  ;;  %v282_v25 = vsel %vm274_vm9, %v5745_v46, 0  ;;  %vm298_vm13 = vmpackc.low %vm290_vm8, %vm290_vm8 }
  0x86   : > { %v5756_v21 = vpack.i.b16 %v649_v13, %v649_v13  ;;  %v5758_v26 = vperm.slane %v4454_v16, 0  ;;  %v306_v40 = vsel %vm298_vm13, %v5745_v46, 0  ;;  %v322_v36 = vrot.slane %v282_v25, 3 }
  0x87   : > { %v963_v1 = vperm.slane %v899_v57, 0  ;;  %v5761_v61 = vperm.slane %v4455_v51, 0  ;;  %v965_v23 = vperm.slane %v901_v20, 0  ;;  %v510_v38 = vrot.slane %v306_v40, 3  ;;  %v2090_v10 = vld [vmem:[#allocation1] sm:$0xff] }
  0x88   : > { %v5763_v17 = vperm.slane %v4456_v50, 0  ;;  %v386_v30 = vsel %vm331_vm10, %v282_v25, %v322_v36  ;;  %v389_v5 = vsel %vm335_vm11, %v282_v25, %v322_v36  ;;  %v392_v35 = vsel %vm339_vm12, %v282_v25, %v322_v36  ;;  %2092 = vst [vmem:[#allocation1] ss:$9 sm:$0xff] %v1949_v14 }
  0x89   : > { %v967_v62 = vperm.slane %v903_v12, 0  ;;  %v5768_v52 = vperm.slane %v4457_v3, 0  ;;  %v384_v7 = vsel %vm326_vm14, %v282_v25, %v322_v36  ;;  %v388_v8 = vrot.slane %v386_v30, 1  ;;  %2094 = vst [vmem:[#allocation1 + $0x1] ss:$9 sm:$0xff] %v5681_v22 }
  0x8a   : > { %v2302_v63 = vshrl.u32 %v2090_v10, 16  ;;  %v2305_v24 = vshll.u32 %v2090_v10, 16  ;;  %v969_v39 = vperm.slane %v5756_v21, 0  ;;  %v1093_v59 = vsel %vm5213_vm1, %v5734_v32, %v5758_v26  ;;  %2096 = vst [vmem:[#allocation1 + $0x2] ss:$9 sm:$0xff] %v1951_v56 }
  0x8b   : > { %v5784_v13 = vsel %vm5213_vm1, %v771_v28, %v963_v1  ;;  %v391_v16 = vrot.slane %v389_v5, 2  ;;  %v394_v57 = vrot.slane %v392_v35, 3  ;;  %v570_v51 = vsel %vm331_vm10, %v306_v40, %v510_v38  ;;  %2098 = vst [vmem:[#allocation1 + $0x3] ss:$9 sm:$0xff] %v5691_v27 }
  0x8c   : > { %v5787_v20 = vrot.slane %v2302_v63, 7  ;;  %v1095_v11 = vsel %vm5213_vm1, %v5741_v42, %v5761_v61  ;;  %v467_v54 = vunpack.i.h.s16 %v384_v7  ;;  %v573_v14 = vsel %vm335_vm11, %v306_v40, %v510_v38  ;;  %2100 = vst [vmem:[#allocation1 + $0x4] ss:$9 sm:$0xff] %v1953_v4 }
  0x8d   : > { %v5802_v22 = vsel %vm5213_vm1, %v773_v37, %v965_v23  ;;  %v1097_v15 = vsel %vm5213_vm1, %v5749_v34, %v5763_v17  ;;  %v469_v53 = vunpack.i.h.s16 %v388_v8  ;;  %v576_v56 = vsel %vm339_vm12, %v306_v40, %v510_v38  ;;  %2102 = vst [vmem:[#allocation1 + $0x5] ss:$9 sm:$0xff] %v5714_v58 }
  0x8e   : > { %v2307_v28 = vor.u32 %v2305_v24, %v5787_v20  ;;  %v5817_v27 = vsel %vm5213_vm1, %v775_v49, %v967_v62  ;;  %v572_v37 = vrot.slane %v570_v51, 1  ;;  %vm1136_vm15 = vcmp.eq.s32.totalorder %v5614_v19, 2  ;;  %2104 = vst [vmem:[#allocation1 + $0x6] ss:$9 sm:$0xff] %v1955_v45 }
  0x8f   : > { %v471_v50 = vunpack.i.h.s16 %v391_v16  ;;  %v473_v12 = vunpack.i.h.s16 %v394_v57  ;;  %v568_v3 = vsel %vm326_vm14, %v306_v40, %v510_v38  ;;  %v5822_v25 = vrot.slane %v573_v14, 2  ;;  %2106 = vst [vmem:[#allocation1 + $0x7] ss:$9 sm:$0xff] %v5722_v9  ;;  %vm1144_vm0 = vmpackc.low %vm1136_vm15, %vm1136_vm15 }
  0x90   : > { %v5826_v21 = vsel %vm5213_vm1, 0, %v2307_v28  ;;  %v5833_v6 = vrot.slane %v576_v56, 3  ;;  %v4426_v0 = vpack.i.b16 %v384_v7, %v384_v7  ;;  %v5835_v4 = vpack.i.b16 %v467_v54, %v467_v54 }
  0x91   : > { %7713 = vst [vmem:[#allocation2_spill] sm:$0xff] %v5826_v21  ;;  %3025 = vmatmul.bf16.vlgmr.msra.gmra.mxu1 %v5826_v21  ;;  %v4427_v58 = vpack.i.b16 %v388_v8, %v388_v8  ;;  %v5839_v49 = vpack.i.b16 %v469_v53, %v469_v53  ;;  %v4428_v40 = vpack.i.b16 %v391_v16, %v391_v16  ;;  %v651_v31 = vunpack.i.h.s16 %v568_v3 }
  0x92   : > { %v1099_v18 = vsel %vm5213_vm1, %v5752_v55, %v5768_v52  ;;  %v653_v45 = vunpack.i.h.s16 %v572_v37  ;;  %vm1160_vm2 = vcmp.eq.s32.totalorder %v5614_v19, 3  ;;  %v5853_v9 = vsel %vm5213_vm1, %v777_v41, %v969_v39 }
  0x93   : > { %v5855_v36 = vpack.i.b16 %v471_v50, %v471_v50  ;;  %v4429_v1 = vpack.i.b16 %v394_v57, %v394_v57  ;;  %v5857_v23 = vpack.i.b16 %v473_v12, %v473_v12  ;;  %v655_v38 = vunpack.i.h.s16 %v5822_v25  ;;  %vm1168_vm3 = vmpackc.low %vm1160_vm2, %vm1160_vm2 }
  0x94   : > { %v657_v30 = vunpack.i.h.s16 %v5833_v6  ;;  %v5861_v5 = vperm.slane %v4426_v0, 0  ;;  %v1152_v35 = vsel %vm1144_vm0, %v5626_v33, 0  ;;  %v5865_v60 = vperm.slane %v4427_v58, 0 }
  0x95   : > { %v5868_v10 = vperm.slane %v4428_v40, 0  ;;  %v4458_v62 = vpack.i.b16 %v568_v3, %v568_v3  ;;  %v5870_v7 = vpack.i.b16 %v651_v31, %v651_v31  ;;  %v4459_v8 = vpack.i.b16 %v572_v37, %v572_v37 }
  0x96   : > { %v5872_v63 = vpack.i.b16 %v653_v45, %v653_v45  ;;  %v5875_v39 = vperm.slane %v4429_v1, 0  ;;  %v4460_v57 = vpack.i.b16 %v5822_v25, %v5822_v25  ;;  %v2107_v51 = vld [vmem:[#allocation1] sm:$0xff]  ;;  %v5880_v54 = vpack.i.b16 %v655_v38, %v655_v38 }
  0x97   : > { %v5884_v53 = vpack.i.b16 %v657_v30, %v657_v30  ;;  %v1176_v56 = vsel %vm1168_vm3, %v5626_v33, 0  ;;  %v2308_v28 = vshrl.u32 %v2107_v51, 16  ;;  %v2311_v37 = vshll.u32 %v2107_v51, 16  ;;  %2109 = vst [vmem:[#allocation1] ss:$9 sm:$0xff] %v1093_v59 }
  0x98   : > { %v1192_v50 = vrot.slane %v1152_v35, 3  ;;  %v1376_v12 = vrot.slane %v1176_v56, 3  ;;  %2111 = vst [vmem:[#allocation1 + $0x1] ss:$9 sm:$0xff] %v5784_v13  ;;  %v5893_v3 = vperm.slane %v4458_v62, 0  ;;  %v5896_v58 = vperm.slane %v4459_v8, 0 }
  0x99   : > { %v5899_v40 = vrot.slane %v2308_v28, 7  ;;  %2113 = vst [vmem:[#allocation1 + $0x2] ss:$9 sm:$0xff] %v1095_v11  ;;  %vm1137_vm4 = vcmp.eq.s32.totalorder %v5738_v2, 2  ;;  %vm1161_vm5 = vcmp.eq.s32.totalorder %v5738_v2, 3  ;;  %v5962_v2 = vperm.slane %v4460_v57, 0 }
  0x9a   : > { %v1238_v32 = vsel %vm326_vm14, %v1152_v35, %v1192_v50  ;;  %v1240_v26 = vsel %vm331_vm10, %v1152_v35, %v1192_v50  ;;  %v1243_v59 = vsel %vm335_vm11, %v1152_v35, %v1192_v50  ;;  %2115 = vst [vmem:[#allocation1 + $0x3] ss:$9 sm:$0xff] %v5802_v22  ;;  %v1246_v45 = vsel %vm339_vm12, %v1152_v35, %v1192_v50  ;;  %vm5938_vm6 = vmpackc.low %vm1137_vm4, %vm1137_vm4 }
  0x9b   : > { %v1242_v13 = vrot.slane %v1240_v26, 1  ;;  %v1245_v31 = vrot.slane %v1243_v59, 2  ;;  %v1326_v1 = vunpack.i.h.s16 %v1238_v32  ;;  %v2313_v38 = vor.u32 %v2311_v37, %v5899_v40  ;;  %2117 = vst [vmem:[#allocation1 + $0x4] ss:$9 sm:$0xff] %v1097_v15  ;;  %vm5947_vm7 = vmpackc.low %vm1161_vm5, %vm1161_vm5 }
  0x9c   : > { %v1248_v42 = vrot.slane %v1246_v45, 3  ;;  %v1422_v61 = vsel %vm326_vm14, %v1176_v56, %v1376_v12  ;;  %v1424_v11 = vsel %vm331_vm10, %v1176_v56, %v1376_v12  ;;  %2119 = vst [vmem:[#allocation1 + $0x5] ss:$9 sm:$0xff] %v5817_v27  ;;  %v1427_v62 = vsel %vm335_vm11, %v1176_v56, %v1376_v12 }
  0x9d   : > { %v1328_v22 = vunpack.i.h.s16 %v1242_v13  ;;  %v1330_v30 = vunpack.i.h.s16 %v1245_v31  ;;  %v1426_v35 = vrot.slane %v1424_v11, 1  ;;  %v5925_v34 = vsel %vm5213_vm1, 0, %v2313_v38  ;;  %2121 = vst [vmem:[#allocation1 + $0x6] ss:$9 sm:$0xff] %v1099_v18 }
  0x9e   : > { %7714 = vst [vmem:[#allocation4_spill] sm:$0xff] %v5925_v34  ;;  %v1332_v17 = vunpack.i.h.s16 %v1248_v42  ;;  %v1429_v15 = vrot.slane %v1427_v62, 2  ;;  %v1430_v27 = vsel %vm339_vm12, %v1176_v56, %v1376_v12  ;;  %v1510_v51 = vunpack.i.h.s16 %v1422_v61 }
  0x9f   : > { %2123 = vst [vmem:[#allocation1 + $0x7] ss:$9 sm:$0xff] %v5853_v9  ;;  %v1432_v8 = vrot.slane %v1430_v27, 3  ;;  %v1512_v28 = vunpack.i.h.s16 %v1426_v35  ;;  %v4486_v37 = vpack.i.b16 %v1238_v32, %v1238_v32  ;;  %v1574_v26 = vpack.i.b16 %v1326_v1, %v1326_v1 }
  0xa0   : > { %v1514_v50 = vunpack.i.h.s16 %v1429_v15  ;;  %v4487_v59 = vpack.i.b16 %v1242_v13, %v1242_v13  ;;  %v1576_v45 = vpack.i.b16 %v1328_v22, %v1328_v22  ;;  %v4488_v11 = vpack.i.b16 %v1245_v31, %v1245_v31 }
  0xa1   : > { %3030 = vmatmul.bf16.gmra.mxu1 %v5925_v34  ;;  %v1516_v38 = vunpack.i.h.s16 %v1432_v8  ;;  %v1578_v55 = vpack.i.b16 %v1330_v30, %v1330_v30  ;;  %v4489_v52 = vpack.i.b16 %v1248_v42, %v1248_v42  ;;  %v1580_v18 = vpack.i.b16 %v1332_v17, %v1332_v17 }
  0xa2   : > { %v1637_v62 = vperm.slane %v4486_v37, 0  ;;  %v1638_v16 = vperm.slane %v1574_v26, 0  ;;  %v1639_v56 = vperm.slane %v4487_v59, 0  ;;  %v1640_v12 = vperm.slane %v1576_v45, 0 }
  0xa3   : > { %v1641_v9 = vperm.slane %v4488_v11, 0  ;;  %v1642_v27 = vperm.slane %v1578_v55, 0  ;;  %v1643_v24 = vperm.slane %v4489_v52, 0  ;;  %v1644_v41 = vperm.slane %v1580_v18, 0  ;;  %v5973_v55 = vld [vmem:[%s5101_s8 + $0x28] sm:$0xff] }
  0xa4   : > { %v4518_v32 = vpack.i.b16 %v1422_v61, %v1422_v61  ;;  %v1766_v33 = vpack.i.b16 %v1510_v51, %v1510_v51  ;;  %v4519_v19 = vpack.i.b16 %v1426_v35, %v1426_v35  ;;  %v1768_v0 = vpack.i.b16 %v1512_v28, %v1512_v28 }
  0xa5   : > { %v4520_v1 = vpack.i.b16 %v1429_v15, %v1429_v15  ;;  %v1770_v13 = vpack.i.b16 %v1514_v50, %v1514_v50  ;;  %v4521_v22 = vpack.i.b16 %v1432_v8, %v1432_v8  ;;  %v1772_v31 = vpack.i.b16 %v1516_v38, %v1516_v38 }
  0xa6   : > { %v2124_v14 = vld [vmem:[#allocation1] sm:$0xff]  ;;  %v1829_v30 = vperm.slane %v4518_v32, 0  ;;  %v1830_v42 = vperm.slane %v1766_v33, 0  ;;  %v1831_v17 = vperm.slane %v4519_v19, 0  ;;  %v1832_v59 = vperm.slane %v1768_v0, 0 }
  0xa7   : > { %v2314_v37 = vshrl.u32 %v2124_v14, 16  ;;  %v2317_v26 = vshll.u32 %v2124_v14, 16  ;;  %v1833_v45 = vperm.slane %v4520_v1, 0  ;;  %v1834_v35 = vperm.slane %v1770_v13, 0 }
  0xa8   : > { %v1835_v15 = vperm.slane %v4521_v22, 0  ;;  %v1836_v8 = vperm.slane %v1772_v31, 0  ;;  %v1957_v51 = vsel %vm5213_vm1, %v1637_v62, %v1829_v30  ;;  %v1958_v0 = vsel %vm5213_vm1, %v1638_v16, %v1830_v42  ;;  %v4869_v31 = vld [vmem:[%s7622_s2 + $0x130] sm:$0xff] }
  0xa9   : > { %v5951_v14 = vrot.slane %v2314_v37, 7  ;;  %v1959_v33 = vsel %vm5213_vm1, %v1639_v56, %v1831_v17  ;;  %v1960_v28 = vsel %vm5213_vm1, %v1640_v12, %v1832_v59  ;;  %2126 = vst [vmem:[#allocation1] ss:$9 sm:$0xff] %v1957_v51  ;;  %v975_v50 = vperm.slane %v5880_v54, 0 }
  0xaa   : > { %v7720_v38 = vpack.i.b16 %v5833_v6, %v5833_v6  ;;  %v1961_v16 = vsel %vm5213_vm1, %v1641_v9, %v1833_v45  ;;  %2128 = vst [vmem:[#allocation1 + $0x1] ss:$9 sm:$0xff] %v1958_v0  ;;  %v1962_v25 = vsel %vm5213_vm1, %v1642_v27, %v1834_v35  ;;  %v1153_v57 = vsel %vm5938_vm6, %v5745_v46, 0  ;;  %v4868_v0 = vld [vmem:[%s7622_s2 + $0x128] sm:$0xff] }
  0xab   : > { %7719 = vst [vmem:[#allocation6_spill] sm:$0xff] %v5951_v14  ;;  %v2319_v52 = vor.u32 %v2317_v26, %v5951_v14  ;;  %v1177_v6 = vsel %vm5947_vm7, %v5745_v46, 0  ;;  %v1101_v54 = vsel %vm5213_vm1, %v5861_v5, %v5893_v3  ;;  %v1963_v18 = vsel %vm5213_vm1, %v1643_v24, %v1835_v15  ;;  %v4870_v46 = vld [vmem:[%s7622_s2 + $0x138] sm:$0xff] }
  0xac   : > { %v5968_v11 = vperm.slane %v7720_v38, 0  ;;  %2130 = vst [vmem:[#allocation1 + $0x2] ss:$9 sm:$0xff] %v1959_v33  ;;  %v1193_v62 = vrot.slane %v1153_v57, 3  ;;  %v1377_v56 = vrot.slane %v1177_v6, 3  ;;  %v1964_v9 = vsel %vm5213_vm1, %v1644_v41, %v1836_v8  ;;  %3086 = vmatpush.bf16.msrb.mxu1 %v4870_v46 }
  0xad   : > { %2132 = vst [vmem:[#allocation1 + $0x3] ss:$9 sm:$0xff] %v1960_v28  ;;  %v5992_v12 = vsel %vm5213_vm1, 0, %v2319_v52  ;;  %vm267_vm8 = vcmp.eq.s32.totalorder %v5973_v55, 0  ;;  %vm291_vm9 = vcmp.eq.s32.totalorder %v5973_v55, 1  ;;  %v7722_v41 = vperm.slane %v5870_v7, 0 }
  0xae   : > { %7721 = vst [vmem:[#allocation3_spill] sm:$0xff] %v5992_v12  ;;  %v1251_v24 = vsel %vm326_vm14, %v1153_v57, %v1193_v62  ;;  %v1253_v27 = vsel %vm331_vm10, %v1153_v57, %v1193_v62  ;;  %v1256_v32 = vsel %vm335_vm11, %v1153_v57, %v1193_v62  ;;  %v1259_v1 = vsel %vm339_vm12, %v1153_v57, %v1193_v62  ;;  %v6032_v8 = vld [vmem:[%s5116_s16 + $0x14] sm:$0xf]  ;;  %vm275_vm13 = vmpackc.low %vm267_vm8, %vm267_vm8 }
  0xaf   : > { %2134 = vst [vmem:[#allocation1 + $0x4] ss:$9 sm:$0xff] %v1961_v16  ;;  %v7723_v13 = vperm.slane %v5835_v4, 0  ;;  %v1255_v30 = vrot.slane %v1253_v27, 1  ;;  %v1258_v42 = vrot.slane %v1256_v32, 2  ;;  %v6014_v17 = vrot.slane %v1259_v1, 3  ;;  %vm299_vm15 = vmpackc.low %vm291_vm9, %vm291_vm9 }
  0xb0   : > { %2136 = vst [vmem:[#allocation1 + $0x5] ss:$9 sm:$0xff] %v1962_v25  ;;  %v977_v7 = vperm.slane %v5884_v53, 0  ;;  %v1103_v4 = vsel %vm5213_vm1, %v5865_v60, %v5896_v58  ;;  %v1437_v37 = vsel %vm331_vm10, %v1177_v6, %v1377_v56  ;;  %v1440_v26 = vsel %vm335_vm11, %v1177_v6, %v1377_v56  ;;  %3087 = vmatpush.bf16.msrb.mxu1 %v4869_v31 }
  0xb1   : > { %v1102_v22 = vsel %vm5213_vm1, %v7723_v13, %v7722_v41  ;;  %2138 = vst [vmem:[#allocation1 + $0x6] ss:$9 sm:$0xff] %v1963_v18  ;;  %3035 = vmatmul.bf16.gmra.mxu1 %v5992_v12  ;;  %v7724_v59 = vperm.slane %v5872_v63, 0  ;;  %v7725_v45 = vperm.slane %v5839_v49, 0  ;;  %v1334_v35 = vunpack.i.h.s16 %v1251_v24 }
  0xb2   : > { %2140 = vst [vmem:[#allocation1 + $0x7] ss:$9 sm:$0xff] %v1964_v9  ;;  %v1435_v53 = vsel %vm326_vm14, %v1177_v6, %v1377_v56  ;;  %v1439_v15 = vrot.slane %v1437_v37, 1  ;;  %v1105_v60 = vsel %vm5213_vm1, %v5868_v10, %v5962_v2  ;;  %v1336_v63 = vunpack.i.h.s16 %v1255_v30 }
  0xb3   : > { %v1104_v61 = vsel %vm5213_vm1, %v7725_v45, %v7724_v59  ;;  %v1442_v49 = vrot.slane %v1440_v26, 2  ;;  %v1443_v58 = vsel %vm339_vm12, %v1177_v6, %v1377_v56  ;;  %v7726_v51 = vperm.slane %v5855_v36, 0 }
  0xb4   : > { %v1338_v33 = vunpack.i.h.s16 %v1258_v42  ;;  %v1340_v10 = vunpack.i.h.s16 %v6014_v17  ;;  %v1445_v28 = vrot.slane %v1443_v58, 3  ;;  %v1107_v2 = vsel %vm5213_vm1, %v5875_v39, %v5968_v11  ;;  %3088 = vmatpush.bf16.msrb.mxu1 %v4868_v0  ;;  %v4866_v0 = vld [vmem:[%s7622_s2 + $0x118] sm:$0xff] }
  0xb5   : > { %v1106_v19 = vsel %vm5213_vm1, %v7726_v51, %v975_v50  ;;  %v7727_v38 = vperm.slane %v5857_v23, 0  ;;  %v1518_v50 = vunpack.i.h.s16 %v1435_v53  ;;  %v6062_v16 = vsel %vm275_vm13, %v6032_v8, 0  ;;  %v4867_v23 = vld [vmem:[%s7622_s2 + $0x120] sm:$0xff] }
  0xb6   : > { %v1520_v52 = vunpack.i.h.s16 %v1439_v15  ;;  %v4490_v25 = vpack.i.b16 %v1251_v24, %v1251_v24  ;;  %v1582_v57 = vpack.i.b16 %v1334_v35, %v1334_v35  ;;  %v6065_v6 = vsel %vm299_vm15, %v6032_v8, 0 }
  0xb7   : > { %v1108_v36 = vsel %vm5213_vm1, %v7727_v38, %v977_v7  ;;  %v1522_v18 = vunpack.i.h.s16 %v1442_v49  ;;  %v4491_v62 = vpack.i.b16 %v1255_v30, %v1255_v30  ;;  %v6067_v56 = vpack.i.b16 %v1336_v63, %v1336_v63 }
  0xb8   : > { %v4492_v39 = vpack.i.b16 %v1258_v42, %v1258_v42  ;;  %v1524_v9 = vunpack.i.h.s16 %v1445_v28  ;;  %v6072_v46 = vpack.i.b16 %v1338_v33, %v1338_v33  ;;  %v4493_v24 = vpack.i.b16 %v6014_v17, %v6014_v17  ;;  %3089 = vmatpush.bf16.msrb.mxu1 %v4867_v23 }
  0xb9   : > { %v2141_v11 = vld [vmem:[#allocation1] sm:$0xff]  ;;  %v6076_v27 = vpack.i.b16 %v1340_v10, %v1340_v10  ;;  %v4522_v41 = vpack.i.b16 %v1435_v53, %v1435_v53  ;;  %v1774_v13 = vpack.i.b16 %v1518_v50, %v1518_v50  ;;  %v6083_v31 = vperm.slane %v4490_v25, 0 }
  0xba   : > { %2143 = vst [vmem:[#allocation1] ss:$9 sm:$0xff] %v1101_v54  ;;  %v2320_v32 = vshrl.u32 %v2141_v11, 16  ;;  %v2323_v1 = vshll.u32 %v2141_v11, 16  ;;  %v1646_v30 = vperm.slane %v1582_v57, 0  ;;  %v4523_v42 = vpack.i.b16 %v1439_v15, %v1439_v15 }
  0xbb   : > { %2145 = vst [vmem:[#allocation1 + $0x1] ss:$9 sm:$0xff] %v1102_v22  ;;  %v1776_v7 = vpack.i.b16 %v1520_v52, %v1520_v52  ;;  %v6087_v37 = vperm.slane %v4491_v62, 0  ;;  %v4524_v26 = vpack.i.b16 %v1442_v49, %v1442_v49  ;;  %v1778_v59 = vpack.i.b16 %v1522_v18, %v1522_v18 }
  0xbc   : > { %2147 = vst [vmem:[#allocation1 + $0x2] ss:$9 sm:$0xff] %v1103_v4  ;;  %v6085_v17 = vrot.slane %v2320_v32, 7  ;;  %v1648_v5 = vperm.slane %v6067_v56, 0  ;;  %v6090_v3 = vperm.slane %v4492_v39, 0  ;;  %v1650_v54 = vperm.slane %v6072_v46, 0  ;;  %3090 = vmatpush.bf16.msrb.mxu1 %v4866_v0 }
  0xbd   : > { %2149 = vst [vmem:[#allocation1 + $0x3] ss:$9 sm:$0xff] %v1104_v61  ;;  %v4525_v22 = vpack.i.b16 %v1445_v28, %v1445_v28  ;;  %v1780_v35 = vpack.i.b16 %v1524_v9, %v1524_v9  ;;  %v1837_v4 = vperm.slane %v4522_v41, 0  ;;  %v1838_v53 = vperm.slane %v1774_v13, 0 }
  0xbe   : > { %7728 = vst [vmem:[#allocation5_spill] sm:$0xff] %v6085_v17  ;;  %v2325_v45 = vor.u32 %v2323_v1, %v6085_v17  ;;  %v6094_v15 = vperm.slane %v4493_v24, 0  ;;  %v1652_v63 = vperm.slane %v6076_v27, 0  ;;  %v1839_v61 = vperm.slane %v4523_v42, 0 }
  0xbf   : > { %2151 = vst [vmem:[#allocation1 + $0x4] ss:$9 sm:$0xff] %v1105_v60  ;;  %v1840_v49 = vperm.slane %v1776_v7, 0  ;;  %v6101_v51 = vperm.slane %v4524_v26, 0  ;;  %v1842_v60 = vperm.slane %v1778_v59, 0  ;;  %v2278_v33 = vshrl.u32 %v5412_v43, 16 }
  0xc0   : > { %2153 = vst [vmem:[#allocation1 + $0x5] ss:$9 sm:$0xff] %v1106_v19  ;;  %v6099_v58 = vsel %vm5213_vm1, 0, %v2325_v45  ;;  %v6106_v19 = vperm.slane %v4525_v22, 0  ;;  %v2281_v10 = vshll.u32 %v5412_v43, 16  ;;  %v323_v28 = vrot.slane %v6062_v16, 3 }
  0xc1   : > { %2155 = vst [vmem:[#allocation1 + $0x6] ss:$9 sm:$0xff] %v1107_v2  ;;  %3040 = vmatmul.bf16.gmra.mxu1 %v6099_v58  ;;  %v1844_v2 = vperm.slane %v1780_v35, 0  ;;  %v1965_v38 = vsel %vm5213_vm1, %v6083_v31, %v1837_v4  ;;  %v1966_v50 = vsel %vm5213_vm1, %v1646_v30, %v1838_v53  ;;  %v1967_v52 = vsel %vm5213_vm1, %v6087_v37, %v1839_v61  ;;  %v4865_v43 = vld [vmem:[%s7622_s2 + $0x110] sm:$0xff] }
  0xc2   : > { %7729 = vst [vmem:[#allocation7_spill] sm:$0xff] %v6099_v58  ;;  %v6124_v25 = vrot.slane %v2278_v33, 7  ;;  %v399_v57 = vsel %vm331_vm10, %v6062_v16, %v323_v28  ;;  %v402_v18 = vsel %vm335_vm11, %v6062_v16, %v323_v28  ;;  %v1968_v62 = vsel %vm5213_vm1, %v1648_v5, %v1840_v49  ;;  %3091 = vmatpush.bf16.msrb.mxu1 %v4865_v43  ;;  %v6169_v7 = vld [vmem:[%s5101_s8 + $0x30] sm:$0xff] }
  0xc3   : > { %2157 = vst [vmem:[#allocation1 + $0x7] ss:$9 sm:$0xff] %v1108_v36  ;;  %v511_v36 = vrot.slane %v6065_v6, 3  ;;  %v1969_v56 = vsel %vm5213_vm1, %v6090_v3, %v6101_v51  ;;  %v6136_v39 = vrot.slane %v399_v57, 1  ;;  %v405_v11 = vsel %vm339_vm12, %v6062_v16, %v323_v28 }
  0xc4   : > { %v2283_v23 = vor.u32 %v2281_v10, %v6124_v25  ;;  %v397_v9 = vsel %vm326_vm14, %v6062_v16, %v323_v28  ;;  %v6143_v46 = vrot.slane %v402_v18, 2  ;;  %v1970_v27 = vsel %vm5213_vm1, %v1650_v54, %v1842_v60  ;;  %v4864_v16 = vld [vmem:[%s7622_s2 + $0x108] sm:$0xff] }
  0xc5   : > { %v583_v24 = vsel %vm331_vm10, %v6065_v6, %v511_v36  ;;  %v6149_v32 = vrot.slane %v405_v11, 3  ;;  %v6153_v1 = vsel %vm326_vm14, %v6065_v6, %v511_v36  ;;  %v586_v41 = vsel %vm335_vm11, %v6065_v6, %v511_v36 }
  0xc6   : > { %v6162_v13 = vsel %vm5213_vm1, 0, %v2283_v23  ;;  %v585_v31 = vrot.slane %v583_v24, 1  ;;  %v6164_v30 = vrot.slane %v586_v41, 2  ;;  %v589_v42 = vsel %vm339_vm12, %v6065_v6, %v511_v36  ;;  %3092 = vmatpush.bf16.msrb.mxu1 %v4864_v16 }
  0xc7   : > { %v1971_v26 = vsel %vm5213_vm1, %v6094_v15, %v6106_v19  ;;  %3005 = vmatmul.bf16.vlgmr.msra.gmra.mxu0 %v6162_v13  ;;  %v475_v59 = vunpack.i.h.s16 %v397_v9  ;;  %v477_v5 = vunpack.i.h.s16 %v6136_v39  ;;  %v591_v3 = vrot.slane %v589_v42, 3  ;;  %v4863_v15 = vld [vmem:[%s7622_s2 + $0x100] sm:$0xff] }
  0xc8   : > { %v1972_v45 = vsel %vm5213_vm1, %v1652_v63, %v1844_v2  ;;  %v479_v6 = vunpack.i.h.s16 %v6143_v46  ;;  %v481_v35 = vunpack.i.h.s16 %v6149_v32  ;;  %v659_v4 = vunpack.i.h.s16 %v6153_v1 }
  0xc9   : > { %vm268_vm0 = vcmp.eq.s32.totalorder %v6169_v7, 0  ;;  %vm292_vm2 = vcmp.eq.s32.totalorder %v6169_v7, 1  ;;  %v661_v63 = vunpack.i.h.s16 %v585_v31  ;;  %v663_v61 = vunpack.i.h.s16 %v6164_v30 }
  0xca   : > { %v2158_v37 = vld [vmem:[#allocation1] sm:$0xff]  ;;  %v4430_v49 = vpack.i.b16 %v397_v9, %v397_v9  ;;  %v665_v51 = vunpack.i.h.s16 %v591_v3  ;;  %v723_v60 = vpack.i.b16 %v475_v59, %v475_v59  ;;  %v4431_v0 = vpack.i.b16 %v6136_v39, %v6136_v39  ;;  %3093 = vmatpush.bf16.msrb.mxu1 %v4863_v15  ;;  %vm6209_vm3 = vmpackc.low %vm268_vm0, %vm268_vm0 }
  0xcb   : > { %v2326_v54 = vshrl.u32 %v2158_v37, 16  ;;  %v2329_v22 = vshll.u32 %v2158_v37, 16  ;;  %2160 = vst [vmem:[#allocation1] ss:$9 sm:$0xff] %v1965_v38  ;;  %v725_v19 = vpack.i.b16 %v477_v5, %v477_v5  ;;  %v4432_v10 = vpack.i.b16 %v6143_v46, %v6143_v46  ;;  %vm300_vm4 = vmpackc.low %vm292_vm2, %vm292_vm2 }
  0xcc   : > { %2162 = vst [vmem:[#allocation1 + $0x1] ss:$9 sm:$0xff] %v1966_v50  ;;  %v727_v28 = vpack.i.b16 %v479_v6, %v479_v6  ;;  %v4433_v2 = vpack.i.b16 %v6149_v32, %v6149_v32  ;;  %v729_v38 = vpack.i.b16 %v481_v35, %v481_v35  ;;  %v4462_v50 = vpack.i.b16 %v6153_v1, %v6153_v1  ;;  %v6214_v1 = vld [vmem:[%s5116_s16 + $0x18] sm:$0xf] }
  0xcd   : > { %v6184_v53 = vrot.slane %v2326_v54, 7  ;;  %2164 = vst [vmem:[#allocation1 + $0x2] ss:$9 sm:$0xff] %v1967_v52  ;;  %v915_v36 = vpack.i.b16 %v659_v4, %v659_v4  ;;  %v4463_v52 = vpack.i.b16 %v585_v31, %v585_v31  ;;  %v917_v57 = vpack.i.b16 %v661_v63, %v661_v63 }
  0xce   : > { %2166 = vst [vmem:[#allocation1 + $0x3] ss:$9 sm:$0xff] %v1968_v62  ;;  %v4464_v18 = vpack.i.b16 %v6164_v30, %v6164_v30  ;;  %v919_v62 = vpack.i.b16 %v663_v61, %v663_v61  ;;  %v787_v39 = vperm.slane %v723_v60, 0  ;;  %v788_v11 = vperm.slane %v4431_v0, 0 }
  0xcf   : > { %7730 = vst [vmem:[#allocation8_spill] sm:$0xff] %v6184_v53  ;;  %v2331_v33 = vor.u32 %v2329_v22, %v6184_v53  ;;  %v4465_v23 = vpack.i.b16 %v591_v3, %v591_v3  ;;  %v789_v46 = vperm.slane %v725_v19, 0  ;;  %v790_v24 = vperm.slane %v4432_v10, 0 }
  0xd0   : > { %2168 = vst [vmem:[#allocation1 + $0x4] ss:$9 sm:$0xff] %v1969_v56  ;;  %v786_v56 = vperm.slane %v4430_v49, 0  ;;  %v978_v32 = vperm.slane %v4462_v50, 0  ;;  %v979_v41 = vperm.slane %v915_v36, 0  ;;  %v980_v16 = vperm.slane %v4463_v52, 0 }
  0xd1   : > { %2170 = vst [vmem:[#allocation1 + $0x5] ss:$9 sm:$0xff] %v1970_v27  ;;  %v6201_v43 = vsel %vm5213_vm1, 0, %v2331_v33  ;;  %v921_v27 = vpack.i.b16 %v665_v51, %v665_v51  ;;  %v981_v31 = vperm.slane %v917_v57, 0  ;;  %v982_v30 = vperm.slane %v4464_v18, 0 }
  0xd2   : > { %7731 = vst [vmem:[#allocation9_spill] sm:$0xff] %v6201_v43  ;;  %3045 = vmatmul.bf16.vlgmr.msra.gmra.mxu2 %v6201_v43  ;;  %v791_v42 = vperm.slane %v727_v28, 0  ;;  %v792_v37 = vperm.slane %v4433_v2, 0  ;;  %vm1138_vm5 = vcmp.eq.s32.totalorder %v5973_v55, 2  ;;  %v793_v59 = vperm.slane %v729_v38, 0 }
  0xd3   : > { %2172 = vst [vmem:[#allocation1 + $0x6] ss:$9 sm:$0xff] %v1971_v26  ;;  %v983_v26 = vperm.slane %v919_v62, 0  ;;  %v984_v5 = vperm.slane %v4465_v23, 0  ;;  %v284_v3 = vsel %vm6209_vm3, %v6214_v1, 0  ;;  %v308_v54 = vsel %vm300_vm4, %v6214_v1, 0  ;;  %vm1146_vm6 = vmpackc.low %vm1138_vm5, %vm1138_vm5 }
  0xd4   : > { %2174 = vst [vmem:[#allocation1 + $0x7] ss:$9 sm:$0xff] %v1972_v45  ;;  %v985_v22 = vperm.slane %v921_v27, 0  ;;  %v1109_v45 = vsel %vm5213_vm1, %v786_v56, %v978_v32  ;;  %v324_v6 = vrot.slane %v284_v3, 3  ;;  %v512_v35 = vrot.slane %v308_v54, 3 }
  0xd5   : > { %v1110_v4 = vsel %vm5213_vm1, %v787_v39, %v979_v41  ;;  %v1111_v15 = vsel %vm5213_vm1, %v788_v11, %v980_v16  ;;  %v1112_v63 = vsel %vm5213_vm1, %v789_v46, %v981_v31  ;;  %v1113_v61 = vsel %vm5213_vm1, %v790_v24, %v982_v30 }
  0xd6   : > { %v1114_v51 = vsel %vm5213_vm1, %v791_v42, %v983_v26  ;;  %v412_v60 = vsel %vm331_vm10, %v284_v3, %v324_v6  ;;  %v415_v0 = vsel %vm335_vm11, %v284_v3, %v324_v6  ;;  %v418_v19 = vsel %vm339_vm12, %v284_v3, %v324_v6 }
  0xd7   : > { %v410_v28 = vsel %vm326_vm14, %v284_v3, %v324_v6  ;;  %v414_v2 = vrot.slane %v412_v60, 1  ;;  %v1115_v38 = vsel %vm5213_vm1, %v792_v37, %v984_v5  ;;  %v417_v50 = vrot.slane %v415_v0, 2 }
  0xd8   : > { %v420_v36 = vrot.slane %v418_v19, 3  ;;  %v596_v52 = vsel %vm331_vm10, %v308_v54, %v512_v35  ;;  %v1116_v18 = vsel %vm5213_vm1, %v793_v59, %v985_v22  ;;  %v6251_v56 = vsel %vm1146_vm6, %v6032_v8, 0 }
  0xd9   : > { %v598_v62 = vrot.slane %v596_v52, 1  ;;  %v483_v39 = vunpack.i.h.s16 %v410_v28  ;;  %v594_v11 = vsel %vm326_vm14, %v308_v54, %v512_v35  ;;  %v599_v23 = vsel %vm335_vm11, %v308_v54, %v512_v35 }
  0xda   : > { %v602_v9 = vsel %vm339_vm12, %v308_v54, %v512_v35  ;;  %v485_v24 = vunpack.i.h.s16 %v414_v2  ;;  %v601_v27 = vrot.slane %v599_v23, 2  ;;  %v487_v41 = vunpack.i.h.s16 %v417_v50 }
  0xdb   : > { %v2175_v49 = vld [vmem:[#allocation1] sm:$0xff]  ;;  %v604_v32 = vrot.slane %v602_v9, 3  ;;  %v489_v16 = vunpack.i.h.s16 %v420_v36  ;;  %v667_v30 = vunpack.i.h.s16 %v594_v11  ;;  %v669_v42 = vunpack.i.h.s16 %v598_v62 }
  0xdc   : > { %v2332_v33 = vshrl.u32 %v2175_v49, 16  ;;  %v2335_v10 = vshll.u32 %v2175_v49, 16  ;;  %2177 = vst [vmem:[#allocation1] ss:$9 sm:$0xff] %v1109_v45  ;;  %vm1162_vm7 = vcmp.eq.s32.totalorder %v5973_v55, 3  ;;  %v671_v37 = vunpack.i.h.s16 %v601_v27 }
  0xdd   : > { %2179 = vst [vmem:[#allocation1 + $0x1] ss:$9 sm:$0xff] %v1110_v4  ;;  %v4434_v26 = vpack.i.b16 %v410_v28, %v410_v28  ;;  %v6262_v59 = vpack.i.b16 %v483_v39, %v483_v39  ;;  %v1194_v5 = vrot.slane %v6251_v56, 3  ;;  %v673_v3 = vunpack.i.h.s16 %v604_v32  ;;  %vm1170_vm8 = vmpackc.low %vm1162_vm7, %vm1162_vm7 }
  0xde   : > { %v6246_v57 = vrot.slane %v2332_v33, 7  ;;  %2181 = vst [vmem:[#allocation1 + $0x2] ss:$9 sm:$0xff] %v1111_v15  ;;  %v4435_v54 = vpack.i.b16 %v414_v2, %v414_v2  ;;  %v6266_v22 = vpack.i.b16 %v485_v24, %v485_v24  ;;  %v4436_v45 = vpack.i.b16 %v417_v50, %v417_v50 }
  0xdf   : > { %2183 = vst [vmem:[#allocation1 + $0x3] ss:$9 sm:$0xff] %v1112_v63  ;;  %v6268_v6 = vpack.i.b16 %v487_v41, %v487_v41  ;;  %v4437_v35 = vpack.i.b16 %v420_v36, %v420_v36  ;;  %v6270_v4 = vpack.i.b16 %v489_v16, %v489_v16  ;;  %v4466_v15 = vpack.i.b16 %v594_v11, %v594_v11 }
  0xe0   : > { %7734 = vst [vmem:[#allocation10_spill] sm:$0xff] %v6246_v57  ;;  %v2337_v46 = vor.u32 %v2335_v10, %v6246_v57  ;;  %v923_v63 = vpack.i.b16 %v667_v30, %v667_v30  ;;  %v6272_v49 = vpack.i.b16 %v669_v42, %v669_v42  ;;  %v6274_v60 = vperm.slane %v4434_v26, 0 }
  0xe1   : > { %2185 = vst [vmem:[#allocation1 + $0x4] ss:$9 sm:$0xff] %v1113_v61  ;;  %v4467_v61 = vpack.i.b16 %v598_v62, %v598_v62  ;;  %v795_v0 = vperm.slane %v6262_v59, 0  ;;  %v6277_v19 = vpack.i.b16 %v671_v37, %v671_v37  ;;  %v4469_v33 = vpack.i.b16 %v604_v32, %v604_v32 }
  0xe2   : > { %2187 = vst [vmem:[#allocation1 + $0x5] ss:$9 sm:$0xff] %v1114_v51  ;;  %v6259_v31 = vsel %vm5213_vm1, 0, %v2337_v46  ;;  %v4468_v51 = vpack.i.b16 %v601_v27, %v601_v27  ;;  %v6279_v10 = vperm.slane %v4435_v54, 0  ;;  %v6282_v2 = vperm.slane %v4436_v45, 0 }
  0xe3   : > { %7735 = vst [vmem:[#allocation11_spill] sm:$0xff] %v6259_v31  ;;  %3050 = vmatmul.bf16.gmra.mxu2 %v6259_v31  ;;  %v6287_v36 = vperm.slane %v4437_v35, 0  ;;  %v987_v39 = vperm.slane %v923_v63, 0  ;;  %v6295_v11 = vperm.slane %v4467_v61, 0  ;;  %v6301_v32 = vperm.slane %v4469_v33, 0 }
  0xe4   : > { %2189 = vst [vmem:[#allocation1 + $0x6] ss:$9 sm:$0xff] %v1115_v38  ;;  %v6284_v38 = vpack.i.b16 %v673_v3, %v673_v3  ;;  %v6298_v9 = vperm.slane %v4468_v51, 0  ;;  %v1178_v55 = vsel %vm1170_vm8, %v6032_v8, 0  ;;  %v1264_v16 = vsel %vm326_vm14, %v6251_v56, %v1194_v5 }
  0xe5   : > { %2191 = vst [vmem:[#allocation1 + $0x7] ss:$9 sm:$0xff] %v1116_v18  ;;  %v6290_v18 = vperm.slane %v4466_v15, 0  ;;  %v1266_v30 = vsel %vm331_vm10, %v6251_v56, %v1194_v5  ;;  %v1269_v26 = vsel %vm335_vm11, %v6251_v56, %v1194_v5  ;;  %v1272_v59 = vsel %vm339_vm12, %v6251_v56, %v1194_v5 }
  0xe6   : > { %v1268_v37 = vrot.slane %v1266_v30, 1  ;;  %v1271_v3 = vrot.slane %v1269_v26, 2  ;;  %v1274_v54 = vrot.slane %v1272_v59, 3  ;;  %v1342_v45 = vunpack.i.h.s16 %v1264_v16 }
  0xe7   : > { %v1378_v35 = vrot.slane %v1178_v55, 3  ;;  %v4494_v61 = vpack.i.b16 %v1264_v16, %v1264_v16  ;;  %v6331_v28 = vsel %vm5213_vm1, %v795_v0, %v987_v39  ;;  %vm1139_vm9 = vcmp.eq.s32.totalorder %v6169_v7, 2 }
  0xe8   : > { %v1344_v63 = vunpack.i.h.s16 %v1268_v37  ;;  %v1346_v51 = vunpack.i.h.s16 %v1271_v3  ;;  %v1348_v33 = vunpack.i.h.s16 %v1274_v54  ;;  %v1590_v15 = vpack.i.b16 %v1342_v45, %v1342_v45  ;;  %vm1147_vm13 = vmpackc.low %vm1139_vm9, %vm1139_vm9 }
  0xe9   : > { %v1456_v30 = vsel %vm339_vm12, %v1178_v55, %v1378_v35  ;;  %v4495_v52 = vpack.i.b16 %v1268_v37, %v1268_v37  ;;  %v4496_v27 = vpack.i.b16 %v1271_v3, %v1271_v3  ;;  %v4497_v45 = vpack.i.b16 %v1274_v54, %v1274_v54 }
  0xea   : > { %v1458_v59 = vrot.slane %v1456_v30, 3  ;;  %v1592_v50 = vpack.i.b16 %v1344_v63, %v1344_v63  ;;  %v1596_v37 = vpack.i.b16 %v1348_v33, %v1348_v33  ;;  %v1654_v30 = vperm.slane %v1590_v15, 0 }
  0xeb   : > { %v1655_v63 = vperm.slane %v4495_v52, 0  ;;  %v1657_v23 = vperm.slane %v4496_v27, 0  ;;  %v1659_v54 = vperm.slane %v4497_v45, 0  ;;  %vm1163_vm15 = vcmp.eq.s32.totalorder %v6169_v7, 3  ;;  %v4878_v7 = vld [vmem:[%s7622_s2 + $0x178] sm:$0xff] }
  0xec   : > { %v2192_v62 = vld [vmem:[#allocation1] sm:$0xff]  ;;  %v1656_v3 = vperm.slane %v1592_v50, 0  ;;  %v4529_v53 = vpack.i.b16 %v1458_v59, %v1458_v59  ;;  %vm2438_vm0 = vsmask.f32 7424  ;;  %vm1171_vm2 = vmpackc.low %vm1163_vm15, %vm1163_vm15  ;;  %v4838_v45 = vld [vmem:[%s7622_s2 + $0x38] sm:$0xff]  ;;  %3175 = vmatpush.bf16.msrb.mxu2 %v4878_v7  ;;  %v7742_v7 = vperm.slane %v6284_v38, 0 }
  0xed   : > { %v2338_v46 = vshrl.u32 %v2192_v62, 16  ;;  %v2341_v24 = vshll.u32 %v2192_v62, 16  ;;  %v1448_v62 = vsel %vm326_vm14, %v1178_v55, %v1378_v35  ;;  %3408 = vmatpush.bf16.msrb.mxu3 %v4838_v45  ;;  %vm2689_vm15 = vcmask 1046528  }
  0xee   : > { %v1526_v16 = vunpack.i.h.s16 %v1448_v62  ;;  %v1851_v15 = vperm.slane %v4529_v53, 0  ;;  %v2448_v53 = vshrl.u32 %v6162_v13, 16 }
  0xef   : > { %v6309_v42 = vrot.slane %v2338_v46, 7  ;;  %v1450_v46 = vsel %vm331_vm10, %v1178_v55, %v1378_v35 }
  0xf0   : > { %v1452_v5 = vrot.slane %v1450_v46, 1  ;;  %v1594_v46 = vpack.i.b16 %v1346_v51, %v1346_v51 }
  0xf1   : > { %7736 = vst [vmem:[#allocation12_spill] sm:$0xff] %v6309_v42  ;;  %v2343_v8 = vor.u32 %v2341_v24, %v6309_v42  ;;  %v1453_v24 = vsel %vm335_vm11, %v1178_v55, %v1378_v35  ;;  %v1532_v35 = vunpack.i.h.s16 %v1458_v59  ;;  %v4526_v42 = vpack.i.b16 %v1448_v62, %v1448_v62 }
  0xf2   : > { %v1455_v26 = vrot.slane %v1453_v24, 2  ;;  %v1528_v41 = vunpack.i.h.s16 %v1452_v5  ;;  %v1653_v24 = vperm.slane %v4494_v61, 0  ;;  %v4527_v57 = vpack.i.b16 %v1452_v5, %v1452_v5 }
  0xf3   : > { %v6324_v56 = vsel %vm5213_vm1, 0, %v2343_v8  ;;  %v1788_v43 = vpack.i.b16 %v1532_v35, %v1532_v35  ;;  %v1845_v17 = vperm.slane %v4526_v42, 0  ;;  %v1658_v51 = vperm.slane %v1594_v46, 0 }
  0xf4   : > { %7737 = vst [vmem:[#allocation13_spill] sm:$0xff] %v6324_v56  ;;  %3055 = vmatmul.bf16.gmra.mxu2 %v6324_v56  ;;  %v1530_v55 = vunpack.i.h.s16 %v1455_v26  ;;  %v1782_v56 = vpack.i.b16 %v1526_v16, %v1526_v16  ;;  %v1784_v0 = vpack.i.b16 %v1528_v41, %v1528_v41  ;;  %v4528_v39 = vpack.i.b16 %v1455_v26, %v1455_v26 }
  0xf5   : > { %v1847_v58 = vperm.slane %v4527_v57, 0  ;;  %v1973_v50 = vsel %vm5213_vm1, %v1653_v24, %v1845_v17  ;;  %v1660_v41 = vperm.slane %v1596_v37, 0  ;;  %v1852_v62 = vperm.slane %v1788_v43, 0 }
  0xf6   : > { %v1786_v31 = vpack.i.b16 %v1530_v55, %v1530_v55  ;;  %v1846_v8 = vperm.slane %v1782_v56, 0  ;;  %v1848_v14 = vperm.slane %v1784_v0, 0  ;;  %v1849_v33 = vperm.slane %v4528_v39, 0  ;;  %2194 = vst [vmem:[#allocation1] ss:$9 sm:$0xff] %v1973_v50  ;;  %v4837_v39 = vld [vmem:[%s7622_s2 + $0x30] sm:$0xff] }
  0xf7   : > { %v1975_v27 = vsel %vm5213_vm1, %v1655_v63, %v1847_v58  ;;  %v6350_v17 = vsel %vm5213_vm1, %v6124_v25, 0  ;;  %v7738_v58 = vperm.slane %v6272_v49, 0  ;;  %v1979_v56 = vsel %vm5213_vm1, %v1659_v54, %v1851_v15  ;;  %3409 = vmatpush.bf16.msrb.mxu3 %v4837_v39 }
  0xf8   : > { %v1850_v61 = vperm.slane %v1786_v31, 0  ;;  %v1974_v52 = vsel %vm5213_vm1, %v1654_v30, %v1846_v8  ;;  %v1976_v57 = vsel %vm5213_vm1, %v1656_v3, %v1848_v14  ;;  %v1977_v42 = vsel %vm5213_vm1, %v1657_v23, %v1849_v33  ;;  %2198 = vst [vmem:[#allocation1 + $0x2] ss:$9 sm:$0xff] %v1975_v27 }
  0xf9   : > { %2196 = vst [vmem:[#allocation1 + $0x1] ss:$9 sm:$0xff] %v1974_v52  ;;  %v2450_v31 = vshll.u32 %v6162_v13, 16  ;;  %v7739_v14 = vperm.slane %v6266_v22, 0  ;;  %v2455_v25 = vshll.u32 %v6350_v17, 16  ;;  %v1155_v22 = vsel %vm1147_vm13, %v6214_v1, 0 }
  0xfa   : > { %v1978_v23 = vsel %vm5213_vm1, %v1658_v51, %v1850_v61  ;;  %2200 = vst [vmem:[#allocation1 + $0x3] ss:$9 sm:$0xff] %v1976_v57  ;;  %v1121_v5 = vsel %vm5213_vm1, %v6282_v2, %v6298_v9  ;;  %v1980_v26 = vsel %vm5213_vm1, %v1660_v41, %v1852_v62  ;;  %v1195_v16 = vrot.slane %v1155_v22, 3  ;;  %v4876_v57 = vld [vmem:[%s7622_s2 + $0x168] sm:$0xff] }
  0xfb   : > { %v6361_v43 = vsel %vm5213_vm1, %v7739_v14, %v7738_v58  ;;  %v2452_v49 = vrot.slane %v2450_v31, 1  ;;  %2202 = vst [vmem:[#allocation1 + $0x4] ss:$9 sm:$0xff] %v1977_v42  ;;  %v2457_v59 = vrot.slane %v2455_v25, 1  ;;  %v7740_v8 = vperm.slane %v6277_v19, 0  ;;  %v4846_v19 = vld [vmem:[%s7622_s2 + $0x78] sm:$0xff] }
  0xfc   : > { %v7741_v55 = vperm.slane %v6268_v6, 0  ;;  %2204 = vst [vmem:[#allocation1 + $0x5] ss:$9 sm:$0xff] %v1978_v23  ;;  %v2284_v37 = vshrl.u32 %v5559_v44, 16  ;;  %v1179_v24 = vsel %vm1171_vm2, %v6214_v1, 0  ;;  %v4877_v6 = vld [vmem:[%s7622_s2 + $0x170] sm:$0xff]  ;;  %v1277_v63 = vsel %vm326_vm14, %v1155_v22, %v1195_v16  ;;  %3497 = vmatpush.bf16.msrb.mxu0 %v4846_v19 }
  0xfd   : > { %v2453_v46 = vor.u32 %v2452_v49, %v2448_v53  ;;  %2206 = vst [vmem:[#allocation1 + $0x6] ss:$9 sm:$0xff] %v1979_v56  ;;  %v2287_v30 = vshll.u32 %v5559_v44, 16  ;;  %v1279_v3 = vsel %vm331_vm10, %v1155_v22, %v1195_v16  ;;  %v1282_v0 = vsel %vm335_vm11, %v1155_v22, %v1195_v16  ;;  %3176 = vmatpush.bf16.msrb.mxu2 %v4877_v6 }
  0xfe   : > { %v6385_v35 = vsel %vm5213_vm1, %v7741_v55, %v7740_v8  ;;  %2208 = vst [vmem:[#allocation1 + $0x7] ss:$9 sm:$0xff] %v1980_v26  ;;  %v6408_v51 = vrot.slane %v2284_v37, 7  ;;  %v1281_v54 = vrot.slane %v1279_v3, 1  ;;  %v1284_v33 = vrot.slane %v1282_v0, 2 }
  0xff   : > { %v6403_v1 = vsel %vm2438_vm0, %v2453_v46, %v2457_v59  ;;  %v1123_v44 = vsel %vm5213_vm1, %v6287_v36, %v6301_v32  ;;  %v1285_v61 = vsel %vm339_vm12, %v1155_v22, %v1195_v16  ;;  %v1350_v15 = vunpack.i.h.s16 %v1277_v63  ;;  %v4836_v36 = vld [vmem:[%s7622_s2 + $0x28] sm:$0xff]  ;;  %v4845_v32 = vld [vmem:[%s7622_s2 + $0x70] sm:$0xff] }
 0x100   : > { %3094 = vmatmul.bf16.vlgmr.msrb.gmra.mxu1 %v6403_v1  ;;  %v1379_v50 = vrot.slane %v1179_v24, 3  ;;  %v2289_v52 = vor.u32 %v2287_v30, %v6408_v51  ;;  %v1287_v27 = vrot.slane %v1285_v61, 3  ;;  %v1352_v41 = vunpack.i.h.s16 %v1281_v54  ;;  %3410 = vmatpush.bf16.msrb.mxu3 %v4836_v36 }
 0x101   : > { %v1354_v62 = vunpack.i.h.s16 %v1284_v33  ;;  %v4498_v22 = vpack.i.b16 %v1277_v63, %v1277_v63  ;;  %v1598_v26 = vpack.i.b16 %v1350_v15, %v1350_v15  ;;  %v4499_v59 = vpack.i.b16 %v1281_v54, %v1281_v54  ;;  %3177 = vmatpush.bf16.msrb.mxu2 %v4876_v57  ;;  %3498 = vmatpush.bf16.msrb.mxu0 %v4845_v32 }
 0x102   : > { %v1461_v42 = vsel %vm326_vm14, %v1179_v24, %v1379_v50  ;;  %v1463_v53 = vsel %vm331_vm10, %v1179_v24, %v1379_v50  ;;  %v1466_v31 = vsel %vm335_vm11, %v1179_v24, %v1379_v50  ;;  %v1469_v58 = vsel %vm339_vm12, %v1179_v24, %v1379_v50  ;;  %v4875_v24 = vld [vmem:[%s7622_s2 + $0x160] sm:$0xff] }
 0x103   : > { %v6426_v14 = vsel %vm5213_vm1, 0, %v2289_v52  ;;  %v1356_v23 = vunpack.i.h.s16 %v1287_v27  ;;  %v1465_v25 = vrot.slane %v1463_v53, 1  ;;  %v1468_v56 = vrot.slane %v1466_v31, 2 }
 0x104   : > { %3010 = vmatmul.bf16.gmra.mxu0 %v6426_v14  ;;  %v1471_v49 = vrot.slane %v1469_v58, 3  ;;  %v7743_v16 = vperm.slane %v6270_v4, 0  ;;  %v1534_v55 = vunpack.i.h.s16 %v1461_v42  ;;  %v1600_v46 = vpack.i.b16 %v1352_v41, %v1352_v41 }
 0x105   : > { %v4500_v45 = vpack.i.b16 %v1284_v33, %v1284_v33  ;;  %v2209_v37 = vld [vmem:[#allocation1] sm:$0xff]  ;;  %v1536_v6 = vunpack.i.h.s16 %v1465_v25  ;;  %v1538_v19 = vunpack.i.h.s16 %v1468_v56  ;;  %v6438_v30 = vpack.i.b16 %v1354_v62, %v1354_v62  ;;  %3178 = vmatpush.bf16.msrb.mxu2 %v4875_v24  ;;  %v6529_v24 = vld [vmem:[%s5116_s16 + $0x1c] sm:$0xf] }
 0x106   : > { %v1124_v8 = vsel %vm5213_vm1, %v7743_v16, %v7742_v7  ;;  %v4501_v63 = vpack.i.b16 %v1287_v27, %v1287_v27  ;;  %v7744_v4 = vsel %vm5213_vm1, %v6274_v60, %v6290_v18  ;;  %v2344_v38 = vshrl.u32 %v2209_v37, 16  ;;  %2213 = vst [vmem:[#allocation1 + $0x1] ss:$9 sm:$0xff] %v6331_v28  ;;  %v4873_v7 = vld [vmem:[%s7622_s2 + $0x150] sm:$0xff] }
 0x107   : > { %2211 = vst [vmem:[#allocation1] ss:$9 sm:$0xff] %v7744_v4  ;;  %v2347_v3 = vshll.u32 %v2209_v37, 16  ;;  %v1540_v0 = vunpack.i.h.s16 %v1471_v49  ;;  %v6445_v39 = vpack.i.b16 %v1356_v23, %v1356_v23  ;;  %v6448_v54 = vperm.slane %v4498_v22, 0  ;;  %v6478_v22 = vld [vmem:[%s5101_s8 + $0x38] sm:$0xff]  ;;  %v4844_v37 = vld [vmem:[%s7622_s2 + $0x68] sm:$0xff] }
 0x108   : > { %v1662_v33 = vperm.slane %v1598_v26, 0  ;;  %v6450_v61 = vperm.slane %v4499_v59, 0  ;;  %v1664_v15 = vperm.slane %v1600_v46, 0  ;;  %v7745_v50 = vsel %vm5213_vm1, %v6279_v10, %v6295_v11  ;;  %2217 = vst [vmem:[#allocation1 + $0x3] ss:$9 sm:$0xff] %v6361_v43  ;;  %3499 = vmatpush.bf16.msrb.mxu0 %v4844_v37 }
 0x109   : > { %2215 = vst [vmem:[#allocation1 + $0x2] ss:$9 sm:$0xff] %v7745_v50  ;;  %v6457_v60 = vrot.slane %v2344_v38, 7  ;;  %v6459_v18 = vperm.slane %v4500_v45, 0  ;;  %v1666_v52 = vperm.slane %v6438_v30, 0  ;;  %v4530_v27 = vpack.i.b16 %v1461_v42, %v1461_v42  ;;  %v4835_v45 = vld [vmem:[%s7622_s2 + $0x20] sm:$0xff] }
 0x10a   : > { %v6463_v28 = vperm.slane %v4501_v63, 0  ;;  %v1790_v41 = vpack.i.b16 %v1534_v55, %v1534_v55  ;;  %v4531_v62 = vpack.i.b16 %v1465_v25, %v1465_v25  ;;  %v1792_v57 = vpack.i.b16 %v1536_v6, %v1536_v6  ;;  %2219 = vst [vmem:[#allocation1 + $0x4] ss:$9 sm:$0xff] %v1121_v5  ;;  %v4874_v25 = vld [vmem:[%s7622_s2 + $0x158] sm:$0xff]  ;;  %3411 = vmatpush.bf16.msrb.mxu3 %v4835_v45 }
 0x10b   : > { %v2349_v10 = vor.u32 %v2347_v3, %v6457_v60  ;;  %v4532_v11 = vpack.i.b16 %v1468_v56, %v1468_v56  ;;  %v1794_v53 = vpack.i.b16 %v1538_v19, %v1538_v19  ;;  %v4533_v42 = vpack.i.b16 %v1471_v49, %v1471_v49  ;;  %2221 = vst [vmem:[#allocation1 + $0x5] ss:$9 sm:$0xff] %v6385_v35 }
 0x10c   : > { %v1796_v43 = vpack.i.b16 %v1540_v0, %v1540_v0  ;;  %v1853_v31 = vperm.slane %v4530_v27, 0  ;;  %v1854_v58 = vperm.slane %v1790_v41, 0  ;;  %v6472_v23 = vperm.slane %v4531_v62, 0  ;;  %2223 = vst [vmem:[#allocation1 + $0x6] ss:$9 sm:$0xff] %v1123_v44  ;;  %3179 = vmatpush.bf16.msrb.mxu2 %v4874_v25 }
 0x10d   : > { %v6487_v2 = vsel %vm5213_vm1, 0, %v2349_v10  ;;  %v1668_v9 = vperm.slane %v6445_v39, 0  ;;  %v1856_v5 = vperm.slane %v1792_v57, 0  ;;  %v6493_v35 = vsel %vm5213_vm1, %v6408_v51, 0  ;;  %2225 = vst [vmem:[#allocation1 + $0x7] ss:$9 sm:$0xff] %v1124_v8 }
 0x10e   : > { %3060 = vmatmul.bf16.gmra.mxu2 %v6487_v2  ;;  %v6496_v56 = vperm.slane %v4532_v11, 0  ;;  %v1858_v49 = vperm.slane %v1794_v53, 0  ;;  %v6504_v44 = vperm.slane %v4533_v42, 0  ;;  %v1860_v26 = vperm.slane %v1796_v43, 0  ;;  %v4871_v11 = vld [vmem:[%s7622_s2 + $0x140] sm:$0xff] }
 0x10f   : > { %v1981_v51 = vsel %vm5213_vm1, %v6448_v54, %v1853_v31  ;;  %v1982_v59 = vsel %vm5213_vm1, %v1662_v33, %v1854_v58  ;;  %v1983_v16 = vsel %vm5213_vm1, %v6450_v61, %v6472_v23  ;;  %v1984_v8 = vsel %vm5213_vm1, %v1664_v15, %v1856_v5 }
 0x110   : > { %v2460_v55 = vshrl.u32 %v6426_v14, 16  ;;  %v2462_v46 = vshll.u32 %v6426_v14, 16  ;;  %v2467_v6 = vshll.u32 %v6493_v35, 16  ;;  %v2290_v19 = vshrl.u32 %v5602_v47, 16  ;;  %3180 = vmatpush.bf16.msrb.mxu2 %v4873_v7 }
 0x111   : > { %v2293_v30 = vshll.u32 %v5602_v47, 16  ;;  %vm269_vm3 = vcmp.eq.s32.totalorder %v6478_v22, 0  ;;  %v1985_v63 = vsel %vm5213_vm1, %v6459_v18, %v6496_v56  ;;  %vm293_vm5 = vcmp.eq.s32.totalorder %v6478_v22, 1  ;;  %v4872_v47 = vld [vmem:[%s7622_s2 + $0x148] sm:$0xff] }
 0x112   : > { %v2464_v4 = vrot.slane %v2462_v46, 1  ;;  %vm277_vm4 = vmpackc.low %vm269_vm3, %vm269_vm3  ;;  %vm1140_vm6 = vcmp.eq.s32.totalorder %v6478_v22, 2  ;;  %v1986_v38 = vsel %vm5213_vm1, %v1666_v52, %v1858_v49  ;;  %v2469_v3 = vrot.slane %v2467_v6, 1 }
 0x113   : > { %v6546_v0 = vrot.slane %v2290_v19, 7  ;;  %v285_v39 = vsel %vm277_vm4, %v6529_v24, 0  ;;  %vm301_vm7 = vmpackc.low %vm293_vm5, %vm293_vm5  ;;  %v1987_v54 = vsel %vm5213_vm1, %v6463_v28, %v6504_v44  ;;  %v1988_v18 = vsel %vm5213_vm1, %v1668_v9, %v1860_v26 }
 0x114   : > { %v2465_v33 = vor.u32 %v2464_v4, %v2460_v55  ;;  %v309_v61 = vsel %vm301_vm7, %v6529_v24, 0  ;;  %v325_v15 = vrot.slane %v285_v39, 3  ;;  %vm1148_vm8 = vmpackc.low %vm1140_vm6, %vm1140_vm6  ;;  %v2226_v50 = vld [vmem:[#allocation1] sm:$0xff]  ;;  %3181 = vmatpush.bf16.msrb.mxu2 %v4872_v47  ;;  %vm1164_vm9 = vcmp.eq.s32.totalorder %v6478_v22, 3  ;;  %v4834_v4 = vld [vmem:[%s7622_s2 + $0x18] sm:$0xff] }
 0x115   : > { %v2295_v52 = vor.u32 %v2293_v30, %v6546_v0  ;;  %v513_v27 = vrot.slane %v309_v61, 3  ;;  %v6558_v41 = vsel %vm1148_vm8, %v6529_v24, 0  ;;  %v2350_v62 = vshrl.u32 %v2226_v50, 16  ;;  %2228 = vst [vmem:[#allocation1] ss:$9 sm:$0xff] %v1981_v51  ;;  %3412 = vmatpush.bf16.msrb.mxu3 %v4834_v4  ;;  %vm1172_vm13 = vmpackc.low %vm1164_vm9, %vm1164_vm9 }
 0x116   : > { %v2353_v57 = vshll.u32 %v2226_v50, 16  ;;  %v6561_v28 = vsel %vm2438_vm0, %v2465_v33, %v2469_v3  ;;  %v423_v10 = vsel %vm326_vm14, %v285_v39, %v325_v15  ;;  %2230 = vst [vmem:[#allocation1 + $0x1] ss:$9 sm:$0xff] %v1982_v59  ;;  %v425_v42 = vsel %vm331_vm10, %v285_v39, %v325_v15 }
 0x117   : > { %7746 = vst [vmem:[#allocation14_spill] sm:$0xff] %v6561_v28  ;;  %3099 = vmatmul.bf16.gmra.mxu1 %v6561_v28  ;;  %v6570_v53 = vsel %vm5213_vm1, 0, %v2295_v52  ;;  %v428_v43 = vsel %vm335_vm11, %v285_v39, %v325_v15  ;;  %v491_v31 = vunpack.i.h.s16 %v423_v10  ;;  %v6574_v58 = vrot.slane %v2350_v62, 7  ;;  %v4842_v52 = vld [vmem:[%s7622_s2 + $0x58] sm:$0xff] }
 0x118   : > { %2232 = vst [vmem:[#allocation1 + $0x2] ss:$9 sm:$0xff] %v1983_v16  ;;  %3015 = vmatmul.bf16.gmra.mxu0 %v6570_v53  ;;  %v427_v23 = vrot.slane %v425_v42, 1  ;;  %v430_v25 = vrot.slane %v428_v43, 2  ;;  %v431_v9 = vsel %vm339_vm12, %v285_v39, %v325_v15  ;;  %v607_v56 = vsel %vm326_vm14, %v309_v61, %v513_v27  ;;  %3182 = vmatpush.bf16.msrb.mxu2 %v4871_v11 }
 0x119   : > { %2234 = vst [vmem:[#allocation1 + $0x3] ss:$9 sm:$0xff] %v1984_v8  ;;  %v433_v5 = vrot.slane %v431_v9, 3  ;;  %v609_v49 = vsel %vm331_vm10, %v309_v61, %v513_v27  ;;  %v612_v36 = vsel %vm335_vm11, %v309_v61, %v513_v27  ;;  %v2355_v32 = vor.u32 %v2353_v57, %v6574_v58 }
 0x11a   : > { %2236 = vst [vmem:[#allocation1 + $0x4] ss:$9 sm:$0xff] %v1985_v63  ;;  %v493_v44 = vunpack.i.h.s16 %v427_v23  ;;  %v495_v26 = vunpack.i.h.s16 %v430_v25  ;;  %v611_v51 = vrot.slane %v609_v49, 1  ;;  %v614_v7 = vrot.slane %v612_v36, 2 }
 0x11b   : > { %2238 = vst [vmem:[#allocation1 + $0x5] ss:$9 sm:$0xff] %v1986_v38  ;;  %v497_v59 = vunpack.i.h.s16 %v433_v5  ;;  %v615_v16 = vsel %vm339_vm12, %v309_v61, %v513_v27  ;;  %v675_v8 = vunpack.i.h.s16 %v607_v56  ;;  %v6585_v55 = vsel %vm5213_vm1, 0, %v2355_v32  ;;  %v4843_v38 = vld [vmem:[%s7622_s2 + $0x60] sm:$0xff] }
 0x11c   : > { %2240 = vst [vmem:[#allocation1 + $0x6] ss:$9 sm:$0xff] %v1987_v54  ;;  %v617_v46 = vrot.slane %v615_v16, 3  ;;  %v677_v45 = vunpack.i.h.s16 %v611_v51  ;;  %v4438_v37 = vpack.i.b16 %v423_v10, %v423_v10  ;;  %3065 = vmatmul.bf16.vlgmr.msra.gmra.mxu3 %v6585_v55  ;;  %v679_v6 = vunpack.i.h.s16 %v614_v7  ;;  %3500 = vmatpush.bf16.msrb.mxu0 %v4843_v38 }
 0x11d   : > { %2242 = vst [vmem:[#allocation1 + $0x7] ss:$9 sm:$0xff] %v1988_v18  ;;  %v739_v19 = vpack.i.b16 %v491_v31, %v491_v31  ;;  %v4439_v30 = vpack.i.b16 %v427_v23, %v427_v23  ;;  %v741_v63 = vpack.i.b16 %v493_v44, %v493_v44  ;;  %v4440_v47 = vpack.i.b16 %v430_v25, %v430_v25  ;;  %v4833_v18 = vld [vmem:[%s7622_s2 + $0x10] sm:$0xff] }
 0x11e   : > { %v681_v3 = vunpack.i.h.s16 %v617_v46  ;;  %v743_v39 = vpack.i.b16 %v495_v26, %v495_v26  ;;  %v4441_v54 = vpack.i.b16 %v433_v5, %v433_v5  ;;  %v745_v33 = vpack.i.b16 %v497_v59, %v497_v59  ;;  %3413 = vmatpush.bf16.msrb.mxu3 %v4833_v18 }
 0x11f   : > { %v802_v61 = vperm.slane %v4438_v37, 0  ;;  %v803_v15 = vperm.slane %v739_v19, 0  ;;  %v804_v50 = vperm.slane %v4439_v30, 0  ;;  %v805_v27 = vperm.slane %v741_v63, 0 }
 0x120   : > { %v806_v62 = vperm.slane %v4440_v47, 0  ;;  %v807_v57 = vperm.slane %v743_v39, 0  ;;  %v808_v10 = vperm.slane %v4441_v54, 0  ;;  %v809_v11 = vperm.slane %v745_v33, 0  ;;  %3501 = vmatpush.bf16.msrb.mxu0 %v4842_v52 }
 0x121   : > { %v4470_v42 = vpack.i.b16 %v607_v56, %v607_v56  ;;  %v931_v43 = vpack.i.b16 %v675_v8, %v675_v8  ;;  %v4471_v31 = vpack.i.b16 %v611_v51, %v611_v51  ;;  %v933_v23 = vpack.i.b16 %v677_v45, %v677_v45 }
 0x122   : > { %v4472_v25 = vpack.i.b16 %v614_v7, %v614_v7  ;;  %v935_v9 = vpack.i.b16 %v679_v6, %v679_v6  ;;  %v4473_v5 = vpack.i.b16 %v617_v46, %v617_v46  ;;  %v937_v49 = vpack.i.b16 %v681_v3, %v681_v3 }
 0x123   : > { %v994_v36 = vperm.slane %v4470_v42, 0  ;;  %v995_v32 = vperm.slane %v931_v43, 0  ;;  %v996_v44 = vperm.slane %v4471_v31, 0  ;;  %v997_v59 = vperm.slane %v933_v23, 0 }
 0x124   : > { %v2243_v26 = vld [vmem:[#allocation1] sm:$0xff]  ;;  %v998_v16 = vperm.slane %v4472_v25, 0  ;;  %v999_v37 = vperm.slane %v935_v9, 0  ;;  %v1000_v19 = vperm.slane %v4473_v5, 0  ;;  %v1001_v56 = vperm.slane %v937_v49, 0 }
 0x125   : > { %v2356_v30 = vshrl.u32 %v2243_v26, 16  ;;  %v2359_v63 = vshll.u32 %v2243_v26, 16  ;;  %v1125_v51 = vsel %vm5213_vm1, %v802_v61, %v994_v36  ;;  %v1126_v7 = vsel %vm5213_vm1, %v803_v15, %v995_v32 }
 0x126   : > { %v1127_v8 = vsel %vm5213_vm1, %v804_v50, %v996_v44  ;;  %v1128_v46 = vsel %vm5213_vm1, %v805_v27, %v997_v59  ;;  %v1129_v45 = vsel %vm5213_vm1, %v806_v62, %v998_v16  ;;  %2245 = vst [vmem:[#allocation1] ss:$9 sm:$0xff] %v1125_v51  ;;  %v1130_v4 = vsel %vm5213_vm1, %v807_v57, %v999_v37 }
 0x127   : > { %v6611_v6 = vrot.slane %v2356_v30, 7  ;;  %v1131_v38 = vsel %vm5213_vm1, %v808_v10, %v1000_v19  ;;  %v1132_v3 = vsel %vm5213_vm1, %v809_v11, %v1001_v56  ;;  %2247 = vst [vmem:[#allocation1 + $0x1] ss:$9 sm:$0xff] %v1126_v7  ;;  %v6625_v47 = vsel %vm5213_vm1, %v6546_v0, 0 }
 0x128   : > { %2249 = vst [vmem:[#allocation1 + $0x2] ss:$9 sm:$0xff] %v1127_v8  ;;  %v2472_v39 = vshrl.u32 %v6570_v53, 16  ;;  %v2474_v54 = vshll.u32 %v6570_v53, 16  ;;  %v2479_v61 = vshll.u32 %v6625_v47, 16  ;;  %v2692_v22 = vrot.slane %v6162_v13, 1 }
 0x129   : > { %v2361_v33 = vor.u32 %v2359_v63, %v6611_v6  ;;  %2251 = vst [vmem:[#allocation1 + $0x3] ss:$9 sm:$0xff] %v1128_v46  ;;  %v2693_v15 = vrot.slane %v6350_v17, 1  ;;  %v2296_v18 = vshrl.u32 %v5665_v29, 16  ;;  %v2299_v0 = vshll.u32 %v5665_v29, 16 }
 0x12a   : > { %2253 = vst [vmem:[#allocation1 + $0x4] ss:$9 sm:$0xff] %v1129_v45  ;;  %v2476_v50 = vrot.slane %v2474_v54, 1  ;;  %v1180_v52 = vsel %vm1172_vm13, %v6529_v24, 0  ;;  %v2481_v62 = vrot.slane %v2479_v61, 1  ;;  %v1196_v10 = vrot.slane %v6558_v41, 3 }
 0x12b   : > { %v6638_v27 = vsel %vm5213_vm1, 0, %v2361_v33  ;;  %2255 = vst [vmem:[#allocation1 + $0x5] ss:$9 sm:$0xff] %v1130_v4  ;;  %v6641_v57 = vsel %vm2689_vm15, %v2692_v22, %v2693_v15  ;;  %v6645_v11 = vrot.slane %v2296_v18, 7  ;;  %v1380_v29 = vrot.slane %v1180_v52, 3  ;;  %v4841_v54 = vld [vmem:[%s7622_s2 + $0x50] sm:$0xff] }
 0x12c   : > { %2257 = vst [vmem:[#allocation1 + $0x6] ss:$9 sm:$0xff] %v1131_v38  ;;  %v2477_v17 = vor.u32 %v2476_v50, %v2472_v39  ;;  %3183 = vmatmul.bf16.vlgmr.msrb.gmra.mxu2 %v6641_v57  ;;  %3070 = vmatmul.bf16.gmra.mxu3 %v6638_v27  ;;  %v1290_v24 = vsel %vm326_vm14, %v6558_v41, %v1196_v10  ;;  %v4832_v39 = vld [vmem:[%s7622_s2 + $0x8] sm:$0xff]  ;;  %v2731_v48 = vrot.slane %v6638_v27, 1 }
 0x12d   : > { %2259 = vst [vmem:[#allocation1 + $0x7] ss:$9 sm:$0xff] %v1132_v3  ;;  %v1292_v42 = vsel %vm331_vm10, %v6558_v41, %v1196_v10  ;;  %v1295_v43 = vsel %vm335_vm11, %v6558_v41, %v1196_v10  ;;  %v2301_v23 = vor.u32 %v2299_v0, %v6645_v11  ;;  %v1298_v5 = vsel %vm339_vm12, %v6558_v41, %v1196_v10  ;;  %v4840_v10 = vld [vmem:[%s7622_s2 + $0x48] sm:$0xff] }
 0x12e   : > { %v6655_v31 = vsel %vm2438_vm0, %v2477_v17, %v2481_v62  ;;  %v1294_v25 = vrot.slane %v1292_v42, 1  ;;  %v1297_v9 = vrot.slane %v1295_v43, 2  ;;  %v1358_v49 = vunpack.i.h.s16 %v1290_v24  ;;  %3414 = vmatpush.bf16.msrb.mxu3 %v4832_v39  ;;  %3502 = vmatpush.bf16.msrb.mxu0 %v4841_v54  ;;  %v4831_v62 = vld [vmem:[%s7622_s2] sm:$0xff] }
 0x12f   : > { %7747 = vst [vmem:[#allocation15_spill] sm:$0xff] %v6655_v31  ;;  %3104 = vmatmul.bf16.gmra.mxu1 %v6655_v31  ;;  %v1476_v36 = vsel %vm331_vm10, %v1180_v52, %v1380_v29  ;;  %v6664_v32 = vsel %vm5213_vm1, 0, %v2301_v23  ;;  %v1300_v44 = vrot.slane %v1298_v5, 3  ;;  %v1474_v59 = vsel %vm326_vm14, %v1180_v52, %v1380_v29 }
 0x130   : > { %7748 = vst [vmem:[#allocation16_spill] sm:$0xff] %v6664_v32  ;;  %v1360_v26 = vunpack.i.h.s16 %v1294_v25  ;;  %3020 = vmatmul.bf16.gmra.mxu0 %v6664_v32  ;;  %v1362_v16 = vunpack.i.h.s16 %v1297_v9  ;;  %v1478_v37 = vrot.slane %v1476_v36, 1  ;;  %v1479_v19 = vsel %vm335_vm11, %v1180_v52, %v1380_v29 }
 0x131   : > { %v1482_v30 = vsel %vm339_vm12, %v1180_v52, %v1380_v29  ;;  %v1364_v41 = vunpack.i.h.s16 %v1300_v44  ;;  %v1481_v63 = vrot.slane %v1479_v19, 2  ;;  %v4502_v51 = vpack.i.b16 %v1290_v24, %v1290_v24 }
 0x132   : > { %v1484_v56 = vrot.slane %v1482_v30, 3  ;;  %v1606_v7 = vpack.i.b16 %v1358_v49, %v1358_v49  ;;  %v4503_v8 = vpack.i.b16 %v1294_v25, %v1294_v25  ;;  %v1608_v46 = vpack.i.b16 %v1360_v26, %v1360_v26  ;;  %3415 = vmatpush.bf16.msrb.mxu3 %v4831_v62  ;;  %3503 = vmatpush.bf16.msrb.mxu0 %v4840_v10 }
 0x133   : > { %v1542_v4 = vunpack.i.h.s16 %v1474_v59  ;;  %v1544_v38 = vunpack.i.h.s16 %v1478_v37  ;;  %v4504_v3 = vpack.i.b16 %v1297_v9, %v1297_v9  ;;  %v1546_v22 = vunpack.i.h.s16 %v1481_v63 }
 0x134   : > { %v2260_v45 = vld [vmem:[#allocation1] sm:$0xff]  ;;  %v1548_v15 = vunpack.i.h.s16 %v1484_v56  ;;  %v1610_v50 = vpack.i.b16 %v1362_v16, %v1362_v16  ;;  %v4505_v18 = vpack.i.b16 %v1300_v44, %v1300_v44  ;;  %v1612_v0 = vpack.i.b16 %v1364_v41, %v1364_v41  ;;  %v6685_v41 = vpop.f32.mrf.mxu1 }
 0x135   : > { %v2362_v33 = vshrl.u32 %v2260_v45, 16  ;;  %v2365_v61 = vshll.u32 %v2260_v45, 16  ;;  %v1669_v52 = vperm.slane %v4502_v51, 0  ;;  %v1670_v29 = vperm.slane %v1606_v7, 0  ;;  %v4839_v51 = vld [vmem:[%s7622_s2 + $0x40] sm:$0xff] }
 0x136   : > { %v1671_v24 = vperm.slane %v4503_v8, 0  ;;  %v1672_v42 = vperm.slane %v1608_v46, 0  ;;  %v1673_v43 = vperm.slane %v4504_v3, 0  ;;  %v4534_v23 = vpack.i.b16 %v1474_v59, %v1474_v59  ;;  %3504 = vmatpush.bf16.msrb.mxu0 %v4839_v51 }
 0x137   : > { %v6682_v17 = vrot.slane %v2362_v33, 7  ;;  %v1798_v25 = vpack.i.b16 %v1542_v4, %v1542_v4  ;;  %v4535_v9 = vpack.i.b16 %v1478_v37, %v1478_v37  ;;  %v1800_v49 = vpack.i.b16 %v1544_v38, %v1544_v38 }
 0x138   : > { %v4536_v36 = vpack.i.b16 %v1481_v63, %v1481_v63  ;;  %v1802_v44 = vpack.i.b16 %v1546_v22, %v1546_v22  ;;  %v4537_v26 = vpack.i.b16 %v1484_v56, %v1484_v56  ;;  %v1804_v16 = vpack.i.b16 %v1548_v15, %v1548_v15 }
 0x139   : > { %v2367_v5 = vor.u32 %v2365_v61, %v6682_v17  ;;  %v1861_v19 = vperm.slane %v4534_v23, 0  ;;  %v1862_v30 = vperm.slane %v1798_v25, 0  ;;  %v1863_v37 = vperm.slane %v4535_v9, 0  ;;  %v4886_v25 = vld [vmem:[%s7622_s2 + $0x1b8] sm:$0xff] }
 0x13a   : > { %v1864_v7 = vperm.slane %v1800_v49, 0  ;;  %v1865_v63 = vperm.slane %v4536_v36, 0  ;;  %v1674_v8 = vperm.slane %v1610_v50, 0  ;;  %v1675_v56 = vperm.slane %v4505_v18, 0  ;;  %v4894_v9 = vld [vmem:[%s7622_s2 + $0x1f8] sm:$0xff]  ;;  %3867 = vmatpush.bf16.msra.mxu2 %v4886_v25  ;;  %v4853_v25 = vld [vmem:[%s7622_s2 + $0xb0] sm:$0xff] }
 0x13b   : > { %v6692_v59 = vsel %vm5213_vm1, 0, %v2367_v5  ;;  %v1866_v46 = vperm.slane %v1802_v44, 0  ;;  %v1989_v45 = vsel %vm5213_vm1, %v1669_v52, %v1861_v19  ;;  %v1676_v4 = vperm.slane %v1612_v0, 0  ;;  %v4854_v49 = vld [vmem:[%s7622_s2 + $0xb8] sm:$0xff]  ;;  %3956 = vmatpush.bf16.msra.mxu3 %v4894_v9  ;;  %v4901_v9 = vld [vmem:[%s7622_s2 + $0x230] sm:$0xff] }
 0x13c   : > { %3075 = vmatmul.bf16.gmra.mxu3 %v6692_v59  ;;  %v1867_v38 = vperm.slane %v4537_v26, 0  ;;  %v1990_v3 = vsel %vm5213_vm1, %v1670_v29, %v1862_v30  ;;  %v1991_v39 = vsel %vm5213_vm1, %v1671_v24, %v1863_v37  ;;  %v1868_v54 = vperm.slane %v1804_v16, 0  ;;  %2262 = vst [vmem:[#allocation1] ss:$9 sm:$0xff] %v1989_v45  ;;  %v6734_v5 = vpop.f32.mrf.mxu1  ;;  %v4902_v44 = vld [vmem:[%s7622_s2 + $0x238] sm:$0xff]  ;;  %3586 = vmatpush.bf16.msra.mxu1 %v4854_v49 }
 0x13d   : > { %v1992_v33 = vsel %vm5213_vm1, %v1672_v42, %v1864_v7  ;;  %v1993_v61 = vsel %vm5213_vm1, %v1673_v43, %v1865_v63  ;;  %v6708_v22 = vsel %vm5213_vm1, %v6645_v11, 0  ;;  %2264 = vst [vmem:[#allocation1 + $0x1] ss:$9 sm:$0xff] %v1990_v3  ;;  %v2484_v15 = vshrl.u32 %v6664_v32, 16  ;;  %4045 = vmatpush.bf16.msra.mxu0 %v4902_v44  ;;  %v7754_v44 = vld [vmem:[#allocation6_spill] sm:$0xff] }
 0x13e   : > { %v2486_v50 = vshll.u32 %v6664_v32, 16  ;;  %v2491_v18 = vshll.u32 %v6708_v22, 16  ;;  %v2695_v0 = vrot.slane %v6426_v14, 1  ;;  %v1994_v52 = vsel %vm5213_vm1, %v1674_v8, %v1866_v46  ;;  %2266 = vst [vmem:[#allocation1 + $0x2] ss:$9 sm:$0xff] %v1991_v39 }
 0x13f   : > { %v2696_v62 = vrot.slane %v6493_v35, 1  ;;  %v1995_v11 = vsel %vm5213_vm1, %v1675_v56, %v1867_v38  ;;  %2268 = vst [vmem:[#allocation1 + $0x3] ss:$9 sm:$0xff] %v1992_v33  ;;  %v1996_v24 = vsel %vm5213_vm1, %v1676_v4, %v1868_v54  ;;  %v7646_v23 = vmov 0  }
 0x140   : > { %v2488_v10 = vrot.slane %v2486_v50, 1  ;;  %v2493_v29 = vrot.slane %v2491_v18, 1  ;;  %2270 = vst [vmem:[#allocation1 + $0x4] ss:$9 sm:$0xff] %v1993_v61  ;;  %v6726_v35 = vrot.slane %v7646_v23, 1  ;;  %v2498_v26 = vshll.u32 %v5826_v21, 16  ;;  %3587 = vmatpush.bf16.msra.mxu1 %v4853_v25 }
 0x141   : > { %v6722_v42 = vsel %vm2689_vm15, %v2695_v0, %v2696_v62  ;;  %2272 = vst [vmem:[#allocation1 + $0x5] ss:$9 sm:$0xff] %v1994_v52  ;;  %v2426_v16 = vsel %vm5213_vm1, %v5787_v20, 0  ;;  %v2496_v19 = vshrl.u32 %v5826_v21, 16  ;;  %v2698_v7 = vrot.slane %v6570_v53, 1  ;;  %4046 = vmatpush.bf16.msra.mxu0 %v4901_v9 }
 0x142   : > { %v2489_v43 = vor.u32 %v2488_v10, %v2484_v15  ;;  %3188 = vmatmul.bf16.gmra.mxu2 %v6722_v42  ;;  %2274 = vst [vmem:[#allocation1 + $0x6] ss:$9 sm:$0xff] %v1995_v11  ;;  %3505 = vmatmul.bf16.vlgmr.msrb.gmra.mxu0 %v6726_v35  ;;  %v2500_v30 = vrot.slane %v2498_v26, 1  ;;  %v2503_v51 = vshll.u32 %v2426_v16, 16  ;;  %v2699_v63 = vrot.slane %v6625_v47, 1 }
 0x143   : > { %2276 = vst [vmem:[#allocation1 + $0x7] ss:$9 sm:$0xff] %v1996_v24  ;;  %v2510_v33 = vshll.u32 %v5925_v34, 16  ;;  %v2427_v61 = vsel %vm5213_vm1, %v5899_v40, 0  ;;  %v2508_v15 = vshrl.u32 %v5925_v34, 16  ;;  %v2701_v0 = vrot.slane %v6664_v32, 1 }
 0x144   : > { %v6740_v36 = vsel %vm2438_vm0, %v2489_v43, %v2493_v29  ;;  %v6754_v8 = vpop.f32.mrf.mxu1  ;;  %v2501_v4 = vor.u32 %v2500_v30, %v2496_v19  ;;  %v2505_v38 = vrot.slane %v2503_v51, 1  ;;  %v6759_v20 = vsel %vm2689_vm15, %v2698_v7, %v2699_v63  ;;  %v4885_v40 = vld [vmem:[%s7622_s2 + $0x1b0] sm:$0xff] }
 0x145   : > { %7749 = vst [vmem:[#allocation17_spill] sm:$0xff] %v6740_v36  ;;  %3109 = vmatmul.bf16.gmra.mxu1 %v6740_v36  ;;  %v2512_v50 = vrot.slane %v2510_v33, 1  ;;  %v2515_v18 = vshll.u32 %v2427_v61, 16  ;;  %v2702_v52 = vrot.slane %v6708_v22, 1  ;;  %v4893_v22 = vld [vmem:[%s7622_s2 + $0x1f0] sm:$0xff]  ;;  %3868 = vmatpush.bf16.msra.mxu2 %v4885_v40  ;;  %v2522_v49 = vshll.u32 %v5992_v12, 16 }
 0x146   : > { %7750 = vst [vmem:[#allocation18_spill] sm:$0xff] %v6759_v20  ;;  %v6767_v54 = vsel %vm2438_vm0, %v2501_v4, %v2505_v38  ;;  %3957 = vmatpush.bf16.msra.mxu3 %v4893_v22  ;;  %v2428_v26 = vsel %vm5213_vm1, %v7754_v44, 0  ;;  %v2520_v19 = vshrl.u32 %v5992_v12, 16  ;;  %v2705_v7 = vrot.slane %v2426_v16, 1  ;;  %v7758_v16 = vld [vmem:[#allocation7_spill] sm:$0xff] }
 0x147   : > { %7751 = vst [vmem:[#allocation19_spill] sm:$0xff] %v6767_v54  ;;  %v2513_v11 = vor.u32 %v2512_v50, %v2508_v15  ;;  %v6785_v10 = vsel %vm2689_vm15, %v2701_v0, %v2702_v52  ;;  %v2524_v30 = vrot.slane %v2522_v49, 1  ;;  %v2527_v51 = vshll.u32 %v2428_v26, 16  ;;  %v3006_v52 = vpop.f32.mrf.mxu0 }
 0x148   : > { %7752 = vst [vmem:[#allocation20_spill] sm:$0xff] %v6785_v10  ;;  %v2534_v50 = vshll.u32 %v7758_v16, 16  ;;  %v2707_v40 = vrot.slane %v5925_v34, 1  ;;  %v2708_v22 = vrot.slane %v2427_v61, 1  ;;  %v4884_v61 = vld [vmem:[%s7622_s2 + $0x1a8] sm:$0xff] }
 0x149   : > { %v2529_v4 = vrot.slane %v2527_v51, 1  ;;  %3869 = vmatpush.bf16.msra.mxu2 %v4884_v61 }
 0x14a   : > { %v2277_v37 = vld [vmem:[#allocation1] sm:$0xff] }
 0x14b   : > { %v2368_v56 = vshrl.u32 %v2277_v37, 16  ;;  %v2371_v46 = vshll.u32 %v2277_v37, 16  ;;  %v2704_v37 = vrot.slane %v5826_v21, 1 }
 0x14c   : > { %v6771_v47 = vpop.f32.mrf.mxu1 }
 0x14d   : > { %v6756_v45 = vrot.slane %v2368_v56, 7  ;;  %v6821_v38 = vsel %vm2689_vm15, %v2704_v37, %v2705_v7  ;;  %v4892_v37 = vld [vmem:[%s7622_s2 + $0x1e8] sm:$0xff] }
 0x14e   : > { %7755 = vst [vmem:[#allocation6_spill] sm:$0xff] %v6821_v38  ;;  %3958 = vmatpush.bf16.msra.mxu3 %v4892_v37 }
 0x14f   : > { %v2373_v3 = vor.u32 %v2371_v46, %v6756_v45  ;;  %v2525_v46 = vor.u32 %v2524_v30, %v2520_v19  ;;  %v6848_v30 = vsel %vm2689_vm15, %v2707_v40, %v2708_v22  ;;  %v6861_v7 = vpop.f32.mrf.mxu0 }
 0x151   : > { %v6764_v39 = vsel %vm5213_vm1, 0, %v2373_v3  ;;  %v6824_v3 = vsel %vm2438_vm0, %v2525_v46, %v2529_v4  ;;  %v4852_v46 = vld [vmem:[%s7622_s2 + $0xa8] sm:$0xff] }
 0x152   : > { %3193 = vmatmul.bf16.gmra.mxu2 %v6759_v20  ;;  %3080 = vmatmul.bf16.gmra.mxu3 %v6764_v39  ;;  %7756 = vst [vmem:[#allocation22_spill] sm:$0xff] %v6824_v3  ;;  %v4900_v4 = vld [vmem:[%s7622_s2 + $0x228] sm:$0xff] }
 0x153   : > { %3510 = vmatmul.bf16.gmra.mxu0 %v6403_v1  ;;  %v2517_v1 = vrot.slane %v2515_v18, 1  ;;  %v7759_v18 = vld [vmem:[#allocation5_spill] sm:$0xff]  ;;  %3588 = vmatpush.bf16.msra.mxu1 %v4852_v46 }
 0x154   : > { %v6782_v62 = vpop.f32.mrf.mxu1  ;;  %v6838_v0 = vsel %vm5213_vm1, %v7759_v18, 0  ;;  %7761 = vst [vmem:[#allocation5_spill] sm:$0xff] %v6848_v30  ;;  %4047 = vmatpush.bf16.msra.mxu0 %v4900_v4 }
 0x155   : > { %3114 = vmatmul.bf16.gmra.mxu1 %v6767_v54  ;;  %v6788_v29 = vsel %vm2438_vm0, %v2513_v11, %v2517_v1  ;;  %v6798_v24 = vpop.f32.mrf.mxu2  ;;  %v2532_v11 = vshrl.u32 %v7758_v16, 16  ;;  %v2536_v1 = vrot.slane %v2534_v50, 1  ;;  %v7763_v50 = vld [vmem:[#allocation9_spill] sm:$0xff] }
 0x156   : > { %7753 = vst [vmem:[#allocation21_spill] sm:$0xff] %v6788_v29  ;;  %v2546_v18 = vshll.u32 %v7763_v50, 16  ;;  %v2544_v40 = vshrl.u32 %v7763_v50, 16 }
 0x157   : > { %v2537_v44 = vor.u32 %v2536_v1, %v2532_v11  ;;  %v7765_v11 = vld [vmem:[#allocation8_spill] sm:$0xff] }
 0x158   : > { %v6877_v1 = vsel %vm5213_vm1, %v7765_v11, 0  ;;  %v2548_v22 = vrot.slane %v2546_v18, 1 }
 0x15a   : > { %v2549_v37 = vor.u32 %v2548_v22, %v2544_v40  ;;  %v7769_v40 = vld [vmem:[#allocation11_spill] sm:$0xff] }
 0x15b   : > { %v2558_v22 = vshll.u32 %v7769_v40, 16 }
 0x15c   : > { %v6800_v43 = vpop.f32.mrf.mxu1 }
 0x15d   : > { %v6816_v63 = vpop.f32.mrf.mxu2 }
 0x162   : > { %3198 = vmatmul.bf16.gmra.mxu2 %v6785_v10  ;;  %3416 = vmatmul.bf16.vlgmr.msrb.gmra.mxu3 %v7646_v23 }
 0x163   : > { %3515 = vmatmul.bf16.gmra.mxu0 %v6561_v28 }
 0x164   : > { %v6818_v56 = vpop.f32.mrf.mxu1 }
 0x165   : > { %3119 = vmatmul.bf16.gmra.mxu1 %v6788_v29 }
 0x166   : > { %v6828_v33 = vpop.f32.mrf.mxu2 }
 0x167   : > { %7757 = vst [vmem:[#allocation23_spill] sm:$0xff] %v6828_v33 }
 0x16c   : > { %v6830_v15 = vpop.f32.mrf.mxu1 }
 0x16e   : > { %v6843_v25 = vpop.f32.mrf.mxu2 }
 0x16f   : > { %7760 = vst [vmem:[#allocation7_spill] sm:$0xff] %v6843_v25 }
 0x172   : > { %3203 = vmatmul.bf16.gmra.mxu2 %v6821_v38  ;;  %3421 = vmatmul.bf16.gmra.mxu3 %v6162_v13  ;;  %v2539_v13 = vshll.u32 %v6838_v0, 16 }
 0x173   : > { %3520 = vmatmul.bf16.gmra.mxu0 %v6655_v31 }
 0x174   : > { %v2541_v19 = vrot.slane %v2539_v13, 1 }
 0x175   : > { %3124 = vmatmul.bf16.gmra.mxu1 %v6824_v3 }
 0x176   : > { %v6851_v51 = vsel %vm2438_vm0, %v2537_v44, %v2541_v19  ;;  %v2710_v44 = vrot.slane %v5992_v12, 1  ;;  %v2711_v19 = vrot.slane %v2428_v26, 1 }
 0x177   : > { %7762 = vst [vmem:[#allocation24_spill] sm:$0xff] %v6851_v51 }
 0x178   : > { %v6885_v46 = vsel %vm2689_vm15, %v2710_v44, %v2711_v19  ;;  %v2556_v44 = vshrl.u32 %v7769_v40, 16  ;;  %v2560_v19 = vrot.slane %v2558_v22, 1 }
 0x179   : > { %7766 = vst [vmem:[#allocation8_spill] sm:$0xff] %v6885_v46 }
 0x17d   : > { %v3095_v9 = vpop.f32.mrf.mxu1 }
 0x17e   : > { %v6845_v49 = vadd.f32 %v3095_v9, %v3006_v52  ;;  %v6872_v52 = vpop.f32.mrf.mxu2  ;;  %v2551_v9 = vshll.u32 %v6877_v1, 16 }
 0x17f   : > { %7764 = vst [vmem:[#allocation9_spill] sm:$0xff] %v6872_v52  ;;  %v2717_v52 = vrot.slane %v6877_v1, 1  ;;  %v2580_v1 = vshrl.u32 %v6487_v2, 16 }
 0x180   : > { %v2553_v23 = vrot.slane %v2551_v9, 1  ;;  %v7770_v9 = vld [vmem:[#allocation10_spill] sm:$0xff] }
 0x181   : > { %v3011_v61 = vpop.f32.mrf.mxu0 }
 0x182   : > { %3208 = vmatmul.bf16.gmra.mxu2 %v6848_v30  ;;  %3426 = vmatmul.bf16.gmra.mxu3 %v6426_v14  ;;  %v6890_v4 = vsel %vm2438_vm0, %v2549_v37, %v2553_v23  ;;  %v6904_v23 = vsel %vm5213_vm1, %v7770_v9, 0  ;;  %v2561_v30 = vor.u32 %v2560_v19, %v2556_v44  ;;  %v4891_v44 = vld [vmem:[%s7622_s2 + $0x1e0] sm:$0xff] }
 0x183   : > { %3525 = vmatmul.bf16.gmra.mxu0 %v6740_v36  ;;  %7768 = vst [vmem:[#allocation26_spill] sm:$0xff] %v6890_v4  ;;  %v2563_v37 = vshll.u32 %v6904_v23, 16  ;;  %3959 = vmatpush.bf16.msra.mxu3 %v4891_v44 }
 0x185   : > { %3129 = vmatmul.bf16.gmra.mxu1 %v6851_v51  ;;  %v6879_v13 = vpop.f32.mrf.mxu1  ;;  %v2565_v31 = vrot.slane %v2563_v37, 1  ;;  %v7776_v37 = vld [vmem:[#allocation13_spill] sm:$0xff] }
 0x186   : > { %v6887_v36 = vpop.f32.mrf.mxu2 }
 0x187   : > { %7767 = vst [vmem:[#allocation25_spill] sm:$0xff] %v6887_v36  ;;  %v6920_v22 = vsel %vm2438_vm0, %v2561_v30, %v2565_v31  ;;  %v4899_v30 = vld [vmem:[%s7622_s2 + $0x220] sm:$0xff] }
 0x188   : > { %7774 = vst [vmem:[#allocation28_spill] sm:$0xff] %v6920_v22  ;;  %4048 = vmatpush.bf16.msra.mxu0 %v4899_v30 }
 0x189   : > { %v6897_v26 = vpop.f32.mrf.mxu0 }
 0x192   : > { %3213 = vmatmul.bf16.gmra.mxu2 %v6885_v46  ;;  %3431 = vmatmul.bf16.gmra.mxu3 %v6570_v53 }
 0x193   : > { %3530 = vmatmul.bf16.gmra.mxu0 %v6767_v54  ;;  %v2714_v54 = vrot.slane %v6838_v0, 1  ;;  %v4883_v0 = vld [vmem:[%s7622_s2 + $0x1a0] sm:$0xff] }
 0x194   : > { %v3100_v18 = vpop.f32.mrf.mxu1  ;;  %3870 = vmatpush.bf16.msra.mxu2 %v4883_v0  ;;  %v2716_v0 = vrot.slane %v7763_v50, 1 }
 0x195   : > { %v6894_v11 = vadd.f32 %v3100_v18, %v3011_v61  ;;  %3134 = vmatmul.bf16.gmra.mxu1 %v6890_v4  ;;  %v6908_v61 = vpop.f32.mrf.mxu2  ;;  %v2713_v18 = vrot.slane %v7758_v16, 1  ;;  %v3016_v46 = vpop.f32.mrf.mxu0 }
 0x196   : > { %7771 = vst [vmem:[#allocation11_spill] sm:$0xff] %v6908_v61 }
 0x197   : > { %v6915_v28 = vsel %vm2689_vm15, %v2713_v18, %v2714_v54  ;;  %v4851_v54 = vld [vmem:[%s7622_s2 + $0xa0] sm:$0xff]  ;;  %v2570_v18 = vshll.u32 %v7776_v37, 16 }
 0x198   : > { %7773 = vst [vmem:[#allocation27_spill] sm:$0xff] %v6915_v28  ;;  %3589 = vmatpush.bf16.msra.mxu1 %v4851_v54 }
 0x199   : > { %v2572_v61 = vrot.slane %v2570_v18, 1 }
 0x19c   : > { %v6917_v9 = vpop.f32.mrf.mxu1 }
 0x19d   : > { %v6933_v19 = vpop.f32.mrf.mxu2  ;;  %v6936_v31 = vpop.f32.mrf.mxu0 }
 0x19e   : > { %7775 = vst [vmem:[#allocation29_spill] sm:$0xff] %v6933_v19 }
 0x19f   : > { %v6912_v38 = vpop.f32.mrf.mxu3 }
 0x1a0   : > { %7772 = vst [vmem:[#allocation10_spill] sm:$0xff] %v6912_v38  ;;  %v7778_v38 = vld [vmem:[#allocation12_spill] sm:$0xff] }
 0x1a1   : > { %v6948_v19 = vsel %vm5213_vm1, %v7778_v38, 0  ;;  %v6959_v38 = vsel %vm2689_vm15, %v2716_v0, %v2717_v52 }
 0x1a2   : > { %3218 = vmatmul.bf16.gmra.mxu2 %v6915_v28  ;;  %3436 = vmatmul.bf16.gmra.mxu3 %v6664_v32  ;;  %v2575_v36 = vshll.u32 %v6948_v19, 16  ;;  %7780 = vst [vmem:[#allocation30_spill] sm:$0xff] %v6959_v38 }
 0x1a3   : > { %3535 = vmatmul.bf16.gmra.mxu0 %v6788_v29  ;;  %v2568_v29 = vshrl.u32 %v7776_v37, 16 }
 0x1a4   : > { %v2577_v32 = vrot.slane %v2575_v36, 1  ;;  %v3098_v36 = vadd.f32 %v6879_v13, %v6861_v7 }
 0x1a5   : > { %3139 = vmatmul.bf16.gmra.mxu1 %v6920_v22 }
 0x1a7   : > { %v6943_v28 = vpop.f32.mrf.mxu3 }
 0x1a8   : > { %7777 = vst [vmem:[#allocation13_spill] sm:$0xff] %v6943_v28  ;;  %v2573_v28 = vor.u32 %v2572_v61, %v2568_v29  ;;  %v2582_v29 = vshll.u32 %v6487_v2, 16  ;;  %v2720_v61 = vrot.slane %v6904_v23, 1  ;;  %v4882_v23 = vld [vmem:[%s7622_s2 + $0x198] sm:$0xff] }
 0x1a9   : > { %3871 = vmatpush.bf16.msra.mxu2 %v4882_v23 }
 0x1aa   : > { %v6965_v18 = vsel %vm2438_vm0, %v2573_v28, %v2577_v32  ;;  %v6979_v28 = vsel %vm5213_vm1, %v6457_v60, 0  ;;  %v2584_v7 = vrot.slane %v2582_v29, 1 }
 0x1ab   : > { %v2587_v13 = vshll.u32 %v6979_v28, 16 }
 0x1ac   : > { %v3105_v10 = vpop.f32.mrf.mxu1  ;;  %v2585_v0 = vor.u32 %v2584_v7, %v2580_v1  ;;  %v4890_v1 = vld [vmem:[%s7622_s2 + $0x1d8] sm:$0xff] }
 0x1ad   : > { %v6954_v44 = vadd.f32 %v3105_v10, %v3016_v46  ;;  %v3021_v54 = vpop.f32.mrf.mxu0  ;;  %v2719_v46 = vrot.slane %v7769_v40, 1  ;;  %3960 = vmatpush.bf16.msra.mxu3 %v4890_v1 }
 0x1af   : > { %v3184_v25 = vpop.f32.mrf.mxu2  ;;  %v6956_v20 = vpop.f32.mrf.mxu3 }
 0x1b0   : > { %7779 = vst [vmem:[#allocation12_spill] sm:$0xff] %v6956_v20  ;;  %v6962_v30 = vadd.f32 %v3184_v25, %v6845_v49 }
 0x1b2   : > { %3223 = vmatmul.bf16.gmra.mxu2 %v6959_v38  ;;  %3441 = vmatmul.bf16.gmra.mxu3 %v5826_v21 }
 0x1b3   : > { %3540 = vmatmul.bf16.gmra.mxu0 %v6824_v3 }
 0x1b4   : > { %v6983_v49 = vpop.f32.mrf.mxu1 }
 0x1b5   : > { %3144 = vmatmul.bf16.gmra.mxu1 %v6965_v18  ;;  %v3023_v32 = vpop.f32.mrf.mxu0 }
 0x1b7   : > { %v3186_v10 = vpop.f32.mrf.mxu2  ;;  %v6981_v25 = vpop.f32.mrf.mxu3 }
 0x1b8   : > { %v6974_v52 = vadd.f32 %v3186_v10, %v3098_v36  ;;  %7781 = vst [vmem:[#allocation31_spill] sm:$0xff] %v6981_v25  ;;  %v2589_v36 = vrot.slane %v2587_v13, 1  ;;  %v6990_v10 = vsel %vm2689_vm15, %v2719_v46, %v2720_v61  ;;  %v4850_v46 = vld [vmem:[%s7622_s2 + $0x98] sm:$0xff] }
 0x1b9   : > { %7782 = vst [vmem:[#allocation32_spill] sm:$0xff] %v6990_v10  ;;  %v4898_v61 = vld [vmem:[%s7622_s2 + $0x218] sm:$0xff]  ;;  %3590 = vmatpush.bf16.msra.mxu1 %v4850_v46 }
 0x1ba   : > { %v6997_v25 = vsel %vm2438_vm0, %v2585_v0, %v2589_v36  ;;  %4049 = vmatpush.bf16.msra.mxu0 %v4898_v61  ;;  %v2592_v36 = vshrl.u32 %v6585_v55, 16 }
 0x1bf   : > { %v6992_v60 = vpop.f32.mrf.mxu0  ;;  %v6994_v3 = vpop.f32.mrf.mxu3 }
 0x1c0   : > { %7783 = vst [vmem:[#allocation33_spill] sm:$0xff] %v6994_v3 }
 0x1c2   : > { %v3110_v38 = vpop.f32.mrf.mxu1  ;;  %3228 = vmatmul.bf16.gmra.mxu2 %v6990_v10  ;;  %3446 = vmatmul.bf16.gmra.mxu3 %v5925_v34  ;;  %v3103_v10 = vadd.f32 %v6917_v9, %v6897_v26  ;;  %v2606_v9 = vshll.u32 %v6638_v27, 16 }
 0x1c3   : > { %v7001_v29 = vadd.f32 %v3110_v38, %v3021_v54  ;;  %3545 = vmatmul.bf16.gmra.mxu0 %v6851_v51  ;;  %v2594_v54 = vshll.u32 %v6585_v55, 16  ;;  %v7018_v38 = vsel %vm5213_vm1, %v6574_v58, 0  ;;  %v2723_v51 = vrot.slane %v6948_v19, 1 }
 0x1c4   : > { %v2599_v1 = vshll.u32 %v7018_v38, 16 }
 0x1c5   : > { %3149 = vmatmul.bf16.gmra.mxu1 %v6997_v25  ;;  %v3189_v7 = vpop.f32.mrf.mxu2  ;;  %v2596_v23 = vrot.slane %v2594_v54, 1 }
 0x1c6   : > { %v7012_v13 = vadd.f32 %v3189_v7, %v6894_v11  ;;  %v2722_v7 = vrot.slane %v7776_v37, 1  ;;  %v2601_v34 = vrot.slane %v2599_v1, 1 }
 0x1c7   : > { %v7026_v0 = vpop.f32.mrf.mxu0  ;;  %v7036_v3 = vpop.f32.mrf.mxu3  ;;  %v2597_v61 = vor.u32 %v2596_v23, %v2592_v36  ;;  %v2604_v36 = vshrl.u32 %v6638_v27, 16  ;;  %v2608_v23 = vrot.slane %v2606_v9, 1 }
 0x1c8   : > { %7784 = vst [vmem:[#allocation34_spill] sm:$0xff] %v7036_v3  ;;  %v7041_v54 = vsel %vm2689_vm15, %v2722_v7, %v2723_v51  ;;  %v2725_v7 = vrot.slane %v6487_v2, 1 }
 0x1c9   : > { %7785 = vst [vmem:[#allocation35_spill] sm:$0xff] %v7041_v54 }
 0x1ca   : > { %v3112_v11 = vpop.f32.mrf.mxu1 }
 0x1cb   : > { %v7030_v58 = vadd.f32 %v3112_v11, %v3023_v32  ;;  %v7048_v11 = vsel %vm2438_vm0, %v2597_v61, %v2601_v34  ;;  %v7063_v34 = vsel %vm5213_vm1, %v6611_v6, 0  ;;  %v3108_v61 = vadd.f32 %v6983_v49, %v6936_v31  ;;  %v4881_v31 = vld [vmem:[%s7622_s2 + $0x190] sm:$0xff] }
 0x1cc   : > { %v2611_v1 = vshll.u32 %v7063_v34, 16  ;;  %3872 = vmatpush.bf16.msra.mxu2 %v4881_v31 }
 0x1cd   : > { %v3191_v20 = vpop.f32.mrf.mxu2 }
 0x1ce   : > { %v7038_v46 = vadd.f32 %v3191_v20, %v3103_v10 }
 0x1d0   : > { %v7043_v21 = vpop.f32.mrf.mxu0 }
 0x1d2   : > { %v7045_v32 = vpop.f32.mrf.mxu1  ;;  %3233 = vmatmul.bf16.gmra.mxu2 %v7041_v54  ;;  %3451 = vmatmul.bf16.gmra.mxu3 %v5992_v12  ;;  %v2609_v54 = vor.u32 %v2608_v23, %v2604_v36  ;;  %v2618_v36 = vshll.u32 %v6692_v59, 16 }
 0x1d3   : > { %3550 = vmatmul.bf16.gmra.mxu0 %v6890_v4 }
 0x1d5   : > { %3154 = vmatmul.bf16.gmra.mxu1 %v7048_v11  ;;  %v3194_v20 = vpop.f32.mrf.mxu2  ;;  %v7054_v26 = vpop.f32.mrf.mxu3 }
 0x1d6   : > { %7786 = vst [vmem:[#allocation36_spill] sm:$0xff] %v7054_v26  ;;  %v7057_v51 = vadd.f32 %v3194_v20, %v6954_v44  ;;  %v2726_v44 = vrot.slane %v6979_v28, 1  ;;  %v2613_v26 = vrot.slane %v2611_v1, 1  ;;  %v4889_v28 = vld [vmem:[%s7622_s2 + $0x1d0] sm:$0xff]  ;;  %v7107_v1 = vsel %vm5213_vm1, %v6682_v17, 0 }
 0x1d7   : > { %3961 = vmatpush.bf16.msra.mxu3 %v4889_v28  ;;  %v2616_v17 = vshrl.u32 %v6692_v59, 16  ;;  %v2623_v31 = vshll.u32 %v7107_v1, 16  ;;  %v2728_v28 = vrot.slane %v6585_v55, 1 }
 0x1d8   : > { %v7065_v19 = vpop.f32.mrf.mxu0  ;;  %v7080_v3 = vsel %vm2689_vm15, %v2725_v7, %v2726_v44  ;;  %v7087_v33 = vsel %vm2438_vm0, %v2609_v54, %v2613_v26  ;;  %v4849_v7 = vld [vmem:[%s7622_s2 + $0x90] sm:$0xff] }
 0x1d9   : > { %7788 = vst [vmem:[#allocation38_spill] sm:$0xff] %v7080_v3  ;;  %v4897_v44 = vld [vmem:[%s7622_s2 + $0x210] sm:$0xff]  ;;  %3591 = vmatpush.bf16.msra.mxu1 %v4849_v7 }
 0x1da   : > { %v7067_v10 = vpop.f32.mrf.mxu1  ;;  %4050 = vmatpush.bf16.msra.mxu0 %v4897_v44  ;;  %v2625_v44 = vrot.slane %v2623_v31, 1  ;;  %v7156_v31 = vsel %vm5213_vm1, %v6756_v45, 0  ;;  %v2732_v45 = vrot.slane %v7063_v34, 1 }
 0x1dd   : > { %v3196_v20 = vpop.f32.mrf.mxu2  ;;  %v7075_v4 = vpop.f32.mrf.mxu3 }
 0x1de   : > { %7787 = vst [vmem:[#allocation37_spill] sm:$0xff] %v7075_v4  ;;  %v7077_v6 = vadd.f32 %v3196_v20, %v3108_v61  ;;  %v2620_v20 = vrot.slane %v2618_v36, 1 }
 0x1e0   : > { %v7082_v9 = vpop.f32.mrf.mxu0  ;;  %v2621_v7 = vor.u32 %v2620_v20, %v2616_v17  ;;  %v2630_v17 = vshll.u32 %v6764_v39, 16 }
 0x1e2   : > { %v7084_v12 = vpop.f32.mrf.mxu1  ;;  %3238 = vmatmul.bf16.gmra.mxu2 %v7080_v3  ;;  %3456 = vmatmul.bf16.gmra.mxu3 %v7758_v16 }
 0x1e3   : > { %3555 = vmatmul.bf16.gmra.mxu0 %v6920_v22 }
 0x1e5   : > { %3159 = vmatmul.bf16.gmra.mxu1 %v7087_v33  ;;  %v3199_v49 = vpop.f32.mrf.mxu2  ;;  %v3417_v54 = vpop.f32.mrf.mxu3 }
 0x1e6   : > { %v7100_v26 = vadd.f32 %v3199_v49, %v7001_v29  ;;  %v3418_v23 = vadd.f32 %v3417_v54, %v6962_v30  ;;  %v2729_v49 = vrot.slane %v7018_v38, 1  ;;  %v7141_v38 = vsel %vm2438_vm0, %v2621_v7, %v2625_v44 }
 0x1e7   : > { %v2635_v7 = vshll.u32 %v7156_v31, 16  ;;  %v3118_v44 = vadd.f32 %v7067_v10, %v6734_v5 }
 0x1e8   : > { %v7115_v29 = vpop.f32.mrf.mxu0  ;;  %v7118_v61 = vadd.f32 %v6992_v60, %v3418_v23  ;;  %v7131_v23 = vsel %vm2689_vm15, %v2728_v28, %v2729_v49 }
 0x1ea   : > { %7789 = vst [vmem:[#allocation39_spill] sm:$0xff] %v7118_v61  ;;  %v7120_v30 = vpop.f32.mrf.mxu1 }
 0x1ed   : > { %v3201_v54 = vpop.f32.mrf.mxu2  ;;  %v3419_v22 = vpop.f32.mrf.mxu3 }
 0x1ee   : > { %v7127_v3 = vadd.f32 %v3201_v54, %v7030_v58  ;;  %v3420_v60 = vadd.f32 %v3419_v22, %v6974_v52  ;;  %v3116_v22 = vadd.f32 %v7045_v32, %v6685_v41  ;;  %v4848_v41 = vld [vmem:[%s7622_s2 + $0x88] sm:$0xff]  ;;  %v2628_v54 = vshrl.u32 %v6764_v39, 16 }
 0x1ef   : > { %3592 = vmatpush.bf16.msra.mxu1 %v4848_v41  ;;  %v7181_v41 = vsel %vm2689_vm15, %v2731_v48, %v2732_v45 }
 0x1f0   : > { %v7133_v61 = vpop.f32.mrf.mxu0  ;;  %v7136_v36 = vadd.f32 %v7026_v0, %v3420_v60 }
 0x1f2   : > { %v7138_v4 = vpop.f32.mrf.mxu1  ;;  %3243 = vmatmul.bf16.gmra.mxu2 %v7131_v23  ;;  %3461 = vmatmul.bf16.gmra.mxu3 %v7763_v50 }
 0x1f3   : > { %3560 = vmatmul.bf16.gmra.mxu0 %v6965_v18 }
 0x1f5   : > { %3164 = vmatmul.bf16.gmra.mxu1 %v7141_v38  ;;  %v3204_v52 = vpop.f32.mrf.mxu2  ;;  %v3422_v58 = vpop.f32.mrf.mxu3 }
 0x1f6   : > { %v7149_v0 = vadd.f32 %v3204_v52, %v3116_v22  ;;  %v3423_v20 = vadd.f32 %v3422_v58, %v7012_v13  ;;  %v2632_v13 = vrot.slane %v2630_v17, 1  ;;  %v2637_v58 = vrot.slane %v2635_v7, 1 }
 0x1f8   : > { %v7161_v32 = vpop.f32.mrf.mxu0  ;;  %v7164_v28 = vadd.f32 %v7043_v21, %v3423_v20  ;;  %v2633_v21 = vor.u32 %v2632_v13, %v2628_v54  ;;  %v4847_v20 = vld [vmem:[%s7622_s2 + $0x80] sm:$0xff]  ;;  %v4888_v54 = vld [vmem:[%s7622_s2 + $0x1c8] sm:$0xff] }
 0x1f9   : > { %3593 = vmatpush.bf16.msra.mxu1 %v4847_v20  ;;  %3962 = vmatpush.bf16.msra.mxu3 %v4888_v54  ;;  %v3123_v20 = vadd.f32 %v7120_v30, %v6771_v47  ;;  %v3126_v47 = vadd.f32 %v7138_v4, %v6782_v62 }
 0x1fa   : > { %v7166_v49 = vpop.f32.mrf.mxu1 }
 0x1fb   : > { %v3128_v62 = vadd.f32 %v7166_v49, %v6800_v43  ;;  %v4879_v43 = vld [vmem:[%s7622_s2 + $0x180] sm:$0xff] }
 0x1fd   : > { %v3206_v60 = vpop.f32.mrf.mxu2  ;;  %v3424_v22 = vpop.f32.mrf.mxu3 }
 0x1fe   : > { %v7174_v52 = vadd.f32 %v3206_v60, %v3118_v44  ;;  %v3425_v17 = vadd.f32 %v3424_v22, %v7038_v46  ;;  %v7189_v44 = vsel %vm2438_vm0, %v2633_v21, %v2637_v58  ;;  %v4880_v46 = vld [vmem:[%s7622_s2 + $0x188] sm:$0xff]  ;;  %v2734_v21 = vrot.slane %v6692_v59, 1 }
 0x1ff   : > { %7790 = vst [vmem:[#allocation40_spill] sm:$0xff] %v7189_v44  ;;  %3873 = vmatpush.bf16.msra.mxu2 %v4880_v46  ;;  %v4896_v60 = vld [vmem:[%s7622_s2 + $0x208] sm:$0xff]  ;;  %v2735_v58 = vrot.slane %v7107_v1, 1 }
 0x200   : > { %v7183_v34 = vpop.f32.mrf.mxu0  ;;  %v7186_v5 = vadd.f32 %v7065_v19, %v3425_v17  ;;  %v3121_v19 = vadd.f32 %v7084_v12, %v6754_v8  ;;  %4051 = vmatpush.bf16.msra.mxu0 %v4896_v60 }
 0x202   : > { %v3130_v10 = vpop.f32.mrf.mxu1  ;;  %3248 = vmatmul.bf16.gmra.mxu2 %v7181_v41  ;;  %3466 = vmatmul.bf16.gmra.mxu3 %v7769_v40 }
 0x203   : > { %3565 = vmatmul.bf16.gmra.mxu0 %v6997_v25  ;;  %3874 = vmatpush.bf16.msra.mxu2 %v4879_v43 }
 0x205   : > { %3169 = vmatmul.bf16.gmra.mxu1 %v7189_v44  ;;  %v3209_v13 = vpop.f32.mrf.mxu2  ;;  %v3427_v7 = vpop.f32.mrf.mxu3  ;;  %v7803_v44 = vld [vmem:[#allocation14_spill] sm:$0xff] }
 0x206   : > { %v7203_v48 = vadd.f32 %v3209_v13, %v3121_v19  ;;  %v3428_v45 = vadd.f32 %v3427_v7, %v7057_v51  ;;  %v7220_v19 = vsel %vm2689_vm15, %v2734_v21, %v2735_v58  ;;  %v2737_v58 = vrot.slane %v6764_v39, 1 }
 0x208   : > { %v3528_v22 = vpop.f32.mrf.mxu0  ;;  %v7210_v12 = vadd.f32 %v7082_v9, %v3428_v45 }
 0x20a   : > { %v3132_v8 = vpop.f32.mrf.mxu1 }
 0x20d   : > { %v3211_v17 = vpop.f32.mrf.mxu2  ;;  %v3429_v46 = vpop.f32.mrf.mxu3 }
 0x20e   : > { %v7216_v51 = vadd.f32 %v3211_v17, %v3123_v20  ;;  %v3430_v54 = vadd.f32 %v3429_v46, %v7077_v6  ;;  %v2738_v20 = vrot.slane %v7156_v31, 1  ;;  %v3131_v31 = vadd.f32 %v3130_v10, %v6818_v56 }
 0x210   : > { %v3531_v13 = vpop.f32.mrf.mxu0  ;;  %v7223_v9 = vadd.f32 %v7115_v29, %v3430_v54 }
 0x212   : > { %v3135_v7 = vpop.f32.mrf.mxu1  ;;  %3253 = vmatmul.bf16.gmra.mxu2 %v7220_v19  ;;  %3471 = vmatmul.bf16.gmra.mxu3 %v7776_v37 }
 0x213   : > { %3570 = vmatmul.bf16.gmra.mxu0 %v7048_v11 }
 0x215   : > { %3594 = vmatmul.bf16.vlgmr.msra.gmra.mxu1 %v6726_v35  ;;  %v3214_v6 = vpop.f32.mrf.mxu2  ;;  %v3432_v1 = vpop.f32.mrf.mxu3 }
 0x216   : > { %v7231_v30 = vadd.f32 %v3214_v6, %v3126_v47  ;;  %v3433_v45 = vadd.f32 %v3432_v1, %v7100_v26  ;;  %v7245_v26 = vsel %vm2689_vm15, %v2737_v58, %v2738_v20  ;;  %v4895_v58 = vld [vmem:[%s7622_s2 + $0x200] sm:$0xff] }
 0x217   : > { %4052 = vmatpush.bf16.msra.mxu0 %v4895_v58 }
 0x218   : > { %v3533_v29 = vpop.f32.mrf.mxu0  ;;  %v7235_v60 = vadd.f32 %v7133_v61, %v3433_v45 }
 0x21a   : > { %v3137_v21 = vpop.f32.mrf.mxu1 }
 0x21d   : > { %v3216_v4 = vpop.f32.mrf.mxu2  ;;  %v3434_v17 = vpop.f32.mrf.mxu3 }
 0x21e   : > { %v7241_v46 = vadd.f32 %v3216_v4, %v3128_v62  ;;  %v3435_v54 = vadd.f32 %v3434_v17, %v7127_v3  ;;  %v4887_v3 = vld [vmem:[%s7622_s2 + $0x1c0] sm:$0xff] }
 0x21f   : > { %3963 = vmatpush.bf16.msra.mxu3 %v4887_v3 }
 0x220   : > { %v3536_v47 = vpop.f32.mrf.mxu0  ;;  %v7248_v61 = vadd.f32 %v7161_v32, %v3435_v54 }
 0x222   : > { %v3140_v6 = vpop.f32.mrf.mxu1  ;;  %3258 = vmatmul.bf16.gmra.mxu2 %v7245_v26  ;;  %3476 = vmatmul.bf16.gmra.mxu3 %v6487_v2 }
 0x223   : > { %3575 = vmatmul.bf16.gmra.mxu0 %v7087_v33 }
 0x225   : > { %3599 = vmatmul.bf16.gmra.mxu1 %v6641_v57  ;;  %v3219_v32 = vpop.f32.mrf.mxu2  ;;  %v3437_v49 = vpop.f32.mrf.mxu3  ;;  %v3133_v57 = vadd.f32 %v3132_v8, %v6830_v15 }
 0x226   : > { %v7261_v1 = vadd.f32 %v3219_v32, %v3131_v31  ;;  %v3438_v45 = vadd.f32 %v3437_v49, %v7149_v0  ;;  %v3136_v31 = vadd.f32 %v3135_v7, %v6798_v24 }
 0x228   : > { %v3538_v20 = vpop.f32.mrf.mxu0  ;;  %v7268_v56 = vadd.f32 %v7183_v34, %v3438_v45  ;;  %v3138_v45 = vadd.f32 %v3137_v21, %v6816_v63 }
 0x22a   : > { %v3142_v10 = vpop.f32.mrf.mxu1 }
 0x22d   : > { %v3221_v62 = vpop.f32.mrf.mxu2  ;;  %v3439_v4 = vpop.f32.mrf.mxu3 }
 0x22e   : > { %v3222_v17 = vadd.f32 %v3221_v62, %v3133_v57  ;;  %v3440_v54 = vadd.f32 %v3439_v4, %v7174_v52 }
 0x230   : > { %v3541_v43 = vpop.f32.mrf.mxu0  ;;  %v7272_v3 = vadd.f32 %v3528_v22, %v3440_v54 }
 0x232   : > { %v3145_v0 = vpop.f32.mrf.mxu1  ;;  %3875 = vmatmul.bf16.vlgmr.msra.gmra.mxu2 %v6426_v14  ;;  %3481 = vmatmul.bf16.gmra.mxu3 %v6585_v55 }
 0x233   : > { %3580 = vmatmul.bf16.gmra.mxu0 %v7141_v38 }
 0x235   : > { %3604 = vmatmul.bf16.gmra.mxu1 %v6722_v42  ;;  %v3224_v15 = vpop.f32.mrf.mxu2  ;;  %v3442_v34 = vpop.f32.mrf.mxu3 }
 0x236   : > { %v3225_v8 = vadd.f32 %v3224_v15, %v3136_v31  ;;  %v3443_v32 = vadd.f32 %v3442_v34, %v7203_v48  ;;  %v7791_v48 = vld [vmem:[#allocation23_spill] sm:$0xff] }
 0x237   : > { %v3141_v54 = vadd.f32 %v3140_v6, %v7791_v48  ;;  %v7796_v48 = vld [vmem:[#allocation16_spill] sm:$0xff] }
 0x238   : > { %v3543_v52 = vpop.f32.mrf.mxu0  ;;  %v7280_v49 = vadd.f32 %v3531_v13, %v3443_v32  ;;  %v7792_v13 = vld [vmem:[#allocation18_spill] sm:$0xff] }
 0x23a   : > { %v3147_v22 = vpop.f32.mrf.mxu1 }
 0x23d   : > { %v3226_v14 = vpop.f32.mrf.mxu2  ;;  %v3444_v58 = vpop.f32.mrf.mxu3 }
 0x23e   : > { %v3227_v57 = vadd.f32 %v3226_v14, %v3138_v45  ;;  %v3445_v24 = vadd.f32 %v3444_v58, %v7216_v51 }
 0x240   : > { %v3546_v7 = vpop.f32.mrf.mxu0  ;;  %v7284_v62 = vadd.f32 %v3533_v29, %v3445_v24  ;;  %v7794_v29 = vld [vmem:[#allocation7_spill] sm:$0xff] }
 0x241   : > { %v3143_v32 = vadd.f32 %v3142_v10, %v7794_v29 }
 0x242   : > { %3880 = vmatmul.bf16.gmra.mxu2 %v6570_v53  ;;  %3486 = vmatmul.bf16.gmra.mxu3 %v6638_v27  ;;  %v3150_v4 = vpop.f32.mrf.mxu1 }
 0x243   : > { %4053 = vmatmul.bf16.vlgmr.msra.gmra.mxu0 %v6722_v42 }
 0x245   : > { %3609 = vmatmul.bf16.gmra.mxu1 %v7792_v13  ;;  %v3229_v63 = vpop.f32.mrf.mxu2  ;;  %v3447_v21 = vpop.f32.mrf.mxu3 }
 0x246   : > { %v3230_v31 = vadd.f32 %v3229_v63, %v3141_v54  ;;  %v3448_v15 = vadd.f32 %v3447_v21, %v7231_v30  ;;  %v7797_v54 = vld [vmem:[#allocation9_spill] sm:$0xff] }
 0x247   : > { %v3146_v30 = vadd.f32 %v3145_v0, %v7797_v54 }
 0x248   : > { %v3548_v51 = vpop.f32.mrf.mxu0  ;;  %v7292_v34 = vadd.f32 %v3536_v47, %v3448_v15  ;;  %v7798_v47 = vld [vmem:[#allocation20_spill] sm:$0xff] }
 0x24a   : > { %7793 = vst [vmem:[#allocation23_spill] sm:$0xff] %v7292_v34  ;;  %v3152_v53 = vpop.f32.mrf.mxu1  ;;  %v7802_v34 = vld [vmem:[#allocation2_spill] sm:$0xff] }
 0x24d   : > { %v3231_v45 = vpop.f32.mrf.mxu2  ;;  %v3449_v14 = vpop.f32.mrf.mxu3 }
 0x24e   : > { %v3232_v58 = vadd.f32 %v3231_v45, %v3143_v32  ;;  %v3450_v6 = vadd.f32 %v3449_v14, %v7241_v46 }
 0x250   : > { %v3551_v24 = vpop.f32.mrf.mxu0  ;;  %v7296_v42 = vadd.f32 %v3538_v20, %v3450_v6  ;;  %v7800_v20 = vld [vmem:[#allocation25_spill] sm:$0xff] }
 0x251   : > { %v3148_v45 = vadd.f32 %v3147_v22, %v7800_v20 }
 0x252   : > { %7795 = vst [vmem:[#allocation18_spill] sm:$0xff] %v7296_v42  ;;  %3885 = vmatmul.bf16.gmra.mxu2 %v7796_v48  ;;  %3491 = vmatmul.bf16.gmra.mxu3 %v6692_v59  ;;  %v3155_v29 = vpop.f32.mrf.mxu1 }
 0x253   : > { %4058 = vmatmul.bf16.gmra.mxu0 %v7792_v13 }
 0x255   : > { %3614 = vmatmul.bf16.gmra.mxu1 %v7798_v47  ;;  %v3234_v10 = vpop.f32.mrf.mxu2  ;;  %v3452_v63 = vpop.f32.mrf.mxu3 }
 0x256   : > { %v3235_v21 = vadd.f32 %v3234_v10, %v3146_v30  ;;  %v3453_v15 = vadd.f32 %v3452_v63, %v7261_v1  ;;  %v7804_v30 = vld [vmem:[#allocation11_spill] sm:$0xff] }
 0x257   : > { %v3151_v1 = vadd.f32 %v3150_v4, %v7804_v30  ;;  %v7810_v30 = vld [vmem:[#allocation15_spill] sm:$0xff] }
 0x258   : > { %v3553_v46 = vpop.f32.mrf.mxu0  ;;  %v7304_v32 = vadd.f32 %v3541_v43, %v3453_v15  ;;  %v7805_v43 = vld [vmem:[#allocation6_spill] sm:$0xff] }
 0x25a   : > { %7799 = vst [vmem:[#allocation7_spill] sm:$0xff] %v7304_v32  ;;  %v3157_v0 = vpop.f32.mrf.mxu1  ;;  %v7811_v32 = vld [vmem:[#allocation10_spill] sm:$0xff] }
 0x25d   : > { %v3236_v14 = vpop.f32.mrf.mxu2  ;;  %v3454_v6 = vpop.f32.mrf.mxu3 }
 0x25e   : > { %v3237_v48 = vadd.f32 %v3236_v14, %v3148_v45  ;;  %v3455_v42 = vadd.f32 %v3454_v6, %v3222_v17 }
 0x260   : > { %v3556_v54 = vpop.f32.mrf.mxu0  ;;  %v7307_v13 = vadd.f32 %v3543_v52, %v3455_v42  ;;  %v7807_v52 = vld [vmem:[#allocation29_spill] sm:$0xff] }
 0x261   : > { %v3153_v42 = vadd.f32 %v3152_v53, %v7807_v52 }
 0x262   : > { %7801 = vst [vmem:[#allocation16_spill] sm:$0xff] %v7307_v13  ;;  %3890 = vmatmul.bf16.gmra.mxu2 %v7802_v34  ;;  %3964 = vmatmul.bf16.vlgmr.msra.gmra.mxu3 %v7803_v44  ;;  %v3160_v45 = vpop.f32.mrf.mxu1 }
 0x263   : > { %4063 = vmatmul.bf16.gmra.mxu0 %v7798_v47  ;;  %v7809_v47 = vld [vmem:[#allocation4_spill] sm:$0xff] }
 0x265   : > { %3619 = vmatmul.bf16.gmra.mxu1 %v7805_v43  ;;  %v3239_v10 = vpop.f32.mrf.mxu2  ;;  %v3457_v22 = vpop.f32.mrf.mxu3 }
 0x266   : > { %v3240_v63 = vadd.f32 %v3239_v10, %v3151_v1  ;;  %v3458_v15 = vadd.f32 %v3457_v22, %v3225_v8  ;;  %v3156_v1 = vadd.f32 %v3155_v29, %v7811_v32 }
 0x268   : > { %v3558_v20 = vpop.f32.mrf.mxu0  ;;  %v7314_v17 = vadd.f32 %v3546_v7, %v3458_v15  ;;  %v7812_v7 = vld [vmem:[#allocation5_spill] sm:$0xff] }
 0x26a   : > { %7806 = vst [vmem:[#allocation9_spill] sm:$0xff] %v7314_v17  ;;  %v3162_v8 = vpop.f32.mrf.mxu1  ;;  %v7816_v17 = vld [vmem:[#allocation12_spill] sm:$0xff] }
 0x26d   : > { %v3241_v14 = vpop.f32.mrf.mxu2  ;;  %v3459_v34 = vpop.f32.mrf.mxu3 }
 0x26e   : > { %v3242_v6 = vadd.f32 %v3241_v14, %v3153_v42  ;;  %v3460_v44 = vadd.f32 %v3459_v34, %v3227_v57 }
 0x270   : > { %v3561_v13 = vpop.f32.mrf.mxu0  ;;  %v7317_v4 = vadd.f32 %v3548_v51, %v3460_v44  ;;  %v7813_v51 = vld [vmem:[#allocation13_spill] sm:$0xff] }
 0x271   : > { %v3158_v42 = vadd.f32 %v3157_v0, %v7813_v51 }
 0x272   : > { %7808 = vst [vmem:[#allocation20_spill] sm:$0xff] %v7317_v4  ;;  %3895 = vmatmul.bf16.gmra.mxu2 %v7809_v47  ;;  %3969 = vmatmul.bf16.gmra.mxu3 %v7810_v30  ;;  %v3165_v30 = vpop.f32.mrf.mxu1  ;;  %v7815_v4 = vld [vmem:[#allocation17_spill] sm:$0xff] }
 0x273   : > { %4068 = vmatmul.bf16.gmra.mxu0 %v7805_v43  ;;  %v7814_v43 = vld [vmem:[#allocation3_spill] sm:$0xff] }
 0x275   : > { %3624 = vmatmul.bf16.gmra.mxu1 %v7812_v7  ;;  %v3244_v10 = vpop.f32.mrf.mxu2  ;;  %v3462_v53 = vpop.f32.mrf.mxu3 }
 0x276   : > { %v3245_v22 = vadd.f32 %v3244_v10, %v3156_v1  ;;  %v3463_v15 = vadd.f32 %v3462_v53, %v3230_v31  ;;  %v3161_v1 = vadd.f32 %v3160_v45, %v7816_v17  ;;  %v7817_v31 = vld [vmem:[#allocation8_spill] sm:$0xff] }
 0x278   : > { %v3563_v52 = vpop.f32.mrf.mxu0  ;;  %v7324_v57 = vadd.f32 %v3551_v24, %v3463_v15 }
 0x27a   : > { %v3167_v15 = vpop.f32.mrf.mxu1 }
 0x27d   : > { %v3246_v14 = vpop.f32.mrf.mxu2  ;;  %v3464_v34 = vpop.f32.mrf.mxu3 }
 0x27e   : > { %v3247_v44 = vadd.f32 %v3246_v14, %v3158_v42  ;;  %v3465_v47 = vadd.f32 %v3464_v34, %v3232_v58 }
 0x280   : > { %v3566_v29 = vpop.f32.mrf.mxu0  ;;  %v7327_v32 = vadd.f32 %v3553_v46, %v3465_v47  ;;  %v7818_v46 = vld [vmem:[#allocation31_spill] sm:$0xff] }
 0x281   : > { %v3163_v42 = vadd.f32 %v3162_v8, %v7818_v46 }
 0x282   : > { %3900 = vmatmul.bf16.gmra.mxu2 %v7814_v43  ;;  %3974 = vmatmul.bf16.gmra.mxu3 %v7815_v4  ;;  %v3170_v45 = vpop.f32.mrf.mxu1 }
 0x283   : > { %4073 = vmatmul.bf16.gmra.mxu0 %v7812_v7  ;;  %v7820_v7 = vld [vmem:[#allocation19_spill] sm:$0xff] }
 0x285   : > { %3629 = vmatmul.bf16.gmra.mxu1 %v7817_v31  ;;  %v3249_v24 = vpop.f32.mrf.mxu2  ;;  %v3467_v0 = vpop.f32.mrf.mxu3 }
 0x286   : > { %v3250_v10 = vadd.f32 %v3249_v24, %v3161_v1  ;;  %v3468_v53 = vadd.f32 %v3467_v0, %v3235_v21  ;;  %v7821_v1 = vld [vmem:[#allocation33_spill] sm:$0xff] }
 0x287   : > { %v3166_v21 = vadd.f32 %v3165_v30, %v7821_v1  ;;  %v7825_v1 = vld [vmem:[#allocation36_spill] sm:$0xff] }
 0x288   : > { %v3568_v58 = vpop.f32.mrf.mxu0  ;;  %v7334_v51 = vadd.f32 %v3556_v54, %v3468_v53  ;;  %v7822_v54 = vld [vmem:[#allocation27_spill] sm:$0xff] }
 0x28d   : > { %v3251_v14 = vpop.f32.mrf.mxu2  ;;  %v3469_v34 = vpop.f32.mrf.mxu3 }
 0x28e   : > { %v3252_v47 = vadd.f32 %v3251_v14, %v3163_v42  ;;  %v3470_v4 = vadd.f32 %v3469_v34, %v3237_v48  ;;  %v3172_v14 = vpop.f32.mrf.mxu1 }
 0x290   : > { %v3571_v43 = vpop.f32.mrf.mxu0  ;;  %v7337_v17 = vadd.f32 %v3558_v20, %v3470_v4  ;;  %v7823_v20 = vld [vmem:[#allocation34_spill] sm:$0xff] }
 0x291   : > { %v3168_v42 = vadd.f32 %v3167_v15, %v7823_v20 }
 0x292   : > { %7819 = vst [vmem:[#allocation25_spill] sm:$0xff] %v7337_v17  ;;  %3905 = vmatmul.bf16.gmra.mxu2 %v7758_v16  ;;  %3979 = vmatmul.bf16.gmra.mxu3 %v7820_v7 }
 0x293   : > { %4078 = vmatmul.bf16.gmra.mxu0 %v7817_v31  ;;  %v7824_v31 = vld [vmem:[#allocation21_spill] sm:$0xff] }
 0x295   : > { %3634 = vmatmul.bf16.gmra.mxu1 %v7822_v54  ;;  %v3254_v24 = vpop.f32.mrf.mxu2  ;;  %v3472_v8 = vpop.f32.mrf.mxu3 }
 0x296   : > { %v3255_v0 = vadd.f32 %v3254_v24, %v3166_v21  ;;  %v3473_v53 = vadd.f32 %v3472_v8, %v3240_v63  ;;  %v3171_v21 = vadd.f32 %v3170_v45, %v7825_v1  ;;  %v7354_v8 = vpop.f32.mrf.mxu1  ;;  %v7828_v1 = vld [vmem:[#allocation22_spill] sm:$0xff] }
 0x298   : > { %v3573_v46 = vpop.f32.mrf.mxu0  ;;  %v7344_v48 = vadd.f32 %v3561_v13, %v3473_v53  ;;  %v7826_v13 = vld [vmem:[#allocation30_spill] sm:$0xff] }
 0x29d   : > { %v3256_v16 = vpop.f32.mrf.mxu2  ;;  %v3474_v34 = vpop.f32.mrf.mxu3 }
 0x29e   : > { %v3257_v4 = vadd.f32 %v3256_v16, %v3168_v42  ;;  %v3475_v7 = vadd.f32 %v3474_v34, %v3242_v6  ;;  %v7359_v45 = vpop.f32.mrf.mxu1 }
 0x2a0   : > { %v3576_v17 = vpop.f32.mrf.mxu0  ;;  %v7347_v30 = vadd.f32 %v3563_v52, %v3475_v7  ;;  %v7827_v52 = vld [vmem:[#allocation37_spill] sm:$0xff] }
 0x2a1   : > { %v3173_v42 = vadd.f32 %v3172_v14, %v7827_v52 }
 0x2a2   : > { %3910 = vmatmul.bf16.gmra.mxu2 %v7763_v50  ;;  %3984 = vmatmul.bf16.gmra.mxu3 %v7824_v31 }
 0x2a3   : > { %4083 = vmatmul.bf16.gmra.mxu0 %v7822_v54 }
 0x2a5   : > { %3639 = vmatmul.bf16.gmra.mxu1 %v7826_v13  ;;  %v3259_v63 = vpop.f32.mrf.mxu2  ;;  %v3477_v15 = vpop.f32.mrf.mxu3 }
 0x2a6   : > { %v3260_v24 = vadd.f32 %v3259_v63, %v3171_v21  ;;  %v3478_v53 = vadd.f32 %v3477_v15, %v3245_v22  ;;  %v7829_v22 = vld [vmem:[#allocation32_spill] sm:$0xff]  ;;  %v7369_v15 = vpop.f32.mrf.mxu1 }
 0x2a8   : > { %v3578_v6 = vpop.f32.mrf.mxu0  ;;  %v7356_v20 = vadd.f32 %v3566_v29, %v3478_v53 }
 0x2ad   : > { %v3261_v50 = vpop.f32.mrf.mxu2  ;;  %v3479_v16 = vpop.f32.mrf.mxu3 }
 0x2ae   : > { %v3262_v34 = vadd.f32 %v3261_v50, %v3173_v42  ;;  %v3480_v7 = vadd.f32 %v3479_v16, %v3247_v44 }
 0x2b0   : > { %v3581_v54 = vpop.f32.mrf.mxu0  ;;  %v7361_v31 = vadd.f32 %v3568_v58, %v3480_v7 }
 0x2b2   : > { %3915 = vmatmul.bf16.gmra.mxu2 %v7769_v40  ;;  %3989 = vmatmul.bf16.gmra.mxu3 %v7828_v1  ;;  %v7830_v40 = vld [vmem:[#allocation24_spill] sm:$0xff] }
 0x2b3   : > { %4088 = vmatmul.bf16.gmra.mxu0 %v7826_v13  ;;  %v7376_v13 = vpop.f32.mrf.mxu1 }
 0x2b5   : > { %3644 = vmatmul.bf16.gmra.mxu1 %v7829_v22  ;;  %v3482_v29 = vpop.f32.mrf.mxu3  ;;  %v3876_v53 = vpop.f32.mrf.mxu2 }
 0x2b6   : > { %v3483_v21 = vadd.f32 %v3482_v29, %v3250_v10  ;;  %v7831_v10 = vld [vmem:[#allocation35_spill] sm:$0xff] }
 0x2b8   : > { %v3583_v14 = vpop.f32.mrf.mxu0  ;;  %v7367_v63 = vadd.f32 %v3571_v43, %v3483_v21 }
 0x2bd   : > { %v3484_v44 = vpop.f32.mrf.mxu3  ;;  %v3878_v50 = vpop.f32.mrf.mxu2 }
 0x2be   : > { %v3485_v52 = vadd.f32 %v3484_v44, %v3252_v47 }
 0x2c0   : > { %v4054_v58 = vpop.f32.mrf.mxu0  ;;  %v7371_v42 = vadd.f32 %v3573_v46, %v3485_v52  ;;  %v7381_v46 = vpop.f32.mrf.mxu1  ;;  %v7834_v52 = vld [vmem:[#allocation38_spill] sm:$0xff] }
 0x2c2   : > { %3920 = vmatmul.bf16.gmra.mxu2 %v7776_v37  ;;  %3994 = vmatmul.bf16.gmra.mxu3 %v7830_v40 }
 0x2c3   : > { %4093 = vmatmul.bf16.gmra.mxu0 %v7829_v22  ;;  %v7833_v22 = vld [vmem:[#allocation26_spill] sm:$0xff] }
 0x2c5   : > { %3649 = vmatmul.bf16.gmra.mxu1 %v7831_v10  ;;  %v3487_v43 = vpop.f32.mrf.mxu3  ;;  %v3881_v29 = vpop.f32.mrf.mxu2 }
 0x2c6   : > { %v3488_v16 = vadd.f32 %v3487_v43, %v3255_v0 }
 0x2c8   : > { %v4056_v7 = vpop.f32.mrf.mxu0  ;;  %v7379_v1 = vadd.f32 %v3576_v17, %v3488_v16  ;;  %v7389_v43 = vpop.f32.mrf.mxu1 }
 0x2ca   : > { %7832 = vst [vmem:[#allocation2_spill] sm:$0xff] %v7379_v1 }
 0x2cd   : > { %v3489_v47 = vpop.f32.mrf.mxu3  ;;  %v3883_v40 = vpop.f32.mrf.mxu2 }
 0x2ce   : > { %v3490_v21 = vadd.f32 %v3489_v47, %v3257_v4 }
 0x2d0   : > { %v4059_v37 = vpop.f32.mrf.mxu0  ;;  %v7383_v44 = vadd.f32 %v3578_v6, %v3490_v21 }
 0x2d2   : > { %3925 = vmatmul.bf16.gmra.mxu2 %v6487_v2  ;;  %3999 = vmatmul.bf16.gmra.mxu3 %v7833_v22  ;;  %v7837_v22 = vld [vmem:[#allocation28_spill] sm:$0xff] }
 0x2d3   : > { %4098 = vmatmul.bf16.gmra.mxu0 %v7831_v10  ;;  %v7400_v10 = vpop.f32.mrf.mxu1 }
 0x2d5   : > { %3654 = vmatmul.bf16.gmra.mxu1 %v7834_v52  ;;  %v3492_v0 = vpop.f32.mrf.mxu3  ;;  %v7393_v47 = vpop.f32.mrf.mxu2 }
 0x2d6   : > { %v3493_v17 = vadd.f32 %v3492_v0, %v3260_v24 }
 0x2d8   : > { %v4061_v16 = vpop.f32.mrf.mxu0  ;;  %v7391_v1 = vadd.f32 %v3581_v54, %v3493_v17 }
 0x2da   : > { %7835 = vst [vmem:[#allocation14_spill] sm:$0xff] %v7391_v1 }
 0x2dd   : > { %v3494_v4 = vpop.f32.mrf.mxu3  ;;  %v7405_v54 = vpop.f32.mrf.mxu2 }
 0x2de   : > { %v3495_v6 = vadd.f32 %v3494_v4, %v3262_v34  ;;  %v7838_v4 = vld [vmem:[#allocation39_spill] sm:$0xff] }
 0x2e0   : > { %v7395_v21 = vpop.f32.mrf.mxu0  ;;  %v7397_v2 = vadd.f32 %v3583_v14, %v3495_v6  ;;  %v3596_v14 = vadd.f32 %v7354_v8, %v7838_v4  ;;  %v7411_v6 = vpop.f32.mrf.mxu1  ;;  %v7426_v8 = vld [vmem:[%s7624_s4] ss:$0 sm:$0xff] }
 0x2e2   : > { %7836 = vst [vmem:[#allocation11_spill] sm:$0xff] %v7397_v2  ;;  %3930 = vmatmul.bf16.gmra.mxu2 %v6585_v55  ;;  %4004 = vmatmul.bf16.gmra.mxu3 %v7837_v22  ;;  %v7416_v22 = vld [vmem:[%s7623_s3] ss:$0 sm:$0xff] }
 0x2e3   : > { %4103 = vmatmul.bf16.gmra.mxu0 %v7834_v52 }
 0x2e5   : > { %3659 = vmatmul.bf16.gmra.mxu1 %v7131_v23  ;;  %v3965_v24 = vpop.f32.mrf.mxu3  ;;  %v7418_v2 = vpop.f32.mrf.mxu2 }
 0x2e6   : > { %v3966_v0 = vadd.f32 %v3965_v24, %v3876_v53  ;;  %v3598_v53 = vadd.f32 %v7359_v45, %v7136_v36 }
 0x2e8   : > { %v4055_v17 = vadd.f32 %v4054_v58, %v3966_v0  ;;  %v7407_v34 = vpop.f32.mrf.mxu0 }
 0x2ea   : > { %v4134_v55 = vadd.f32 %v4055_v17, %v3596_v14  ;;  %v7438_v14 = vpop.f32.mrf.mxu1 }
 0x2ec   : > { %v4169_v58 = vmul.f32 %v7416_v22, %v4134_v55 }
 0x2ed   : > { %v3967_v52 = vpop.f32.mrf.mxu3  ;;  %v7436_v4 = vpop.f32.mrf.mxu2 }
 0x2ee   : > { %v3968_v1 = vadd.f32 %v3967_v52, %v3878_v50  ;;  %v4204_v50 = vadd.f32 %v7426_v8, %v4169_v58 }
 0x2f0   : > { %v4057_v24 = vadd.f32 %v4056_v7, %v3968_v1  ;;  %v7428_v0 = vpop.f32.mrf.mxu0  ;;  %v4236_v1 = vmax.f32 %v4204_v50, 0.0 }
 0x2f2   : > { %3935 = vmatmul.bf16.gmra.mxu2 %v6638_v27  ;;  %v4135_v17 = vadd.f32 %v4057_v24, %v3598_v53  ;;  %4009 = vmatmul.bf16.gmra.mxu3 %v6965_v18  ;;  %v7456_v50 = vpop.f32.mrf.mxu1 }
 0x2f3   : > { %4108 = vmatmul.bf16.gmra.mxu0 %v7131_v23  ;;  %v3601_v23 = vadd.f32 %v7369_v15, %v7164_v28 }
 0x2f4   : > { %v4170_v36 = vmul.f32 %v7416_v22, %v4135_v17 }
 0x2f5   : > { %3664 = vmatmul.bf16.gmra.mxu1 %v7181_v41  ;;  %v3970_v45 = vpop.f32.mrf.mxu3  ;;  %v7452_v17 = vpop.f32.mrf.mxu2 }
 0x2f6   : > { %v4205_v7 = vadd.f32 %v7426_v8, %v4170_v36  ;;  %v3971_v27 = vadd.f32 %v3970_v45, %v3881_v29 }
 0x2f8   : > { %v4237_v55 = vmax.f32 %v4205_v7, 0.0  ;;  %v4060_v18 = vadd.f32 %v4059_v37, %v3971_v27  ;;  %v7442_v52 = vpop.f32.mrf.mxu0  ;;  %v3603_v37 = vadd.f32 %v7376_v13, %v7186_v5 }
 0x2fa   : > { %v4906_v53 = vpack.c.bf16 %v4237_v55, %v4236_v1  ;;  %v4136_v58 = vadd.f32 %v4060_v18, %v3601_v23  ;;  %v7476_v18 = vpop.f32.mrf.mxu1 }
 0x2fc   : > { %4907 = vst [vmem:[%s7447_s20] sm:$0xff] %v4906_v53   ;;  %v4171_v36 = vmul.f32 %v7416_v22, %v4136_v58 }
 0x2fd   : > { %v3972_v24 = vpop.f32.mrf.mxu3  ;;  %v7467_v13 = vpop.f32.mrf.mxu2 }
 0x2fe   : > { %v3973_v29 = vadd.f32 %v3972_v24, %v3883_v40  ;;  %v4206_v15 = vadd.f32 %v7426_v8, %v4171_v36 }
 0x300   : > { %v4062_v45 = vadd.f32 %v4061_v16, %v3973_v29  ;;  %v7459_v7 = vpop.f32.mrf.mxu0 }
 0x302   : > { %3940 = vmatmul.bf16.gmra.mxu2 %v6692_v59  ;;  %v4137_v28 = vadd.f32 %v4062_v45, %v3603_v37  ;;  %4014 = vmatmul.bf16.gmra.mxu3 %v6997_v25  ;;  %v4238_v59 = vmax.f32 %v4206_v15, 0.0 }
 0x303   : > { %4113 = vmatmul.bf16.gmra.mxu0 %v7181_v41  ;;  %v3606_v41 = vadd.f32 %v7381_v46, %v7210_v12  ;;  %v7491_v46 = vpop.f32.mrf.mxu1 }
 0x304   : > { %v4172_v40 = vmul.f32 %v7416_v22, %v4137_v28 }
 0x305   : > { %3669 = vmatmul.bf16.gmra.mxu1 %v7220_v19  ;;  %v3975_v5 = vpop.f32.mrf.mxu3  ;;  %v7479_v24 = vpop.f32.mrf.mxu2 }
 0x306   : > { %v4207_v16 = vadd.f32 %v7426_v8, %v4172_v40  ;;  %v3976_v27 = vadd.f32 %v3975_v5, %v7393_v47  ;;  %v3608_v47 = vadd.f32 %v7389_v43, %v7223_v9 }
 0x308   : > { %v4239_v1 = vmax.f32 %v4207_v16, 0.0  ;;  %v4065_v25 = vadd.f32 %v7395_v21, %v3976_v27  ;;  %v7472_v55 = vpop.f32.mrf.mxu0 }
 0x30a   : > { %v4911_v23 = vpack.c.bf16 %v4239_v1, %v4238_v59  ;;  %v4138_v53 = vadd.f32 %v4065_v25, %v3606_v41 }
 0x30b   : > { %v7503_v59 = vpop.f32.mrf.mxu1 }
 0x30c   : > { %4983 = vst [vmem:[%s7447_s20 + $0x8] sm:$0xff] %v4911_v23   ;;  %v4173_v21 = vmul.f32 %v7416_v22, %v4138_v53  ;;  %v7839_v53 = vmov 0  }
 0x30d   : > { %v3977_v58 = vpop.f32.mrf.mxu3  ;;  %v7495_v45 = vpop.f32.mrf.mxu2 }
 0x30e   : > { %v3978_v29 = vadd.f32 %v3977_v58, %v7405_v54  ;;  %v4208_v54 = vadd.f32 %v7426_v8, %v4173_v21 }
 0x310   : > { %v4067_v37 = vadd.f32 %v7407_v34, %v3978_v29  ;;  %v7486_v36 = vpop.f32.mrf.mxu0 }
 0x312   : > { %3945 = vmatmul.bf16.gmra.mxu2 %v6764_v39  ;;  %v4139_v12 = vadd.f32 %v4067_v37, %v3608_v47  ;;  %4019 = vmatmul.bf16.gmra.mxu3 %v7048_v11  ;;  %v4240_v39 = vmax.f32 %v4208_v54, 0.0 }
 0x313   : > { %4118 = vmatmul.bf16.gmra.mxu0 %v7220_v19  ;;  %v3611_v19 = vadd.f32 %v7400_v10, %v7235_v60  ;;  %v3627_v29 = vpop.f32.mrf.mxu1 }
 0x314   : > { %v4174_v9 = vmul.f32 %v7416_v22, %v4139_v12 }
 0x315   : > { %v3980_v43 = vpop.f32.mrf.mxu3  ;;  %v3906_v25 = vpop.f32.mrf.mxu2 }
 0x316   : > { %v4209_v34 = vadd.f32 %v7426_v8, %v4174_v9  ;;  %v3981_v28 = vadd.f32 %v3980_v43, %v7418_v2  ;;  %v3613_v2 = vadd.f32 %v7411_v6, %v7248_v61 }
 0x318   : > { %v4241_v15 = vmax.f32 %v4209_v34, 0.0  ;;  %v4070_v40 = vadd.f32 %v7428_v0, %v3981_v28  ;;  %v4081_v11 = vpop.f32.mrf.mxu0  ;;  %v3618_v34 = vadd.f32 %v7456_v50, %v7272_v3 }
 0x31a   : > { %v4916_v5 = vpack.c.bf16 %v4241_v15, %v4240_v39  ;;  %v4140_v16 = vadd.f32 %v4070_v40, %v3611_v19 }
 0x31b   : > { %v3630_v39 = vpop.f32.mrf.mxu1 }
 0x31c   : > { %4984 = vst [vmem:[%s7447_s20 + $0x10] sm:$0xff] %v4916_v5   ;;  %v4175_v41 = vmul.f32 %v7416_v22, %v4140_v16 }
 0x31d   : > { %v3982_v27 = vpop.f32.mrf.mxu3  ;;  %v3908_v37 = vpop.f32.mrf.mxu2 }
 0x31e   : > { %v3983_v1 = vadd.f32 %v3982_v27, %v7436_v4  ;;  %v4210_v10 = vadd.f32 %v7426_v8, %v4175_v41 }
 0x320   : > { %v4072_v0 = vadd.f32 %v7442_v52, %v3983_v1  ;;  %v4084_v23 = vpop.f32.mrf.mxu0  ;;  %v4242_v52 = vmax.f32 %v4210_v10, 0.0 }
 0x322   : > { %3950 = vmatmul.bf16.gmra.mxu2 %v7839_v53  ;;  %v4141_v60 = vadd.f32 %v4072_v0, %v3613_v2  ;;  %4024 = vmatmul.bf16.gmra.mxu3 %v7087_v33  ;;  %v3616_v33 = vadd.f32 %v7438_v14, %v7268_v56 }
 0x323   : > { %4123 = vmatmul.bf16.gmra.mxu0 %v7245_v26  ;;  %v3632_v27 = vpop.f32.mrf.mxu1 }
 0x324   : > { %v4176_v4 = vmul.f32 %v7416_v22, %v4141_v60  ;;  %v3623_v60 = vadd.f32 %v7491_v46, %v7284_v62 }
 0x325   : > { %v3985_v58 = vpop.f32.mrf.mxu3  ;;  %v3911_v56 = vpop.f32.mrf.mxu2 }
 0x326   : > { %v4211_v61 = vadd.f32 %v7426_v8, %v4176_v4  ;;  %v3986_v6 = vadd.f32 %v3985_v58, %v7452_v17  ;;  %v7840_v4 = vld [vmem:[#allocation40_spill] sm:$0xff] }
 0x328   : > { %v4243_v47 = vmax.f32 %v4211_v61, 0.0  ;;  %v4075_v21 = vadd.f32 %v7459_v7, %v3986_v6  ;;  %v4086_v26 = vpop.f32.mrf.mxu0 }
 0x32a   : > { %v4921_v12 = vpack.c.bf16 %v4243_v47, %v4242_v52  ;;  %v4142_v54 = vadd.f32 %v4075_v21, %v3616_v33  ;;  %v7841_v33 = vld [vmem:[#allocation23_spill] sm:$0xff] }
 0x32b   : > { %v3635_v61 = vpop.f32.mrf.mxu1 }
 0x32c   : > { %4985 = vst [vmem:[%s7447_s20 + $0x18] sm:$0xff] %v4921_v12   ;;  %v4177_v17 = vmul.f32 %v7416_v22, %v4142_v54 }
 0x32d   : > { %v3987_v9 = vpop.f32.mrf.mxu3  ;;  %v3913_v41 = vpop.f32.mrf.mxu2 }
 0x32e   : > { %v3988_v43 = vadd.f32 %v3987_v9, %v7467_v13  ;;  %v4212_v14 = vadd.f32 %v7426_v8, %v4177_v17 }
 0x330   : > { %v4077_v28 = vadd.f32 %v7472_v55, %v3988_v43  ;;  %v4089_v40 = vpop.f32.mrf.mxu0  ;;  %v4244_v19 = vmax.f32 %v4212_v14, 0.0 }
 0x332   : > { %v4143_v7 = vadd.f32 %v4077_v28, %v3618_v34  ;;  %4029 = vmatmul.bf16.gmra.mxu3 %v7141_v38  ;;  %v3621_v38 = vadd.f32 %v7476_v18, %v7280_v49  ;;  %v7842_v34 = vld [vmem:[#allocation18_spill] sm:$0xff] }
 0x333   : > { %4128 = vmatmul.bf16.gmra.mxu0 %v6726_v35  ;;  %v3628_v17 = vadd.f32 %v3627_v29, %v7842_v34  ;;  %v3637_v28 = vpop.f32.mrf.mxu1  ;;  %v7846_v34 = vld [vmem:[#allocation20_spill] sm:$0xff] }
 0x334   : > { %v4178_v15 = vmul.f32 %v7416_v22, %v4143_v7 }
 0x335   : > { %v3990_v13 = vpop.f32.mrf.mxu3  ;;  %v3916_v52 = vpop.f32.mrf.mxu2 }
 0x336   : > { %v4213_v3 = vadd.f32 %v7426_v8, %v4178_v15  ;;  %v3991_v50 = vadd.f32 %v3990_v13, %v7479_v24 }
 0x338   : > { %v4245_v55 = vmax.f32 %v4213_v3, 0.0  ;;  %v4080_v5 = vadd.f32 %v7486_v36, %v3991_v50  ;;  %v4091_v53 = vpop.f32.mrf.mxu0 }
 0x33a   : > { %v4926_v16 = vpack.c.bf16 %v4245_v55, %v4244_v19  ;;  %v4144_v1 = vadd.f32 %v4080_v5, %v3621_v38  ;;  %v7843_v5 = vld [vmem:[#allocation7_spill] sm:$0xff] }
 0x33b   : > { %v3631_v38 = vadd.f32 %v3630_v39, %v7843_v5 }
 0x33c   : > { %4986 = vst [vmem:[%s7447_s20 + $0x20] sm:$0xff] %v4926_v16   ;;  %v4179_v24 = vmul.f32 %v7416_v22, %v4144_v1 }
 0x33d   : > { %v3992_v2 = vpop.f32.mrf.mxu3 }
 0x33e   : > { %v3993_v0 = vadd.f32 %v3992_v2, %v7495_v45  ;;  %v4214_v49 = vadd.f32 %v7426_v8, %v4179_v24  ;;  %v7844_v24 = vld [vmem:[#allocation16_spill] sm:$0xff] }
 0x340   : > { %v4082_v10 = vadd.f32 %v4081_v11, %v3993_v0  ;;  %v4246_v47 = vmax.f32 %v4214_v49, 0.0  ;;  %v4094_v46 = vpop.f32.mrf.mxu0  ;;  %v3626_v11 = vadd.f32 %v7503_v59, %v7841_v33 }
 0x342   : > { %v4145_v36 = vadd.f32 %v4082_v10, %v3623_v60  ;;  %4034 = vmatmul.bf16.gmra.mxu3 %v7840_v4  ;;  %v3633_v10 = vadd.f32 %v3632_v27, %v7844_v24  ;;  %v7845_v27 = vld [vmem:[#allocation9_spill] sm:$0xff] }
 0x343   : > { %v3636_v33 = vadd.f32 %v3635_v61, %v7845_v27 }
 0x344   : > { %v4180_v18 = vmul.f32 %v7416_v22, %v4145_v36 }
 0x345   : > { %v3995_v58 = vpop.f32.mrf.mxu3 }
 0x346   : > { %v4215_v6 = vadd.f32 %v7426_v8, %v4180_v18  ;;  %v3996_v45 = vadd.f32 %v3995_v58, %v3906_v25  ;;  %v3918_v25 = vpop.f32.mrf.mxu2 }
 0x348   : > { %v4247_v21 = vmax.f32 %v4215_v6, 0.0  ;;  %v4085_v62 = vadd.f32 %v4084_v23, %v3996_v45  ;;  %v4096_v23 = vpop.f32.mrf.mxu0 }
 0x34a   : > { %v4931_v12 = vpack.c.bf16 %v4247_v21, %v4246_v47  ;;  %v4146_v54 = vadd.f32 %v4085_v62, %v3626_v11 }
 0x34c   : > { %4987 = vst [vmem:[%s7447_s20 + $0x28] sm:$0xff] %v4931_v12   ;;  %v4181_v7 = vmul.f32 %v7416_v22, %v4146_v54 }
 0x34d   : > { %v3997_v9 = vpop.f32.mrf.mxu3 }
 0x34e   : > { %v3998_v43 = vadd.f32 %v3997_v9, %v3908_v37  ;;  %v4216_v13 = vadd.f32 %v7426_v8, %v4181_v7  ;;  %v3921_v1 = vpop.f32.mrf.mxu2 }
 0x350   : > { %v4087_v14 = vadd.f32 %v4086_v26, %v3998_v43  ;;  %v4248_v19 = vmax.f32 %v4216_v13, 0.0  ;;  %v3640_v26 = vpop.f32.mrf.mxu1  ;;  %v4099_v0 = vpop.f32.mrf.mxu0 }
 0x352   : > { %v4147_v15 = vadd.f32 %v4087_v14, %v3628_v17  ;;  %4039 = vmatmul.bf16.gmra.mxu3 %v6726_v35  ;;  %v3638_v17 = vadd.f32 %v3637_v28, %v7846_v34  ;;  %v3641_v28 = vadd.f32 %v3640_v26, %v7324_v57 }
 0x354   : > { %v4182_v59 = vmul.f32 %v7416_v22, %v4147_v15 }
 0x355   : > { %v4000_v3 = vpop.f32.mrf.mxu3 }
 0x356   : > { %v4217_v50 = vadd.f32 %v7426_v8, %v4182_v59  ;;  %v4001_v37 = vadd.f32 %v4000_v3, %v3911_v56  ;;  %v3923_v58 = vpop.f32.mrf.mxu2 }
 0x358   : > { %v4249_v29 = vmax.f32 %v4217_v50, 0.0  ;;  %v4090_v55 = vadd.f32 %v4089_v40, %v4001_v37  ;;  %v3642_v49 = vpop.f32.mrf.mxu1  ;;  %v4101_v47 = vpop.f32.mrf.mxu0 }
 0x35a   : > { %v4936_v16 = vpack.c.bf16 %v4249_v29, %v4248_v19  ;;  %v4148_v2 = vadd.f32 %v4090_v55, %v3631_v38 }
 0x35c   : > { %4988 = vst [vmem:[%s7447_s20 + $0x30] sm:$0xff] %v4936_v16   ;;  %v4183_v36 = vmul.f32 %v7416_v22, %v4148_v2  ;;  %v3643_v2 = vadd.f32 %v3642_v49, %v7327_v32 }
 0x35d   : > { %v4002_v35 = vpop.f32.mrf.mxu3 }
 0x35e   : > { %v4003_v60 = vadd.f32 %v4002_v35, %v3913_v41  ;;  %v4218_v40 = vadd.f32 %v7426_v8, %v4183_v36  ;;  %v3926_v43 = vpop.f32.mrf.mxu2 }
 0x360   : > { %v4092_v4 = vadd.f32 %v4091_v53, %v4003_v60  ;;  %v4250_v21 = vmax.f32 %v4218_v40, 0.0  ;;  %v3645_v54 = vpop.f32.mrf.mxu1 }
 0x361   : > { %v3646_v32 = vadd.f32 %v3645_v54, %v7334_v51 }
 0x362   : > { %v4149_v56 = vadd.f32 %v4092_v4, %v3633_v10 }
 0x364   : > { %v4184_v39 = vmul.f32 %v7416_v22, %v4149_v56 }
 0x365   : > { %v4005_v18 = vpop.f32.mrf.mxu3 }
 0x366   : > { %v4219_v6 = vadd.f32 %v7426_v8, %v4184_v39  ;;  %v4006_v45 = vadd.f32 %v4005_v18, %v3916_v52  ;;  %v4104_v52 = vpop.f32.mrf.mxu0  ;;  %v3928_v29 = vpop.f32.mrf.mxu2 }
 0x368   : > { %v4251_v41 = vmax.f32 %v4219_v6, 0.0  ;;  %v4095_v62 = vadd.f32 %v4094_v46, %v4006_v45  ;;  %v3647_v50 = vpop.f32.mrf.mxu1 }
 0x36a   : > { %v4941_v11 = vpack.c.bf16 %v4251_v41, %v4250_v21  ;;  %v4150_v53 = vadd.f32 %v4095_v62, %v3636_v33  ;;  %v7847_v62 = vld [vmem:[#allocation25_spill] sm:$0xff] }
 0x36b   : > { %v3648_v27 = vadd.f32 %v3647_v50, %v7847_v62 }
 0x36c   : > { %4989 = vst [vmem:[%s7447_s20 + $0x38] sm:$0xff] %v4941_v11   ;;  %v4185_v7 = vmul.f32 %v7416_v22, %v4150_v53 }
 0x36d   : > { %v4007_v12 = vpop.f32.mrf.mxu3 }
 0x36e   : > { %v4008_v9 = vadd.f32 %v4007_v12, %v3918_v25  ;;  %v4220_v13 = vadd.f32 %v7426_v8, %v4185_v7  ;;  %v3931_v10 = vpop.f32.mrf.mxu2 }
 0x370   : > { %v4097_v14 = vadd.f32 %v4096_v23, %v4008_v9  ;;  %v4252_v37 = vmax.f32 %v4220_v13, 0.0  ;;  %v4106_v23 = vpop.f32.mrf.mxu0 }
 0x372   : > { %v4151_v15 = vadd.f32 %v4097_v14, %v3638_v17 }
 0x374   : > { %v4186_v46 = vmul.f32 %v7416_v22, %v4151_v15 }
 0x375   : > { %v4010_v61 = vpop.f32.mrf.mxu3 }
 0x376   : > { %v4221_v59 = vadd.f32 %v7426_v8, %v4186_v46  ;;  %v4011_v3 = vadd.f32 %v4010_v61, %v3921_v1  ;;  %v3650_v1 = vpop.f32.mrf.mxu1 }
 0x377   : > { %v3651_v13 = vadd.f32 %v3650_v1, %v7344_v48 }
 0x378   : > { %v4253_v25 = vmax.f32 %v4221_v59, 0.0  ;;  %v4100_v19 = vadd.f32 %v4099_v0, %v4011_v3  ;;  %v4109_v26 = vpop.f32.mrf.mxu0 }
 0x37a   : > { %v4946_v55 = vpack.c.bf16 %v4253_v25, %v4252_v37  ;;  %v4152_v5 = vadd.f32 %v4100_v19, %v3641_v28 }
 0x37c   : > { %4990 = vst [vmem:[%s7447_s20 + $0x40] sm:$0xff] %v4946_v55   ;;  %v4187_v35 = vmul.f32 %v7416_v22, %v4152_v5 }
 0x37d   : > { %v4012_v38 = vpop.f32.mrf.mxu3 }
 0x37e   : > { %v4013_v16 = vadd.f32 %v4012_v38, %v3923_v58  ;;  %v4222_v0 = vadd.f32 %v7426_v8, %v4187_v35  ;;  %v3652_v58 = vpop.f32.mrf.mxu1 }
 0x37f   : > { %v3653_v50 = vadd.f32 %v3652_v58, %v7347_v30 }
 0x380   : > { %v4102_v60 = vadd.f32 %v4101_v47, %v4013_v16  ;;  %v4254_v40 = vmax.f32 %v4222_v0, 0.0  ;;  %v3933_v47 = vpop.f32.mrf.mxu2  ;;  %v4111_v41 = vpop.f32.mrf.mxu0 }
 0x382   : > { %v4153_v24 = vadd.f32 %v4102_v60, %v3643_v2 }
 0x384   : > { %v4188_v36 = vmul.f32 %v7416_v22, %v4153_v24 }
 0x385   : > { %v4015_v57 = vpop.f32.mrf.mxu3 }
 0x386   : > { %v4223_v4 = vadd.f32 %v7426_v8, %v4188_v36  ;;  %v4016_v56 = vadd.f32 %v4015_v57, %v3926_v43  ;;  %v3655_v54 = vpop.f32.mrf.mxu1 }
 0x387   : > { %v3656_v30 = vadd.f32 %v3655_v54, %v7356_v20 }
 0x388   : > { %v4255_v39 = vmax.f32 %v4223_v4, 0.0  ;;  %v4105_v18 = vadd.f32 %v4104_v52, %v4016_v56  ;;  %v3936_v17 = vpop.f32.mrf.mxu2  ;;  %v4114_v15 = vpop.f32.mrf.mxu0 }
 0x38a   : > { %v4951_v49 = vpack.c.bf16 %v4255_v39, %v4254_v40  ;;  %v4154_v6 = vadd.f32 %v4105_v18, %v3646_v32 }
 0x38c   : > { %4991 = vst [vmem:[%s7447_s20 + $0x48] sm:$0xff] %v4951_v49   ;;  %v4189_v33 = vmul.f32 %v7416_v22, %v4154_v6 }
 0x38d   : > { %v4017_v45 = vpop.f32.mrf.mxu3 }
 0x38e   : > { %v4018_v21 = vadd.f32 %v4017_v45, %v3928_v29  ;;  %v4224_v12 = vadd.f32 %v7426_v8, %v4189_v33  ;;  %v3657_v37 = vpop.f32.mrf.mxu1 }
 0x38f   : > { %v3658_v4 = vadd.f32 %v3657_v37, %v7361_v31 }
 0x390   : > { %v4107_v11 = vadd.f32 %v4106_v23, %v4018_v21  ;;  %v4256_v7 = vmax.f32 %v4224_v12, 0.0  ;;  %v3938_v29 = vpop.f32.mrf.mxu2  ;;  %v4116_v55 = vpop.f32.mrf.mxu0 }
 0x392   : > { %v4155_v53 = vadd.f32 %v4107_v11, %v3648_v27 }
 0x394   : > { %v4190_v9 = vmul.f32 %v7416_v22, %v4155_v53 }
 0x395   : > { %v4020_v51 = vpop.f32.mrf.mxu3 }
 0x396   : > { %v4225_v43 = vadd.f32 %v7426_v8, %v4190_v9  ;;  %v4021_v34 = vadd.f32 %v4020_v51, %v3931_v10  ;;  %v3660_v1 = vpop.f32.mrf.mxu1 }
 0x397   : > { %v3661_v31 = vadd.f32 %v3660_v1, %v7367_v63 }
 0x398   : > { %v4257_v14 = vmax.f32 %v4225_v43, 0.0  ;;  %v4110_v52 = vadd.f32 %v4109_v26, %v4021_v34  ;;  %v3941_v10 = vpop.f32.mrf.mxu2  ;;  %v4119_v57 = vpop.f32.mrf.mxu0 }
 0x39a   : > { %v4956_v46 = vpack.c.bf16 %v4257_v14, %v4256_v7  ;;  %v4156_v61 = vadd.f32 %v4110_v52, %v3651_v13 }
 0x39c   : > { %4992 = vst [vmem:[%s7447_s20 + $0x50] sm:$0xff] %v4956_v46   ;;  %v4191_v25 = vmul.f32 %v7416_v22, %v4156_v61 }
 0x39d   : > { %v4022_v59 = vpop.f32.mrf.mxu3 }
 0x39e   : > { %v4023_v3 = vadd.f32 %v4022_v59, %v3933_v47  ;;  %v4226_v23 = vadd.f32 %v7426_v8, %v4191_v25  ;;  %v3662_v18 = vpop.f32.mrf.mxu1 }
 0x39f   : > { %v3663_v51 = vadd.f32 %v3662_v18, %v7371_v42  ;;  %v7848_v42 = vld [vmem:[#allocation2_spill] sm:$0xff] }
 0x3a0   : > { %v4112_v19 = vadd.f32 %v4111_v41, %v4023_v3  ;;  %v4258_v2 = vmax.f32 %v4226_v23, 0.0  ;;  %v3943_v49 = vpop.f32.mrf.mxu2  ;;  %v4121_v47 = vpop.f32.mrf.mxu0 }
 0x3a2   : > { %v4157_v28 = vadd.f32 %v4112_v19, %v3653_v50 }
 0x3a4   : > { %v4192_v5 = vmul.f32 %v7416_v22, %v4157_v28 }
 0x3a5   : > { %v4025_v48 = vpop.f32.mrf.mxu3 }
 0x3a6   : > { %v4227_v38 = vadd.f32 %v7426_v8, %v4192_v5  ;;  %v4026_v16 = vadd.f32 %v4025_v48, %v3936_v17  ;;  %v3665_v53 = vpop.f32.mrf.mxu1 }
 0x3a7   : > { %v3666_v50 = vadd.f32 %v3665_v53, %v7848_v42 }
 0x3a8   : > { %v4259_v35 = vmax.f32 %v4227_v38, 0.0  ;;  %v4115_v60 = vadd.f32 %v4114_v15, %v4026_v16  ;;  %v3946_v9 = vpop.f32.mrf.mxu2  ;;  %v4124_v34 = vpop.f32.mrf.mxu0 }
 0x3aa   : > { %v4961_v24 = vpack.c.bf16 %v4259_v35, %v4258_v2  ;;  %v4158_v0 = vadd.f32 %v4115_v60, %v3656_v30 }
 0x3ac   : > { %4993 = vst [vmem:[%s7447_s20 + $0x58] sm:$0xff] %v4961_v24   ;;  %v4193_v56 = vmul.f32 %v7416_v22, %v4158_v0 }
 0x3ad   : > { %v4027_v36 = vpop.f32.mrf.mxu3 }
 0x3ae   : > { %v4028_v26 = vadd.f32 %v4027_v36, %v3938_v29  ;;  %v4228_v32 = vadd.f32 %v7426_v8, %v4193_v56  ;;  %v3667_v13 = vpop.f32.mrf.mxu1 }
 0x3b0   : > { %v4117_v40 = vadd.f32 %v4116_v55, %v4028_v26  ;;  %v4260_v21 = vmax.f32 %v4228_v32, 0.0  ;;  %v3948_v3 = vpop.f32.mrf.mxu2  ;;  %v4126_v25 = vpop.f32.mrf.mxu0  ;;  %v3668_v55 = vadd.f32 %v3667_v13, %v7383_v44  ;;  %v7849_v44 = vld [vmem:[#allocation14_spill] sm:$0xff] }
 0x3b2   : > { %v4159_v39 = vadd.f32 %v4117_v40, %v3658_v4 }
 0x3b4   : > { %v4194_v20 = vmul.f32 %v7416_v22, %v4159_v39 }
 0x3b5   : > { %v4030_v58 = vpop.f32.mrf.mxu3 }
 0x3b6   : > { %v4229_v6 = vadd.f32 %v7426_v8, %v4194_v20  ;;  %v4031_v45 = vadd.f32 %v4030_v58, %v3941_v10  ;;  %v3670_v48 = vpop.f32.mrf.mxu1  ;;  %v7850_v20 = vld [vmem:[#allocation11_spill] sm:$0xff] }
 0x3b8   : > { %v4261_v41 = vmax.f32 %v4229_v6, 0.0  ;;  %v4120_v62 = vadd.f32 %v4119_v57, %v4031_v45  ;;  %v3951_v16 = vpop.f32.mrf.mxu2  ;;  %v4129_v60 = vpop.f32.mrf.mxu0  ;;  %v3671_v57 = vadd.f32 %v3670_v48, %v7849_v44 }
 0x3ba   : > { %v4966_v27 = vpack.c.bf16 %v4261_v41, %v4260_v21  ;;  %v4160_v33 = vadd.f32 %v4120_v62, %v3661_v31 }
 0x3bc   : > { %4994 = vst [vmem:[%s7447_s20 + $0x60] sm:$0xff] %v4966_v27   ;;  %v4195_v54 = vmul.f32 %v7416_v22, %v4160_v33 }
 0x3bd   : > { %v4032_v11 = vpop.f32.mrf.mxu3 }
 0x3be   : > { %v4033_v12 = vadd.f32 %v4032_v11, %v3943_v49  ;;  %v4230_v7 = vadd.f32 %v7426_v8, %v4195_v54  ;;  %v3672_v4 = vpop.f32.mrf.mxu1 }
 0x3bf   : > { %v3673_v49 = vadd.f32 %v3672_v4, %v7850_v20 }
 0x3c0   : > { %v4122_v43 = vadd.f32 %v4121_v47, %v4033_v12  ;;  %v4262_v46 = vmax.f32 %v4230_v7, 0.0  ;;  %v3953_v40 = vpop.f32.mrf.mxu2  ;;  %v4131_v32 = vpop.f32.mrf.mxu0 }
 0x3c2   : > { %v4161_v17 = vadd.f32 %v4122_v43, %v3663_v51 }
 0x3c4   : > { %v4196_v14 = vmul.f32 %v7416_v22, %v4161_v17 }
 0x3c5   : > { %v4035_v63 = vpop.f32.mrf.mxu3 }
 0x3c6   : > { %v4231_v52 = vadd.f32 %v7426_v8, %v4196_v14  ;;  %v4036_v15 = vadd.f32 %v4035_v63, %v3946_v9 }
 0x3c8   : > { %v4263_v61 = vmax.f32 %v4231_v52, 0.0  ;;  %v4125_v59 = vadd.f32 %v4124_v34, %v4036_v15 }
 0x3ca   : > { %v4971_v37 = vpack.c.bf16 %v4263_v61, %v4262_v46  ;;  %v4162_v19 = vadd.f32 %v4125_v59, %v3666_v50 }
 0x3cc   : > { %4995 = vst [vmem:[%s7447_s20 + $0x68] sm:$0xff] %v4971_v37   ;;  %v4197_v23 = vmul.f32 %v7416_v22, %v4162_v19 }
 0x3cd   : > { %v4037_v29 = vpop.f32.mrf.mxu3 }
 0x3ce   : > { %v4038_v28 = vadd.f32 %v4037_v29, %v3948_v3  ;;  %v4232_v2 = vadd.f32 %v7426_v8, %v4197_v23 }
 0x3d0   : > { %v4127_v5 = vadd.f32 %v4126_v25, %v4038_v28  ;;  %v4264_v10 = vmax.f32 %v4232_v2, 0.0 }
 0x3d2   : > { %v4163_v38 = vadd.f32 %v4127_v5, %v3668_v55 }
 0x3d4   : > { %v4198_v35 = vmul.f32 %v7416_v22, %v4163_v38 }
 0x3d5   : > { %v4040_v30 = vpop.f32.mrf.mxu3 }
 0x3d6   : > { %v4233_v1 = vadd.f32 %v7426_v8, %v4198_v35  ;;  %v4041_v24 = vadd.f32 %v4040_v30, %v3951_v16 }
 0x3d8   : > { %v4265_v0 = vmax.f32 %v4233_v1, 0.0  ;;  %v4130_v36 = vadd.f32 %v4129_v60, %v4041_v24 }
 0x3da   : > { %v4976_v26 = vpack.c.bf16 %v4265_v0, %v4264_v10  ;;  %v4164_v56 = vadd.f32 %v4130_v36, %v3671_v57 }
 0x3dc   : > { %4996 = vst [vmem:[%s7447_s20 + $0x70] sm:$0xff] %v4976_v26   ;;  %v4199_v58 = vmul.f32 %v7416_v22, %v4164_v56 }
 0x3dd   : > { %v4042_v39 = vpop.f32.mrf.mxu3 }
 0x3de   : > { %v4043_v18 = vadd.f32 %v4042_v39, %v3953_v40  ;;  %v4234_v47 = vadd.f32 %v7426_v8, %v4199_v58 }
 0x3e0   : > { %v4132_v6 = vadd.f32 %v4131_v32, %v4043_v18  ;;  %v4266_v62 = vmax.f32 %v4234_v47, 0.0 }
 0x3e2   : > { %v4165_v45 = vadd.f32 %v4132_v6, %v3673_v49 }
 0x3e4   : > { %v4200_v21 = vmul.f32 %v7416_v22, %v4165_v45 }
 0x3e6   : > { %v4235_v41 = vadd.f32 %v7426_v8, %v4200_v21 }
 0x3e8   : > { %v4267_v31 = vmax.f32 %v4235_v41, 0.0 }
 0x3ea   : > { %v4981_v27 = vpack.c.bf16 %v4267_v31, %v4266_v62 }
 0x3ec   : > { %4997 = vst [vmem:[%s7447_s20 + $0x78] sm:$0xff] %v4981_v27  }
 0x3ed PF: > { %s15_s18 = sadd.s32 1, %s5039_s18  }
 0x3ee   : > { %p12_p4 = scmp.ge.s32.totalorder %s15_s18, 4  }
 0x3f0   :  { %14 = sbr.rel (!%p12_p4) target bundleno = 1 (0x1), region = 80 }

</bundles_post_ra>
